<compile_context>
chip_gen: v7x
topology: tpu7x:2x2x1
jax: 0.10.0
libtpu: 0.0.40
codegen_flags: <defaults>
</compile_context>

<pallas_src>
import functools

import jax
import jax.numpy as jnp
from jax.experimental import pallas as pl
from jax.experimental.pallas import tpu as pltpu

D_IN, HIDDEN, D_OUT = 512, 4096, 512


def _round_up(n, m):
    return (n + m - 1) // m * m


def _generator_kernel(x_ref, w1t_ref, b1_ref, w2t_ref, b2_ref, o_ref):
    # x_ref   : (TB, D_IN)   f32   resident across the hidden (reduction) axis
    # w1t_ref : (D_IN, TH)   bf16  hidden tile of W1^T
    # b1_ref  : (1, TH)      f32   hidden tile of b1
    # w2t_ref : (TH, D_OUT)  bf16  hidden tile of W2^T (contiguous rows)
    # b2_ref  : (1, D_OUT)   f32   resident
    # o_ref   : (TB, D_OUT)  f32   same block for every j -> resident f32
    #                              accumulator; written back to HBM once
    j = pl.program_id(1)

    @pl.when(j == 0)
    def _():
        # Initialise the resident output block with b2 (added exactly once).
        o_ref[...] = jnp.broadcast_to(b2_ref[...], o_ref.shape)

    # First linear (this hidden tile) + bias + ReLU; bf16 MXU, f32 accumulate.
    h = jnp.dot(x_ref[...].astype(jnp.bfloat16), w1t_ref[...],
                preferred_element_type=jnp.float32)
    h = jnp.maximum(h + b1_ref[...], 0.0)                       # (TB, TH) f32

    # Second linear: accumulate this hidden tile's contribution into o_ref.
    o_ref[...] += jnp.dot(h.astype(jnp.bfloat16), w2t_ref[...],
                          preferred_element_type=jnp.float32)


def prepare_generator_params(w1, b1, w2, b2, weight_dtype=jnp.bfloat16):
    """One-time parameter prep — keeps transposes/casts OUT of the forward path.

    w1: (HIDDEN, D_IN), b1: (HIDDEN,), w2: (D_OUT, HIDDEN), b2: (D_OUT,)
    Returns (w1t, b1r, w2t, b2r) with bf16 weights and 2-D f32 bias rows.
    """
    w1t = jnp.asarray(w1).T.astype(weight_dtype)            # (D_IN, HIDDEN)
    w2t = jnp.asarray(w2).T.astype(weight_dtype)            # (HIDDEN, D_OUT)
    b1r = jnp.asarray(b1).reshape(1, -1).astype(jnp.float32)
    b2r = jnp.asarray(b2).reshape(1, -1).astype(jnp.float32)
    return w1t, b1r, w2t, b2r


@functools.partial(jax.jit, static_argnames=("tb", "th"))
def generator_forward(x, w1t, b1r, w2t, b2r, *, tb=256, th=2048):
    """Generator.forward with prepared params: relu(x@W1.T+b1)@W2.T+b2."""
    B, d_in = x.shape
    d_in_w, hidden = w1t.shape
    hidden_w, d_out = w2t.shape
    assert d_in == d_in_w and hidden == hidden_w

    th = min(th, hidden)
    assert hidden % th == 0

    # Pad batch up to a multiple-of-8 tile: keeps every store full-tile and
    # lane/sublane aligned (no masked partial-sublane stores).
    tb = min(tb, _round_up(B, 8))
    b_pad = _round_up(B, tb)
    if b_pad != B:
        x = jnp.pad(x, ((0, b_pad - B), (0, 0)))

    grid = (b_pad // tb, hidden // th)          # reduction (hidden) axis last

    grid_spec = pltpu.PrefetchScalarGridSpec(
        num_scalar_prefetch=0,
        grid=grid,
        in_specs=[
            pl.BlockSpec((tb, d_in), lambda i, j: (i, 0)),    # x (resident over j)
            pl.BlockSpec((d_in, th), lambda i, j: (0, j)),    # W1^T hidden tile
            pl.BlockSpec((1, th), lambda i, j: (0, j)),       # b1 hidden tile
            pl.BlockSpec((th, d_out), lambda i, j: (j, 0)),   # W2^T hidden tile
            pl.BlockSpec((1, d_out), lambda i, j: (0, 0)),    # b2 (resident)
        ],
        out_specs=pl.BlockSpec((tb, d_out), lambda i, j: (i, 0)),
    )

    # Advisory cost estimate: the call is dominated by streaming the (bf16)
    # weights once per batch tile; lets XLA overlap surrounding ops.
    n_batch_tiles = b_pad // tb
    weight_bytes = (w1t.size * w1t.dtype.itemsize
                    + w2t.size * w2t.dtype.itemsize
                    + b1r.size * b1r.dtype.itemsize
                    + b2r.size * b2r.dtype.itemsize)
    bytes_accessed = (n_batch_tiles * weight_bytes
                      + x.size * x.dtype.itemsize
                      + b_pad * d_out * 4)
    cost = pl.CostEstimate(
        flops=2 * b_pad * (d_in * hidden + hidden * d_out),
        transcendentals=0,
        bytes_accessed=int(bytes_accessed))

    out = pl.pallas_call(
        _generator_kernel,
        out_shape=jax.ShapeDtypeStruct((b_pad, d_out), jnp.float32),
        grid_spec=grid_spec,
        compiler_params=pltpu.CompilerParams(
            dimension_semantics=("parallel", "arbitrary"),
            # Needs ~9 MiB (double-buffered 2 MiB bf16 weight tiles at th=2048
            # plus small x/out/bias tiles); 32 MiB fits every TPU generation.
            vmem_limit_bytes=32 * 1024 * 1024),
        cost_estimate=cost,
    )(x, w1t, b1r, w2t, b2r)

    return out[:B]


if __name__ == "__main__":
    # Dimensions fixed by the module: Linear(512, 4096) -> ReLU -> Linear(4096, 512).
    B = 8  # small batch for the example

    key = jax.random.PRNGKey(0)
    k_x, k_w1, k_w2 = jax.random.split(key, 3)

    # weights_init: Linear weights ~ N(0, 0.02), biases = 0.
    w1 = 0.02 * jax.random.normal(k_w1, (HIDDEN, D_IN), dtype=jnp.float32)
    b1 = jnp.zeros((HIDDEN,), dtype=jnp.float32)
    w2 = 0.02 * jax.random.normal(k_w2, (D_OUT, HIDDEN), dtype=jnp.float32)
    b2 = jnp.zeros((D_OUT,), dtype=jnp.float32)

    x = jax.random.normal(k_x, (B, D_IN), dtype=jnp.float32)

    # One-time parameter preparation (transpose + bf16 cast), then the forward.
    params = prepare_generator_params(w1, b1, w2, b2)
    out = jax.block_until_ready(generator_forward(x, *params))

    # Pure-JAX f32 reference (original module semantics).
    ref = jnp.maximum(x @ w1.T + b1, 0.0) @ w2.T + b2

    assert out.shape == (B, D_OUT), out.shape
    max_err = float(jnp.max(jnp.abs(out - ref)))
    # bf16 weight streaming perturbs numerics slightly; 2e-2 gives safe margin.
    assert jnp.allclose(out, ref, atol=2e-2, rtol=2e-2), f"mismatch vs reference: {max_err}"
    print("KERNEL_OK")
</pallas_src>

<mosaic_0001>
module attributes {stable_mosaic.version = 11 : i64} {
  func.func @_generator_kernel(%arg0: i32, %arg1: i32, %arg2: memref<8x512xf32, #tpu.memory_space<vmem>>, %arg3: memref<512x2048xbf16, #tpu.memory_space<vmem>>, %arg4: memref<1x2048xf32, #tpu.memory_space<vmem>>, %arg5: memref<2048x512xbf16, #tpu.memory_space<vmem>>, %arg6: memref<1x512xf32, #tpu.memory_space<vmem>>, %arg7: memref<8x512xf32, #tpu.memory_space<vmem>>) attributes {dimension_semantics = [#tpu.dimension_semantics<parallel>, #tpu.dimension_semantics<arbitrary>], iteration_bounds = array<i64: 1, 2>, scalar_prefetch = 0 : i64, scratch_operands = 0 : i64, tpu.core_type = #tpu.core_type<tc>, window_params = [{transform_indices = @transform_0, window_bounds = array<i64: 8, 512>}, {transform_indices = @transform_1, window_bounds = array<i64: 512, 2048>}, {transform_indices = @transform_2, window_bounds = array<i64: 1, 2048>}, {transform_indices = @transform_3, window_bounds = array<i64: 2048, 512>}, {pipeline_mode = #tpu.pipeline_mode<synchronous>, transform_indices = @transform_4, window_bounds = array<i64: 1, 512>}, {transform_indices = @transform_5, window_bounds = array<i64: 8, 512>}]} {
    %c0_i32 = arith.constant 0 : i32
    %0 = arith.cmpi eq, %arg1, %c0_i32 : i32
    %1 = arith.extui %0 : i1 to i32
    %c0_i32_0 = arith.constant 0 : i32
    %2 = arith.cmpi ne, %1, %c0_i32_0 : i32
    scf.if %2 {
      %c0_14 = arith.constant 0 : index
      %c0_15 = arith.constant 0 : index
      %18 = vector.load %arg6[%c0_14, %c0_15] : memref<1x512xf32, #tpu.memory_space<vmem>>, vector<1x512xf32>
      %19 = vector.shape_cast %18 : vector<1x512xf32> to vector<1x512xf32>
      %20 = vector.broadcast %19 : vector<1x512xf32> to vector<8x512xf32>
      %c0_16 = arith.constant 0 : index
      %c0_17 = arith.constant 0 : index
      %21 = vector.load %arg7[%c0_16, %c0_17] : memref<8x512xf32, #tpu.memory_space<vmem>>, vector<8x512xf32>
      tpu.vector_store %arg7[%c0_16, %c0_17], %20 {strides = array<i32>} : memref<8x512xf32, #tpu.memory_space<vmem>>, vector<8x512xf32>,
    } else {
    }
    %c0 = arith.constant 0 : index
    %c0_1 = arith.constant 0 : index
    %3 = vector.load %arg2[%c0, %c0_1] : memref<8x512xf32, #tpu.memory_space<vmem>>, vector<8x512xf32>
    %4 = arith.truncf %3 : vector<8x512xf32> to vector<8x512xbf16>
    %c0_2 = arith.constant 0 : index
    %c0_3 = arith.constant 0 : index
    %5 = vector.load %arg3[%c0_2, %c0_3] : memref<512x2048xbf16, #tpu.memory_space<vmem>>, vector<512x2048xbf16>
    %cst = arith.constant dense<0.000000e+00> : vector<8x2048xf32>
    %6 = tpu.matmul %4, %5, %cst {dimension_numbers = #tpu.dot_dimension_numbers<[1], [0], [0], [1], [0, 0, 1, 1], [], []>} : vector<8x512xbf16>, vector<512x2048xbf16>, vector<8x2048xf32> -> vector<8x2048xf32>
    %c0_4 = arith.constant 0 : index
    %c0_5 = arith.constant 0 : index
    %7 = vector.load %arg4[%c0_4, %c0_5] : memref<1x2048xf32, #tpu.memory_space<vmem>>, vector<1x2048xf32>
    %8 = vector.broadcast %7 : vector<1x2048xf32> to vector<8x2048xf32>
    %9 = arith.addf %6, %8 : vector<8x2048xf32>
    %cst_6 = arith.constant 0.000000e+00 : f32
    %10 = vector.broadcast %cst_6 : f32 to vector<8x2048xf32>
    %11 = arith.maximumf %9, %10 : vector<8x2048xf32>
    %c0_7 = arith.constant 0 : index
    %c0_8 = arith.constant 0 : index
    %12 = vector.load %arg7[%c0_7, %c0_8] : memref<8x512xf32, #tpu.memory_space<vmem>>, vector<8x512xf32>
    %13 = arith.truncf %11 : vector<8x2048xf32> to vector<8x2048xbf16>
    %c0_9 = arith.constant 0 : index
    %c0_10 = arith.constant 0 : index
    %14 = vector.load %arg5[%c0_9, %c0_10] : memref<2048x512xbf16, #tpu.memory_space<vmem>>, vector<2048x512xbf16>
    %cst_11 = arith.constant dense<0.000000e+00> : vector<8x512xf32>
    %15 = tpu.matmul %13, %14, %cst_11 {dimension_numbers = #tpu.dot_dimension_numbers<[1], [0], [0], [1], [0, 0, 1, 1], [], []>} : vector<8x2048xbf16>, vector<2048x512xbf16>, vector<8x512xf32> -> vector<8x512xf32>
    %16 = arith.addf %12, %15 : vector<8x512xf32>
    %c0_12 = arith.constant 0 : index
    %c0_13 = arith.constant 0 : index
    %17 = vector.load %arg7[%c0_12, %c0_13] : memref<8x512xf32, #tpu.memory_space<vmem>>, vector<8x512xf32>
    tpu.vector_store %arg7[%c0_12, %c0_13], %16 {strides = array<i32>} : memref<8x512xf32, #tpu.memory_space<vmem>>, vector<8x512xf32>,
    return
  }
  func.func @transform_0(%arg0: i32, %arg1: i32) -> (i32, i32) {
    %c0_i32 = arith.constant 0 : i32
    %c0_i32_0 = arith.constant 0 : i32
    return %arg0, %c0_i32 : i32, i32
  }
  func.func @transform_1(%arg0: i32, %arg1: i32) -> (i32, i32) {
    %c0_i32 = arith.constant 0 : i32
    %c0_i32_0 = arith.constant 0 : i32
    return %c0_i32, %arg1 : i32, i32
  }
  func.func @transform_2(%arg0: i32, %arg1: i32) -> (i32, i32) {
    %c0_i32 = arith.constant 0 : i32
    %c0_i32_0 = arith.constant 0 : i32
    return %c0_i32, %arg1 : i32, i32
  }
  func.func @transform_3(%arg0: i32, %arg1: i32) -> (i32, i32) {
    %c0_i32 = arith.constant 0 : i32
    %c0_i32_0 = arith.constant 0 : i32
    return %arg1, %c0_i32 : i32, i32
  }
  func.func @transform_4(%arg0: i32, %arg1: i32) -> (i32, i32) {
    %c0_i32 = arith.constant 0 : i32
    %c0_i32_0 = arith.constant 0 : i32
    %c0_i32_1 = arith.constant 0 : i32
    return %c0_i32, %c0_i32_0 : i32, i32
  }
  func.func @transform_5(%arg0: i32, %arg1: i32) -> (i32, i32) {
    %c0_i32 = arith.constant 0 : i32
    %c0_i32_0 = arith.constant 0 : i32
    return %arg0, %c0_i32 : i32, i32
  }
}

</mosaic_0001>

<bundles_post_ra>
// kernel: generator_forward.1
= control target key start
LH: loop header
LB: loop body
LE: loop exit
PB: predicated region body
PF: predicated region fallthrough
CT: control target
= control target key end

     0   :  { %s11913_s0 = inlined_call_operand.hbm [shape: f32[8,512], index: 0, kind: input, shape index: {}]   ;;  %s11914_s1 = inlined_call_operand.hbm [shape: bf16[512,4096], index: 1, kind: input, shape index: {}]   ;;  %s11915_s2 = inlined_call_operand.hbm [shape: f32[1,4096], index: 2, kind: input, shape index: {}]   ;;  %s11916_s3 = inlined_call_operand.hbm [shape: bf16[4096,512], index: 3, kind: input, shape index: {}]   ;;  %s11917_s4 = inlined_call_operand.hbm [shape: f32[1,512], index: 4, kind: input, shape index: {}]   ;;  %s11918_s5 = inlined_call_operand.hbm [shape: f32[8,512], index: 5, kind: output, shape index: {}]  }
   0x1   :  { %11933 = sst [smem:[#allocation20_spill]] %s11914_s1 }
   0x2   :  { %11934 = sst [smem:[#allocation21_spill]] %s11917_s4 }
   0x3   :  { %11935 = sst [smem:[#allocation22_spill]] %s11918_s5 }
   0x4   :  { %10 = vsyncpa [#allocation3], 0 }
   0x5   :  { %11 = vsyncpa [#allocation6], 0 }
   0x6   :  { %13 = vsyncpa [#allocation6 + $0x1], 0 }
   0x7   :  { %14 = vsyncpa [#allocation9], 0 }
   0x8   :  { %16 = vsyncpa [#allocation9 + $0x1], 0 }
   0x9   :  { %17 = vsyncpa [#allocation4], 0  ;;  %s10368_s18 = smov 0   ;;  %s10370_s19 = smov 0  }
   0xa   :  { %s10372_s20 = smov 0   ;;  %s10374_s21 = smov 0  }
   0xb   :  { %s10376_s22 = smov 0   ;;  %s10378_s23 = smov 0  }
   0xc LB: > { %11936 = sst [smem:[#allocation17_spill]] %s10317_s21  ;;  %s10397_s24 = sadd.s32 4294967295, %s10325_s23   ;;  %s10325_s23 = sphi %s10378_s23, %s23_s23   ;;  %s10321_s22 = sphi %s10376_s22, %s11968_s22   ;;  %s10317_s21 = sphi %s10374_s21, %s11967_s21   ;;  %s10313_s20 = sphi %s10372_s20, %s11966_s20   ;;  %s10309_s19 = sphi %s10370_s19, %s11965_s19   ;;  %s10305_s18 = sphi %s10368_s18, %s11964_s18  }
   0xd   : > { %s68_s25 = sadd.s32 1, %s10313_s20  ;;  %p75_p0 = scmp.ne.s32.totalorder %s10313_s20, %s10309_s19 }
   0xe   : > { %p76_p1 = scmp.eq.s32.totalorder %s10325_s23, 0  ;;  %p81_p2 = scmp.ne.s32.totalorder %s10309_s19, %s10305_s18 }
   0xf   : > { %p11919_p3 = scmp.eq.s32.totalorder %s10397_s24, 0  ;;  %p8120_p5 = scmp.ge.s32.totalorder %s10325_s23, 1 }
  0x10   : > { %p77_p4 = por %p76_p1, %p75_p0  ;;  %p191_p7 = scmp.lt.s32.totalorder %s10325_s23, 3 }
  0x11   : > { %p10408_p6 = por %p11919_p3, %p81_p2  ;;  %s10327_s28 = smov [#allocation10]  }
  0x12   : > { %p10413_p8 = pnand %p8120_p5, %p191_p7  ;;  %s218_s29 = sshll.u32 %s10327_s28, 4  ;;  %s219_s29 = int_to_ptr.vmem [resolvable:$true] %s218_s29 }
  0x13   : > { %s11937_s26 = scalar_select %p10408_p6, 1, 0 }
  0x14   : > { %s11938_s27 = scalar_select %p10413_p8, 1, 0 }
  0x15   : > { %p9239_p9 = pneg %p10413_p8  ;;  %p9258_p10 = scmp.lt.s32.totalorder %s10325_s23, 2 }
  0x16   : > { %s11923_s30 = sand.u32 1, %s10325_s23   ;;  %s11941_s4 = sld [smem:[#allocation21_spill]] }
  0x17   : > { %p10423_p11 = pnand %p9239_p9, %p11919_p3  ;;  %p10427_p12 = pnand %p9258_p10, %p77_p4 }
  0x19   : > { %s11939_s6 = scalar_select %p10423_p11, 1, 0 }
  0x1a   : > { %s11940_s7 = scalar_select %p10427_p12, 1, 0 }
  0x1b   : > { %p11924_p0 = pneg %p10423_p11 }
  0x1c   : > { %s10087_s10 = scalar_lea.hbm %s11941_s4, 64 }
  0x1d   : > { %p10088_p13 = scmp.ne.s32.totalorder %s11941_s4, %s10087_s10  ;;  %p10094_p4 = scmp.lt.u32.totalorder %s10087_s10, %s11941_s4 }
  0x1f   : > { %p10090_p1 = pnand %p11924_p0, %p10088_p13 }
  0x21   : > { %p10091_p2 = pneg %p10090_p1 }
  0x23   : > { %p10096_p5 = pnand %p10094_p4, %p10091_p2 }
  0x25   : > { %10099 = shalt.err (!%p10096_p5)
}
  0x26   : > { %s10100_s15 = scalar_lea.vmem %s219_s29, 64  ;;  %p10108_p3 = scmp.lt.s32.totalorder %s219_s29, %s219_s29 }
  0x27   : > { %p10101_p7 = scmp.ne.s32.totalorder %s219_s29, %s10100_s15  ;;  %p10109_p6 = scmp.lt.s32.totalorder %s10100_s15, %s10100_s15 }
  0x29   : > { %p10103_p9 = pnand %p10101_p7, %p11924_p0  ;;  %p10110_p8 = por %p10109_p6, %p10108_p3 }
  0x2b   : > { %p10104_p10 = pneg %p10103_p9 }
  0x2d   : > { %p10111_p12 = pnand %p10110_p8, %p10104_p10 }
  0x2f   : > { %10114 = shalt.err (!%p10111_p12)
}
  0x30   : > { %9245 = dma.hbm_to_vmem [thread:$0]  (!%p10423_p11), %s11941_s4, 64, %s219_s29, [#allocation9]  }
  0x31   : > { %s32_s18 = sadd.s32 1, %s10321_s22  ;;  %s11927_s28 = sand.u32 1, %s10313_s20  }
  0x32   : > { %p33_p3 = scmp.ge.s32.totalorder %s32_s18, 2  ;;  %s10457_s8 = sshll.u32 %s11927_s28, 12 }
  0x33   : > { %s9169_s9 = sshll.u32 %s10321_s22, 10  ;;  %s11943_s1 = sld [smem:[#allocation20_spill]] }
  0x34   : > { %s11970_s18 = smov (%p33_p3, %s32_s18), 0  ;;  %s233_s29 = scalar_lea.vmem [#allocation5], %s10457_s8 }
  0x35   : > { %11942 = sst [smem:[#allocation18_spill]] %s11970_s18  ;;  %s240_s13 = sshll.u32 %s233_s29, 4  ;;  %s10470_s13 = int_to_ptr.vmem [resolvable:$true] %s240_s13 }
  0x36   : > { %s65_s14 = ssub.s32 %s10321_s22, %s11970_s18  ;;  %s10479_s16 = scalar_lea.sflag [#allocation6], %s11923_s30 }
  0x37   : > { %p66_p6 = scmp.eq.s32.totalorder %s65_s14, 0  ;;  %p11945_p12 = scmp.ne.s32.totalorder %s11940_s7, 0 }
  0x39   : > { %s10465_s12 = scalar_lea.hbm %s11943_s1, %s9169_s9  ;;  %p10485_p13 = pneg %p11945_p12 }
  0x3a   : > { %s10475_s15 = scalar_select %p66_p6, %s10313_s20, %s68_s25  }
  0x3b   : > { %s10115_s17 = scalar_lea.hbm %s10465_s12, 65536  ;;  %s10120_s29 = scalar_lea.hbm %s11943_s1, 131072 }
  0x3c   : > { %11944 = sst [smem:[#allocation19_spill]] %s10475_s15  ;;  %p10116_p8 = scmp.ne.s32.totalorder %s10465_s12, %s10115_s17 }
  0x3d   : > { %s11946_s9 = scalar_select %p10485_p13, 1, 0 }
  0x3e   : > { %p10118_p1 = pnand %p10485_p13, %p10116_p8  ;;  %p10121_p4 = scmp.lt.u32.totalorder %s10465_s12, %s11943_s1 }
  0x3f   : > { %p10122_p5 = scmp.lt.u32.totalorder %s10120_s29, %s10115_s17  ;;  %p10124_p9 = scmp.lt.u32.totalorder %s10115_s17, %s10465_s12 }
  0x40   : > { %p10119_p2 = pneg %p10118_p1 }
  0x41   : > { %p10123_p7 = por %p10122_p5, %p10121_p4 }
  0x43   : > { %p10125_p10 = por %p10124_p9, %p10123_p7 }
  0x45   : > { %p10126_p3 = pnand %p10125_p10, %p10119_p2 }
  0x47   : > { %10129 = shalt.err (!%p10126_p3)
}
  0x48   : > { %s10130_s30 = scalar_lea.vmem %s10470_s13, 65536  ;;  %s10328_s10 = smov [#allocation5]  }
  0x49   : > { %p10131_p6 = scmp.ne.s32.totalorder %s10470_s13, %s10130_s30  ;;  %s10135_s11 = sshll.u32 %s10328_s10, 4  ;;  %s10136_s11 = int_to_ptr.vmem [resolvable:$false] %s10135_s11 }
  0x4a   : > { %s10137_s25 = scalar_lea.vmem %s10136_s11, 131072  ;;  %p10138_p0 = scmp.lt.s32.totalorder %s10470_s13, %s10136_s11 }
  0x4b   : > { %p10133_p8 = pnand %p10131_p6, %p10485_p13  ;;  %p10139_p11 = scmp.lt.s32.totalorder %s10137_s25, %s10130_s30 }
  0x4d   : > { %p10134_p1 = pneg %p10133_p8  ;;  %p10140_p4 = por %p10139_p11, %p10138_p0 }
  0x4f   : > { %p10141_p5 = pnand %p10140_p4, %p10134_p1 }
  0x51   : > { %10144 = shalt.err (!%p10141_p5)
}
  0x52   : > { %s10329_s17 = smov 2048   ;;  %s10330_s29 = smov 1024  }
  0x53   : > { %s10331_s14 = smov 64   ;;  %s10332_s28 = smov [#allocation2]  }
  0x54   : > { %9249 = dma.hbm_to_vmem [thread:$0]  (!%p11945_p12), %s10465_s12, 65536, %s10470_s13, %s10479_s16, %s10329_s17, %s10330_s29, %s10331_s14  }
  0x55   : > { %s207_s10 = sshll.u32 %s10332_s28, 4  ;;  %s11947_s1 = sand.u32 1, %s10313_s20   ;;  %s208_s10 = int_to_ptr.vmem [resolvable:$true] %s207_s10 }
  0x56   : > { %s8127_s11 = sshll.u32 %s11947_s1, 4  ;;  %s10145_s4 = scalar_lea.hbm %s11913_s0, 512 }
  0x57   : > { %p10146_p11 = scmp.ne.s32.totalorder %s11913_s0, %s10145_s4  ;;  %p11948_p0 = scmp.ne.s32.totalorder %s11939_s6, 0 }
  0x58   : > { %p10152_p10 = scmp.lt.u32.totalorder %s10145_s4, %s11913_s0 }
  0x59   : > { %p11949_p2 = pneg %p11948_p0 }
  0x5b   : > { %p10148_p7 = pnand %p10146_p11, %p11949_p2 }
  0x5d   : > { %p10149_p9 = pneg %p10148_p7 }
  0x5f   : > { %p10154_p3 = pnand %p10152_p10, %p10149_p9 }
  0x61   : > { %10157 = shalt.err (!%p10154_p3)
}
  0x62   : > { %s10158_s28 = scalar_lea.vmem %s208_s10, 512  ;;  %p11950_p8 = pmov %p11949_p2 }
  0x63   : > { %p10159_p6 = scmp.ne.s32.totalorder %s208_s10, %s10158_s28  ;;  %p10166_p5 = scmp.lt.s32.totalorder %s208_s10, %s208_s10 }
  0x64   : > { %p10167_p12 = scmp.lt.s32.totalorder %s10158_s28, %s10158_s28 }
  0x65   : > { %p10161_p1 = pnand %p10159_p6, %p11950_p8 }
  0x66   : > { %p10168_p13 = por %p10167_p12, %p10166_p5 }
  0x67   : > { %p10162_p4 = pneg %p10161_p1 }
  0x69   : > { %p10169_p2 = pnand %p10168_p13, %p10162_p4 }
  0x6b   : > { %10172 = shalt.err (!%p10169_p2)
}
  0x6c   : > { %9242 = dma.hbm_to_vmem [thread:$0]  (!%p11948_p0), %s11913_s0, 512, %s208_s10, [#allocation3]  }
  0x6d   : > { %s9170_s4 = sshll.u32 %s10321_s22, 8  ;;  %s254_s13 = scalar_lea.vmem [#allocation7], %s8127_s11 }
  0x6e   : > { %s10535_s12 = scalar_lea.hbm %s11915_s2, %s9170_s4  ;;  %s262_s15 = sshll.u32 %s254_s13, 4  ;;  %s263_s15 = int_to_ptr.vmem [resolvable:$true] %s262_s15 }
  0x6f   : > { %s10173_s6 = scalar_lea.hbm %s10535_s12, 256  ;;  %p11951_p13 = scmp.ne.s32.totalorder %s11946_s9, 0 }
  0x70   : > { %p10174_p12 = scmp.ne.s32.totalorder %s10535_s12, %s10173_s6  ;;  %s10178_s14 = scalar_lea.hbm %s11915_s2, 512 }
  0x71   : > { %p10179_p0 = scmp.lt.u32.totalorder %s10535_s12, %s11915_s2  ;;  %p10180_p9 = scmp.lt.u32.totalorder %s10178_s14, %s10173_s6 }
  0x72   : > { %p10176_p11 = pnand %p10174_p12, %p11951_p13  ;;  %p10182_p3 = scmp.lt.u32.totalorder %s10173_s6, %s10535_s12 }
  0x73   : > { %p10181_p10 = por %p10180_p9, %p10179_p0 }
  0x74   : > { %p10177_p7 = pneg %p10176_p11 }
  0x75   : > { %p10183_p6 = por %p10182_p3, %p10181_p10 }
  0x77   : > { %p10184_p8 = pnand %p10183_p6, %p10177_p7 }
  0x79   : > { %10187 = shalt.err (!%p10184_p8)
}
  0x7a   : > { %s10188_s11 = scalar_lea.vmem %s263_s15, 256  ;;  %s10333_s25 = smov [#allocation7]  }
  0x7b   : > { %p10189_p1 = scmp.ne.s32.totalorder %s263_s15, %s10188_s11  ;;  %s10193_s28 = sshll.u32 %s10333_s25, 4  ;;  %s10194_s28 = int_to_ptr.vmem [resolvable:$false] %s10193_s28 }
  0x7c   : > { %s10195_s1 = scalar_lea.vmem %s10194_s28, 512  ;;  %p10196_p2 = scmp.lt.s32.totalorder %s263_s15, %s10194_s28 }
  0x7d   : > { %p10191_p4 = pnand %p10189_p1, %p11951_p13  ;;  %p10197_p12 = scmp.lt.s32.totalorder %s10195_s1, %s10188_s11 }
  0x7f   : > { %p10192_p5 = pneg %p10191_p4  ;;  %p10198_p11 = por %p10197_p12, %p10196_p2 }
  0x81   : > { %p10199_p0 = pnand %p10198_p11, %p10192_p5 }
  0x83   : > { %10202 = shalt.err (!%p10199_p0)
}
  0x84   : > { %p11952_p9 = scmp.ne.s32.totalorder %s11940_s7, 0  ;;  %s9172_s18 = sshll.u32 %s10321_s22, 16 }
  0x85   : > { %s10559_s21 = scalar_lea.hbm %s11916_s3, %s9172_s18  ;;  %s273_s13 = scalar_lea.vmem [#allocation8], %s10457_s8 }
  0x86   : > { %9252 = dma.hbm_to_vmem [thread:$0]  (!%p11952_p9), %s10535_s12, 256, %s263_s15, %s10479_s16  }
  0x87   : > { %s281_s6 = sshll.u32 %s273_s13, 4  ;;  %s11953_s17 = sand.u32 1, %s10325_s23   ;;  %s10562_s6 = int_to_ptr.vmem [resolvable:$true] %s281_s6 }
  0x88   : > { %s10566_s29 = scalar_lea.sflag [#allocation9], %s11953_s17  ;;  %s10203_s14 = scalar_lea.hbm %s10559_s21, 65536 }
  0x89   : > { %p10204_p7 = scmp.ne.s32.totalorder %s10559_s21, %s10203_s14  ;;  %s10208_s15 = scalar_lea.hbm %s11916_s3, 131072 }
  0x8a   : > { %p10209_p6 = scmp.lt.u32.totalorder %s10559_s21, %s11916_s3  ;;  %p10210_p8 = scmp.lt.u32.totalorder %s10208_s15, %s10203_s14 }
  0x8b   : > { %p10206_p10 = pnand %p10204_p7, %p11951_p13  ;;  %p10212_p4 = scmp.lt.u32.totalorder %s10203_s14, %s10559_s21 }
  0x8c   : > { %p10211_p1 = por %p10210_p8, %p10209_p6 }
  0x8d   : > { %p10207_p3 = pneg %p10206_p10 }
  0x8e   : > { %p10213_p5 = por %p10212_p4, %p10211_p1 }
  0x90   : > { %p10214_p2 = pnand %p10213_p5, %p10207_p3 }
  0x92   : > { %10217 = shalt.err (!%p10214_p2)
}
  0x93   : > { %s10218_s8 = scalar_lea.vmem %s10562_s6, 65536  ;;  %s10334_s11 = smov [#allocation8]  }
  0x94   : > { %p10219_p12 = scmp.ne.s32.totalorder %s10562_s6, %s10218_s8  ;;  %s10223_s25 = sshll.u32 %s10334_s11, 4  ;;  %s10224_s25 = int_to_ptr.vmem [resolvable:$false] %s10223_s25 }
  0x95   : > { %s10225_s28 = scalar_lea.vmem %s10224_s25, 131072  ;;  %p10226_p7 = scmp.lt.s32.totalorder %s10562_s6, %s10224_s25 }
  0x96   : > { %p10221_p11 = pnand %p10219_p12, %p11951_p13  ;;  %p10227_p10 = scmp.lt.s32.totalorder %s10225_s28, %s10218_s8 }
  0x98   : > { %p10222_p0 = pneg %p10221_p11  ;;  %p10228_p6 = por %p10227_p10, %p10226_p7 }
  0x9a   : > { %p10229_p8 = pnand %p10228_p6, %p10222_p0 }
  0x9c   : > { %10232 = shalt.err (!%p10229_p8)
}
  0x9d   : > { %s10335_s1 = smov 256   ;;  %s10336_s18 = smov 16  }
  0x9e   : > { %9255 = dma.hbm_to_vmem [thread:$0]  (!%p11952_p9), %s10559_s21, 65536, %s10562_s6, %s10566_s29, %s10335_s1, %s10335_s1, %s10336_s18  }
  0x9f   : > { %p11954_p13 = scmp.ne.s32.totalorder %s11938_s27, 0 }
  0xa0   : > { %p11955_p3 = scmp.eq.s32.totalorder (!%p11954_p13), %s10397_s24, 0 }
  0xa1   : > { %293 = sbr.rel (%p11954_p13) target bundleno = 1465 (0x5b9), region = 40 }
  0xa8   : > { %10284 = dma.done.wait (%p11955_p3), [#allocation3], 512   ;;  %p11956_p1 = pmov %p11955_p3 }
  0xa9   : > { %s299_s9 = sand.u32 1, %s10397_s24   ;;  %s301_s4 = sand.u32 1, %s10309_s19  }
  0xaa   : > { %10286 = vsyncadd (%p11956_p1), [#allocation3], 4294966784  ;;  %s8136_s5 = sshll.u32 %s301_s4, 12  ;;  %s300_s13 = scalar_lea.sflag [#allocation6], %s299_s9 }
  0xab   : > { %s10598_s17 = scalar_lea.vmem [#allocation5], %s8136_s5  ;;  %p11957_p4 = scmp.ne.s32.totalorder %s11937_s26, 0 }
  0xad   : > { %10288 = dma.done.wait (%p11957_p4), %s300_s13, 65792  }
  0xae   : > { %10290 = vsyncadd (%p11957_p4), %s300_s13, 4294901504  ;;  %s10604_s27 = sshll.u32 %s301_s4, 4  ;;  %s318_s21 = scalar_lea.sflag [#allocation9], %s299_s9 }
  0xaf   : > { %s312_s7 = scalar_lea.vmem [#allocation7], %s10604_s27  ;;  %s10607_s6 = scalar_lea.vmem [#allocation8], %s8136_s5 }
  0xb0   : > { %10292 = dma.done.wait (%p11957_p4), %s318_s21, 65536  }
  0xb1   : > { %10294 = vsyncadd (%p11957_p4), %s318_s21, 4294901760  ;;  %p11958_p9 = pmov %p11956_p1 }
  0xb2   : > { %p11959_p5 = pmov %p11956_p1 }
  0xb3   : > { %10296 = dma.done.wait (%p11958_p9), [#allocation9], 64  }
  0xb4   : > { %10298 = vsyncadd (%p11959_p5), [#allocation9], 4294967232  ;;  %s11960_s29 = sld [smem:[#allocation17_spill]] }
  0xba   : > { %p8140_p2 = scmp.ne.s32.totalorder %s11960_s29, 0 }
  0xbb   : > { %v366_v0 = vlaneseq (!%p8140_p2)  ;;  %v364_v2 = vld [vmem:[#allocation10] sm:$0xf] (!%p8140_p2) }
  0xbc   : > { %363 = sbr.rel (%p8140_p2) target bundleno = 197 (0xc5), region = 64 }
  0xbd   : > { %v367_v1 = vshrl.u32 (!%p8140_p2), %v366_v0, 7 }
  0xbf   : > { %v368_v3 = vsub.s32 (!%p8140_p2), 0, %v367_v1  ;;  %v372_v4 = vsub.s32 (!%p8140_p2), 1, %v367_v1  ;;  %v376_v5 = vsub.s32 (!%p8140_p2), 2, %v367_v1  ;;  %v380_v6 = vsub.s32 (!%p8140_p2), 3, %v367_v1 }
  0xc1   : > { %v369_v7 = vrot.slane (!%p8140_p2), %v364_v2, %v368_v3  ;;  %v373_v8 = vrot.slane (!%p8140_p2), %v364_v2, %v372_v4  ;;  %v377_v9 = vrot.slane (!%p8140_p2), %v364_v2, %v376_v5  ;;  %v381_v10 = vrot.slane (!%p8140_p2), %v364_v2, %v380_v6 }
  0xc3   : > { %386 = vst [vmem:[#allocation11] sm:$0xff] %v369_v7  ;;  %387 = vst [vmem:[#allocation11 + $0x8] sm:$0xff] %v373_v8 }
  0xc4   : > { %388 = vst [vmem:[#allocation11 + $0x10] sm:$0xff] %v377_v9  ;;  %389 = vst [vmem:[#allocation11 + $0x18] sm:$0xff] %v381_v10 }
  0xc5 PF: > { %v398_v11 = vld [vmem:[%s10598_s17] sm:$0xff]  ;;  %v399_v13 = vld [vmem:[%s10598_s17 + $0x8] sm:$0xff]  ;;  %s10337_s26 = smov [#allocation11]   ;;  %p9261_p12 = scmp.eq.s32.totalorder %s10397_s24, 1 }
  0xc6   : > { %v406_v12 = vld [vmem:[%s10598_s17 + $0x40] sm:$0xff]  ;;  %v407_v15 = vld [vmem:[%s10598_s17 + $0x48] sm:$0xff]  ;;  %s7992_s14 = sshll.u32 %s10337_s26, 4  ;;  %s7993_s14 = int_to_ptr.vmem [resolvable:$true] %s7992_s14 }
  0xc7   : > { %v8142_v14 = vcombine.high %v398_v11, %v406_v12  ;;  %v8141_v16 = vcombine.low %v398_v11, %v406_v12  ;;  %v414_v17 = vld [vmem:[%s10598_s17 + $0x80] sm:$0xff]  ;;  %v8144_v19 = vcombine.high %v399_v13, %v407_v15  ;;  %v8143_v20 = vcombine.low %v399_v13, %v407_v15  ;;  %v415_v22 = vld [vmem:[%s10598_s17 + $0x88] sm:$0xff]  ;;  %s10233_s16 = scalar_lea.vmem %s7993_s14, 512  ;;  %p10240_p10 = scmp.lt.s32.totalorder %s7993_s14, %s7993_s14 }
  0xc8   : > { %v422_v18 = vld [vmem:[%s10598_s17 + $0xc0] sm:$0xff]  ;;  %v423_v23 = vld [vmem:[%s10598_s17 + $0xc8] sm:$0xff]  ;;  %p10234_p11 = scmp.ne.s32.totalorder %s7993_s14, %s10233_s16  ;;  %p10241_p6 = scmp.lt.s32.totalorder %s10233_s16, %s10233_s16 }
  0xc9   : > { %v8158_v21 = vcombine.high %v414_v17, %v422_v18  ;;  %v430_v24 = vld [vmem:[%s10598_s17 + $0x100] sm:$0xff]  ;;  %3554 = vmatprep.subr.bf16.mxu0 %v8142_v14  ;;  %v8160_v25 = vcombine.high %v415_v22, %v423_v23  ;;  %v431_v27 = vld [vmem:[%s10598_s17 + $0x108] sm:$0xff]  ;;  %3636 = vmatprep.subr.bf16.mxu1 %v8144_v19  ;;  %v8157_v29 = vcombine.low %v414_v17, %v422_v18 }
  0xca   : > { %v438_v26 = vld [vmem:[%s10598_s17 + $0x140] sm:$0xff]  ;;  %v439_v28 = vld [vmem:[%s10598_s17 + $0x148] sm:$0xff]  ;;  %3555 = vmatpush1.bf16.msra.mxu0 %v8141_v16  ;;  %3637 = vmatpush1.bf16.msra.mxu1 %v8143_v20  ;;  %v8159_v30 = vcombine.low %v415_v22, %v423_v23  ;;  %p10235_p0 = pnand %p10234_p11, %p9261_p12  ;;  %p10242_p8 = por %p10241_p6, %p10240_p10 }
  0xcb   : > { %3556 = vmatprep.subr.bf16.mxu0 %v8158_v21  ;;  %v8174_v31 = vcombine.high %v430_v24, %v438_v26  ;;  %3638 = vmatprep.subr.bf16.mxu1 %v8160_v25  ;;  %v8176_v32 = vcombine.high %v431_v27, %v439_v28  ;;  %v446_v33 = vld [vmem:[%s10598_s17 + $0x180] sm:$0xff]  ;;  %v447_v35 = vld [vmem:[%s10598_s17 + $0x188] sm:$0xff]  ;;  %v8173_v37 = vcombine.low %v430_v24, %v438_v26 }
  0xcc   : > { %v454_v34 = vld [vmem:[%s10598_s17 + $0x1c0] sm:$0xff]  ;;  %v455_v36 = vld [vmem:[%s10598_s17 + $0x1c8] sm:$0xff]  ;;  %v8175_v38 = vcombine.low %v431_v27, %v439_v28  ;;  %p10236_p7 = pneg %p10235_p0 }
  0xcd   : > { %v8190_v39 = vcombine.high %v446_v33, %v454_v34  ;;  %v8192_v40 = vcombine.high %v447_v35, %v455_v36  ;;  %v462_v41 = vld [vmem:[%s10598_s17 + $0x200] sm:$0xff]  ;;  %v463_v43 = vld [vmem:[%s10598_s17 + $0x208] sm:$0xff]  ;;  %v8189_v45 = vcombine.low %v446_v33, %v454_v34  ;;  %v8191_v46 = vcombine.low %v447_v35, %v455_v36 }
  0xce   : > { %3557 = vmatpush1.bf16.msra.mxu0 %v8157_v29  ;;  %3639 = vmatpush1.bf16.msra.mxu1 %v8159_v30  ;;  %v470_v42 = vld [vmem:[%s10598_s17 + $0x240] sm:$0xff]  ;;  %v471_v44 = vld [vmem:[%s10598_s17 + $0x248] sm:$0xff]  ;;  %p10243_p13 = pnand %p10242_p8, %p10236_p7 }
  0xcf   : > { %3558 = vmatprep.subr.bf16.mxu0 %v8174_v31  ;;  %3640 = vmatprep.subr.bf16.mxu1 %v8176_v32  ;;  %v8206_v47 = vcombine.high %v462_v41, %v470_v42  ;;  %v8208_v48 = vcombine.high %v463_v43, %v471_v44  ;;  %v478_v49 = vld [vmem:[%s10598_s17 + $0x280] sm:$0xff]  ;;  %v479_v51 = vld [vmem:[%s10598_s17 + $0x288] sm:$0xff]  ;;  %v8205_v53 = vcombine.low %v462_v41, %v470_v42 }
  0xd0   : > { %v486_v50 = vld [vmem:[%s10598_s17 + $0x2c0] sm:$0xff]  ;;  %v487_v52 = vld [vmem:[%s10598_s17 + $0x2c8] sm:$0xff]  ;;  %v8207_v54 = vcombine.low %v463_v43, %v471_v44 }
  0xd1   : > { %v8222_v55 = vcombine.high %v478_v49, %v486_v50  ;;  %v8224_v56 = vcombine.high %v479_v51, %v487_v52  ;;  %v494_v57 = vld [vmem:[%s10598_s17 + $0x300] sm:$0xff]  ;;  %v495_v59 = vld [vmem:[%s10598_s17 + $0x308] sm:$0xff]  ;;  %v8221_v61 = vcombine.low %v478_v49, %v486_v50  ;;  %v8223_v62 = vcombine.low %v479_v51, %v487_v52 }
  0xd2   : > { %3559 = vmatpush1.bf16.msra.mxu0 %v8173_v37  ;;  %3641 = vmatpush1.bf16.msra.mxu1 %v8175_v38  ;;  %v502_v58 = vld [vmem:[%s10598_s17 + $0x340] sm:$0xff]  ;;  %v503_v60 = vld [vmem:[%s10598_s17 + $0x348] sm:$0xff] }
  0xd3   : > { %3560 = vmatprep.subr.bf16.mxu0 %v8190_v39  ;;  %3642 = vmatprep.subr.bf16.mxu1 %v8192_v40  ;;  %v8238_v63 = vcombine.high %v494_v57, %v502_v58  ;;  %v391_v0 = vld [vmem:[#allocation2 + $0x8] sm:$0xff]  ;;  %v8240_v1 = vcombine.high %v495_v59, %v503_v60  ;;  %v510_v2 = vld [vmem:[%s10598_s17 + $0x380] sm:$0xff]  ;;  %v8237_v7 = vcombine.low %v494_v57, %v502_v58 }
  0xd4   : > { %v518_v3 = vld [vmem:[%s10598_s17 + $0x3c0] sm:$0xff]  ;;  %v10648_v4 = vpack.c.bf16 %v391_v0, %v391_v0  ;;  %v511_v5 = vld [vmem:[%s10598_s17 + $0x388] sm:$0xff]  ;;  %v8239_v8 = vcombine.low %v495_v59, %v503_v60 }
  0xd5   : > { %v519_v6 = vld [vmem:[%s10598_s17 + $0x3c8] sm:$0xff]  ;;  %v8254_v9 = vcombine.high %v510_v2, %v518_v3  ;;  %v526_v11 = vld [vmem:[%s10598_s17 + $0x400] sm:$0xff]  ;;  %v8253_v15 = vcombine.low %v510_v2, %v518_v3 }
  0xd6   : > { %3561 = vmatpush1.bf16.msra.mxu0 %v8189_v45  ;;  %3643 = vmatpush1.bf16.msra.mxu1 %v8191_v46  ;;  %v8256_v10 = vcombine.high %v511_v5, %v519_v6  ;;  %v534_v12 = vld [vmem:[%s10598_s17 + $0x440] sm:$0xff]  ;;  %v527_v13 = vld [vmem:[%s10598_s17 + $0x408] sm:$0xff]  ;;  %v8255_v16 = vcombine.low %v511_v5, %v519_v6 }
  0xd7   : > { %3562 = vmatprep.subr.bf16.mxu0 %v8206_v47  ;;  %3644 = vmatprep.subr.bf16.mxu1 %v8208_v48  ;;  %v535_v14 = vld [vmem:[%s10598_s17 + $0x448] sm:$0xff]  ;;  %v8270_v17 = vcombine.high %v526_v11, %v534_v12  ;;  %v542_v19 = vld [vmem:[%s10598_s17 + $0x480] sm:$0xff]  ;;  %v8269_v23 = vcombine.low %v526_v11, %v534_v12 }
  0xd8   : > { %3586 = vmatprep.mubr.bf16.mxu0 %v10648_v4  ;;  %3668 = vmatprep.mubr.bf16.mxu1 %v10648_v4  ;;  %v8272_v18 = vcombine.high %v527_v13, %v535_v14  ;;  %v550_v20 = vld [vmem:[%s10598_s17 + $0x4c0] sm:$0xff]  ;;  %v543_v21 = vld [vmem:[%s10598_s17 + $0x488] sm:$0xff]  ;;  %v8271_v24 = vcombine.low %v527_v13, %v535_v14 }
  0xd9   : > { %v551_v22 = vld [vmem:[%s10598_s17 + $0x4c8] sm:$0xff]  ;;  %v8286_v25 = vcombine.high %v542_v19, %v550_v20  ;;  %v558_v27 = vld [vmem:[%s10598_s17 + $0x500] sm:$0xff]  ;;  %v8285_v31 = vcombine.low %v542_v19, %v550_v20 }
  0xda   : > { %3563 = vmatpush1.bf16.msra.mxu0 %v8205_v53  ;;  %3645 = vmatpush1.bf16.msra.mxu1 %v8207_v54  ;;  %v8288_v26 = vcombine.high %v543_v21, %v551_v22  ;;  %v566_v28 = vld [vmem:[%s10598_s17 + $0x540] sm:$0xff]  ;;  %v559_v29 = vld [vmem:[%s10598_s17 + $0x508] sm:$0xff]  ;;  %v8287_v32 = vcombine.low %v543_v21, %v551_v22 }
  0xdb   : > { %3564 = vmatprep.subr.bf16.mxu0 %v8222_v55  ;;  %3646 = vmatprep.subr.bf16.mxu1 %v8224_v56  ;;  %v567_v30 = vld [vmem:[%s10598_s17 + $0x548] sm:$0xff]  ;;  %v8302_v33 = vcombine.high %v558_v27, %v566_v28  ;;  %v574_v35 = vld [vmem:[%s10598_s17 + $0x580] sm:$0xff]  ;;  %v8301_v39 = vcombine.low %v558_v27, %v566_v28 }
  0xdc   : > { %v8304_v34 = vcombine.high %v559_v29, %v567_v30  ;;  %v582_v36 = vld [vmem:[%s10598_s17 + $0x5c0] sm:$0xff]  ;;  %v575_v37 = vld [vmem:[%s10598_s17 + $0x588] sm:$0xff]  ;;  %v8303_v40 = vcombine.low %v559_v29, %v567_v30 }
  0xdd   : > { %v583_v38 = vld [vmem:[%s10598_s17 + $0x5c8] sm:$0xff]  ;;  %v8318_v41 = vcombine.high %v574_v35, %v582_v36  ;;  %v590_v43 = vld [vmem:[%s10598_s17 + $0x600] sm:$0xff]  ;;  %v8317_v47 = vcombine.low %v574_v35, %v582_v36 }
  0xde   : > { %3565 = vmatpush1.bf16.msra.mxu0 %v8221_v61  ;;  %3647 = vmatpush1.bf16.msra.mxu1 %v8223_v62  ;;  %v8320_v42 = vcombine.high %v575_v37, %v583_v38  ;;  %v598_v44 = vld [vmem:[%s10598_s17 + $0x640] sm:$0xff]  ;;  %v591_v45 = vld [vmem:[%s10598_s17 + $0x608] sm:$0xff]  ;;  %v8319_v48 = vcombine.low %v575_v37, %v583_v38 }
  0xdf   : > { %3566 = vmatprep.subr.bf16.mxu0 %v8238_v63  ;;  %3648 = vmatprep.subr.bf16.mxu1 %v8240_v1  ;;  %v599_v46 = vld [vmem:[%s10598_s17 + $0x648] sm:$0xff]  ;;  %v8334_v49 = vcombine.high %v590_v43, %v598_v44  ;;  %v606_v51 = vld [vmem:[%s10598_s17 + $0x680] sm:$0xff]  ;;  %v8333_v55 = vcombine.low %v590_v43, %v598_v44 }
  0xe0   : > { %v8336_v50 = vcombine.high %v591_v45, %v599_v46  ;;  %v614_v52 = vld [vmem:[%s10598_s17 + $0x6c0] sm:$0xff]  ;;  %v607_v53 = vld [vmem:[%s10598_s17 + $0x688] sm:$0xff]  ;;  %v8335_v56 = vcombine.low %v591_v45, %v599_v46 }
  0xe1   : > { %v615_v54 = vld [vmem:[%s10598_s17 + $0x6c8] sm:$0xff]  ;;  %v8350_v57 = vcombine.high %v606_v51, %v614_v52  ;;  %v622_v59 = vld [vmem:[%s10598_s17 + $0x700] sm:$0xff]  ;;  %v8349_v63 = vcombine.low %v606_v51, %v614_v52 }
  0xe2   : > { %3567 = vmatpush1.bf16.msra.mxu0 %v8237_v7  ;;  %3649 = vmatpush1.bf16.msra.mxu1 %v8239_v8  ;;  %v8352_v58 = vcombine.high %v607_v53, %v615_v54  ;;  %v630_v60 = vld [vmem:[%s10598_s17 + $0x740] sm:$0xff]  ;;  %v623_v61 = vld [vmem:[%s10598_s17 + $0x708] sm:$0xff]  ;;  %v8351_v0 = vcombine.low %v607_v53, %v615_v54 }
  0xe3   : > { %3568 = vmatprep.subr.bf16.mxu0 %v8254_v9  ;;  %3650 = vmatprep.subr.bf16.mxu1 %v8256_v10  ;;  %v631_v62 = vld [vmem:[%s10598_s17 + $0x748] sm:$0xff]  ;;  %v8366_v1 = vcombine.high %v622_v59, %v630_v60  ;;  %v638_v3 = vld [vmem:[%s10598_s17 + $0x780] sm:$0xff]  ;;  %v8365_v8 = vcombine.low %v622_v59, %v630_v60 }
  0xe4   : > { %v8368_v2 = vcombine.high %v623_v61, %v631_v62  ;;  %v646_v5 = vld [vmem:[%s10598_s17 + $0x7c0] sm:$0xff]  ;;  %v639_v6 = vld [vmem:[%s10598_s17 + $0x788] sm:$0xff]  ;;  %v8367_v9 = vcombine.low %v623_v61, %v631_v62 }
  0xe5   : > { %v647_v7 = vld [vmem:[%s10598_s17 + $0x7c8] sm:$0xff]  ;;  %v8382_v10 = vcombine.high %v638_v3, %v646_v5  ;;  %v654_v12 = vld [vmem:[%s10598_s17 + $0x800] sm:$0xff] }
  0xe6   : > { %3569 = vmatpush1.bf16.msra.mxu0 %v8253_v15  ;;  %3651 = vmatpush1.bf16.msra.mxu1 %v8255_v16  ;;  %v8384_v11 = vcombine.high %v639_v6, %v647_v7  ;;  %v662_v13 = vld [vmem:[%s10598_s17 + $0x840] sm:$0xff]  ;;  %v655_v14 = vld [vmem:[%s10598_s17 + $0x808] sm:$0xff]  ;;  %v8381_v16 = vcombine.low %v638_v3, %v646_v5 }
  0xe7   : > { %3570 = vmatprep.subr.bf16.mxu0 %v8270_v17  ;;  %3652 = vmatprep.subr.bf16.mxu1 %v8272_v18  ;;  %v663_v15 = vld [vmem:[%s10598_s17 + $0x848] sm:$0xff]  ;;  %v390_v17 = vld [vmem:[#allocation2] sm:$0xff]  ;;  %v8383_v18 = vcombine.low %v639_v6, %v647_v7  ;;  %v8398_v19 = vcombine.high %v654_v12, %v662_v13  ;;  %v8397_v27 = vcombine.low %v654_v12, %v662_v13 }
  0xe8   : > { %v8400_v20 = vcombine.high %v655_v14, %v663_v15  ;;  %v670_v21 = vld [vmem:[%s10598_s17 + $0x880] sm:$0xff]  ;;  %v8399_v28 = vcombine.low %v655_v14, %v663_v15  ;;  %v711_v43 = vld [vmem:[%s10598_s17 + $0x9c8] sm:$0xff] }
  0xe9   : > { %v678_v22 = vld [vmem:[%s10598_s17 + $0x8c0] sm:$0xff]  ;;  %v727_v51 = vld [vmem:[%s10598_s17 + $0xa48] sm:$0xff] }
  0xea   : > { %3571 = vmatpush1.bf16.msra.mxu0 %v8269_v23  ;;  %3653 = vmatpush1.bf16.msra.mxu1 %v8271_v24  ;;  %v10692_v23 = vpack.c.bf16 %v390_v17, %v390_v17  ;;  %v671_v24 = vld [vmem:[%s10598_s17 + $0x888] sm:$0xff]  ;;  %v8414_v29 = vcombine.high %v670_v21, %v678_v22  ;;  %v686_v30 = vld [vmem:[%s10598_s17 + $0x900] sm:$0xff]  ;;  %v8413_v36 = vcombine.low %v670_v21, %v678_v22 }
  0xeb   : > { %3572 = vmatprep.subr.bf16.mxu0 %v8286_v25  ;;  %3654 = vmatprep.subr.bf16.mxu1 %v8288_v26  ;;  %v679_v25 = vld [vmem:[%s10598_s17 + $0x8c8] sm:$0xff]  ;;  %v393_v26 = vld [vmem:[#allocation2 + $0x18] sm:$0xff]  ;;  %v790_v17 = vld [vmem:[%s10598_s17 + $0xc40] sm:$0xff] }
  0xec   : > { %v10700_v35 = vpack.c.bf16 %v393_v26, %v393_v26  ;;  %v8415_v37 = vcombine.low %v671_v24, %v679_v25  ;;  %v743_v59 = vld [vmem:[%s10598_s17 + $0xac8] sm:$0xff]  ;;  %v806_v26 = vld [vmem:[%s10598_s17 + $0xcc0] sm:$0xff] }
  0xed   : > { %v759_v3 = vld [vmem:[%s10598_s17 + $0xb48] sm:$0xff] }
  0xee   : > { %3573 = vmatpush1.bf16.msra.mxu0 %v8285_v31  ;;  %3655 = vmatpush1.bf16.msra.mxu1 %v8287_v32  ;;  %v694_v31 = vld [vmem:[%s10598_s17 + $0x940] sm:$0xff]  ;;  %v8416_v32 = vcombine.high %v671_v24, %v679_v25  ;;  %v775_v12 = vld [vmem:[%s10598_s17 + $0xbc8] sm:$0xff] }
  0xef   : > { %3574 = vmatprep.subr.bf16.mxu0 %v8302_v33  ;;  %3656 = vmatprep.subr.bf16.mxu1 %v8304_v34  ;;  %v687_v33 = vld [vmem:[%s10598_s17 + $0x908] sm:$0xff]  ;;  %v8430_v38 = vcombine.high %v686_v30, %v694_v31  ;;  %v8429_v44 = vcombine.low %v686_v30, %v694_v31  ;;  %v798_v25 = vld [vmem:[%s10598_s17 + $0xc80] sm:$0xff] }
  0xf0   : > { %v695_v34 = vld [vmem:[%s10598_s17 + $0x948] sm:$0xff] }
  0xf1   : > { %v8431_v45 = vcombine.low %v687_v33, %v695_v34 }
  0xf2   : > { %3575 = vmatpush1.bf16.msra.mxu0 %v8301_v39  ;;  %3657 = vmatpush1.bf16.msra.mxu1 %v8303_v40  ;;  %v702_v39 = vld [vmem:[%s10598_s17 + $0x980] sm:$0xff] }
  0xf3   : > { %3576 = vmatprep.subr.bf16.mxu0 %v8318_v41  ;;  %3658 = vmatprep.subr.bf16.mxu1 %v8320_v42  ;;  %v710_v40 = vld [vmem:[%s10598_s17 + $0x9c0] sm:$0xff]  ;;  %v703_v41 = vld [vmem:[%s10598_s17 + $0x988] sm:$0xff]  ;;  %v8432_v42 = vcombine.high %v687_v33, %v695_v34 }
  0xf4   : > { %v8446_v46 = vcombine.high %v702_v39, %v710_v40  ;;  %v8445_v52 = vcombine.low %v702_v39, %v710_v40  ;;  %v8447_v53 = vcombine.low %v703_v41, %v711_v43  ;;  %v814_v33 = vld [vmem:[%s10598_s17 + $0xd00] sm:$0xff]  ;;  %v8541_v39 = vcombine.low %v798_v25, %v806_v26 }
  0xf5   : > { %v822_v34 = vld [vmem:[%s10598_s17 + $0xd40] sm:$0xff] }
  0xf6   : > { %3577 = vmatpush1.bf16.msra.mxu0 %v8317_v47  ;;  %3659 = vmatpush1.bf16.msra.mxu1 %v8319_v48  ;;  %v718_v47 = vld [vmem:[%s10598_s17 + $0xa00] sm:$0xff] }
  0xf7   : > { %3578 = vmatprep.subr.bf16.mxu0 %v8334_v49  ;;  %3660 = vmatprep.subr.bf16.mxu1 %v8336_v50  ;;  %v726_v48 = vld [vmem:[%s10598_s17 + $0xa40] sm:$0xff]  ;;  %v719_v49 = vld [vmem:[%s10598_s17 + $0xa08] sm:$0xff]  ;;  %v8448_v50 = vcombine.high %v703_v41, %v711_v43  ;;  %v8558_v41 = vcombine.high %v814_v33, %v822_v34 }
  0xf8   : > { %v8462_v54 = vcombine.high %v718_v47, %v726_v48  ;;  %v8461_v60 = vcombine.low %v718_v47, %v726_v48  ;;  %v8463_v61 = vcombine.low %v719_v49, %v727_v51  ;;  %v838_v43 = vld [vmem:[%s10598_s17 + $0xdc0] sm:$0xff]  ;;  %v8557_v47 = vcombine.low %v814_v33, %v822_v34  ;;  %v425_v33 = vld [vmem:[%s10598_s17 + $0xd8] sm:$0xff] }
  0xfa   : > { %3579 = vmatpush1.bf16.msra.mxu0 %v8333_v55  ;;  %3661 = vmatpush1.bf16.msra.mxu1 %v8335_v56  ;;  %v734_v55 = vld [vmem:[%s10598_s17 + $0xa80] sm:$0xff] }
  0xfb   : > { %3580 = vmatprep.subr.bf16.mxu0 %v8350_v57  ;;  %3662 = vmatprep.subr.bf16.mxu1 %v8352_v58  ;;  %v742_v56 = vld [vmem:[%s10598_s17 + $0xac0] sm:$0xff]  ;;  %v735_v57 = vld [vmem:[%s10598_s17 + $0xa88] sm:$0xff]  ;;  %v8464_v58 = vcombine.high %v719_v49, %v727_v51 }
  0xfc   : > { %v8478_v62 = vcombine.high %v734_v55, %v742_v56  ;;  %v8477_v5 = vcombine.low %v734_v55, %v742_v56  ;;  %v8479_v6 = vcombine.low %v735_v57, %v743_v59  ;;  %v854_v51 = vld [vmem:[%s10598_s17 + $0xe40] sm:$0xff] }
  0xfe   : > { %3581 = vmatpush1.bf16.msra.mxu0 %v8349_v63  ;;  %3663 = vmatpush1.bf16.msra.mxu1 %v8351_v0  ;;  %v750_v63 = vld [vmem:[%s10598_s17 + $0xb00] sm:$0xff] }
  0xff   : > { %3582 = vmatprep.subr.bf16.mxu0 %v8366_v1  ;;  %3664 = vmatprep.subr.bf16.mxu1 %v8368_v2  ;;  %v758_v0 = vld [vmem:[%s10598_s17 + $0xb40] sm:$0xff]  ;;  %v751_v1 = vld [vmem:[%s10598_s17 + $0xb08] sm:$0xff]  ;;  %v8480_v2 = vcombine.high %v735_v57, %v743_v59 }
 0x100   : > { %v8494_v7 = vcombine.high %v750_v63, %v758_v0  ;;  %v8493_v13 = vcombine.low %v750_v63, %v758_v0  ;;  %v8495_v14 = vcombine.low %v751_v1, %v759_v3  ;;  %v870_v59 = vld [vmem:[%s10598_s17 + $0xec0] sm:$0xff] }
 0x102   : > { %3583 = vmatpush1.bf16.msra.mxu0 %v8365_v8  ;;  %3665 = vmatpush1.bf16.msra.mxu1 %v8367_v9  ;;  %v766_v8 = vld [vmem:[%s10598_s17 + $0xb80] sm:$0xff] }
 0x103   : > { %3584 = vmatprep.subr.bf16.mxu0 %v8382_v10  ;;  %3666 = vmatprep.subr.bf16.mxu1 %v8384_v11  ;;  %v774_v9 = vld [vmem:[%s10598_s17 + $0xbc0] sm:$0xff]  ;;  %v767_v10 = vld [vmem:[%s10598_s17 + $0xb88] sm:$0xff]  ;;  %v8496_v11 = vcombine.high %v751_v1, %v759_v3 }
 0x104   : > { %v8510_v15 = vcombine.high %v766_v8, %v774_v9  ;;  %v8509_v21 = vcombine.low %v766_v8, %v774_v9  ;;  %v8511_v22 = vcombine.low %v767_v10, %v775_v12  ;;  %v886_v3 = vld [vmem:[%s10598_s17 + $0xf40] sm:$0xff] }
 0x106   : > { %3585 = vmatpush1.bf16.msra.mxu0 %v8381_v16  ;;  %3667 = vmatpush1.bf16.msra.mxu1 %v8383_v18  ;;  %v782_v16 = vld [vmem:[%s10598_s17 + $0xc00] sm:$0xff]  ;;  %v783_v18 = vld [vmem:[%s10598_s17 + $0xc08] sm:$0xff] }
 0x107   : > { %3595 = vmatprep.subr.bf16.mxu0 %v8398_v19  ;;  %3677 = vmatprep.subr.bf16.mxu1 %v8400_v20  ;;  %v8512_v19 = vcombine.high %v767_v10, %v775_v12  ;;  %v791_v20 = vld [vmem:[%s10598_s17 + $0xc48] sm:$0xff]  ;;  %v8526_v24 = vcombine.high %v782_v16, %v790_v17  ;;  %v8525_v30 = vcombine.low %v782_v16, %v790_v17  ;;  %v902_v12 = vld [vmem:[%s10598_s17 + $0xfc0] sm:$0xff] }
 0x108   : > { %v8527_v31 = vcombine.low %v783_v18, %v791_v20 }
 0x109   : > { %3587 = vmatmul.mubr.bf16.vlgmr.msra.gmra.mrb[0].mxu0 %v10692_v23  ;;  %3669 = vmatmul.mubr.bf16.vlgmr.msra.gmra.mrb[0].mxu1 %v10692_v23 }
 0x10a   : > { %3596 = vmatpush1.bf16.msra.mxu0 %v8397_v27  ;;  %3678 = vmatpush1.bf16.msra.mxu1 %v8399_v28  ;;  %v799_v27 = vld [vmem:[%s10598_s17 + $0xc88] sm:$0xff]  ;;  %v8528_v28 = vcombine.high %v783_v18, %v791_v20  ;;  %v408_v20 = vld [vmem:[%s10598_s17 + $0x50] sm:$0xff] }
 0x10b   : > { %3597 = vmatprep.subr.bf16.mxu0 %v8414_v29  ;;  %3679 = vmatprep.subr.bf16.mxu1 %v8416_v32  ;;  %v807_v29 = vld [vmem:[%s10598_s17 + $0xcc8] sm:$0xff]  ;;  %v8542_v32 = vcombine.high %v798_v25, %v806_v26  ;;  %v409_v25 = vld [vmem:[%s10598_s17 + $0x58] sm:$0xff] }
 0x10c   : > { %3627 = vmatprep.mubr.bf16.mxu0 %v10700_v35  ;;  %3709 = vmatprep.mubr.bf16.mxu1 %v10700_v35  ;;  %v8543_v40 = vcombine.low %v799_v27, %v807_v29 }
 0x10e   : > { %3598 = vmatpush1.bf16.msra.mxu0 %v8413_v36  ;;  %3680 = vmatpush1.bf16.msra.mxu1 %v8415_v37  ;;  %v815_v36 = vld [vmem:[%s10598_s17 + $0xd08] sm:$0xff]  ;;  %v8544_v37 = vcombine.high %v799_v27, %v807_v29  ;;  %v416_v29 = vld [vmem:[%s10598_s17 + $0x90] sm:$0xff] }
 0x10f   : > { %3599 = vmatprep.subr.bf16.mxu0 %v8430_v38  ;;  %3681 = vmatprep.subr.bf16.mxu1 %v8432_v42  ;;  %v823_v38 = vld [vmem:[%s10598_s17 + $0xd48] sm:$0xff]  ;;  %v830_v42 = vld [vmem:[%s10598_s17 + $0xd80] sm:$0xff] }
 0x110   : > { %v8559_v48 = vcombine.low %v815_v36, %v823_v38  ;;  %v8574_v49 = vcombine.high %v830_v42, %v838_v43  ;;  %v8573_v55 = vcombine.low %v830_v42, %v838_v43  ;;  %v441_v43 = vld [vmem:[%s10598_s17 + $0x158] sm:$0xff] }
 0x112   : > { %3600 = vmatpush1.bf16.msra.mxu0 %v8429_v44  ;;  %3682 = vmatpush1.bf16.msra.mxu1 %v8431_v45  ;;  %v831_v44 = vld [vmem:[%s10598_s17 + $0xd88] sm:$0xff]  ;;  %v8560_v45 = vcombine.high %v815_v36, %v823_v38 }
 0x113   : > { %3601 = vmatprep.subr.bf16.mxu0 %v8446_v46  ;;  %3683 = vmatprep.subr.bf16.mxu1 %v8448_v50  ;;  %v839_v46 = vld [vmem:[%s10598_s17 + $0xdc8] sm:$0xff]  ;;  %v846_v50 = vld [vmem:[%s10598_s17 + $0xe00] sm:$0xff] }
 0x114   : > { %v8575_v56 = vcombine.low %v831_v44, %v839_v46  ;;  %v8590_v57 = vcombine.high %v846_v50, %v854_v51  ;;  %v8589_v63 = vcombine.low %v846_v50, %v854_v51  ;;  %v457_v51 = vld [vmem:[%s10598_s17 + $0x1d8] sm:$0xff] }
 0x116   : > { %3602 = vmatpush1.bf16.msra.mxu0 %v8445_v52  ;;  %3684 = vmatpush1.bf16.msra.mxu1 %v8447_v53  ;;  %v847_v52 = vld [vmem:[%s10598_s17 + $0xe08] sm:$0xff]  ;;  %v8576_v53 = vcombine.high %v831_v44, %v839_v46 }
 0x117   : > { %3603 = vmatprep.subr.bf16.mxu0 %v8462_v54  ;;  %3685 = vmatprep.subr.bf16.mxu1 %v8464_v58  ;;  %v855_v54 = vld [vmem:[%s10598_s17 + $0xe48] sm:$0xff]  ;;  %v862_v58 = vld [vmem:[%s10598_s17 + $0xe80] sm:$0xff] }
 0x118   : > { %v8591_v0 = vcombine.low %v847_v52, %v855_v54  ;;  %v8606_v1 = vcombine.high %v862_v58, %v870_v59  ;;  %v8605_v8 = vcombine.low %v862_v58, %v870_v59  ;;  %v473_v59 = vld [vmem:[%s10598_s17 + $0x258] sm:$0xff] }
 0x11a   : > { %3604 = vmatpush1.bf16.msra.mxu0 %v8461_v60  ;;  %3686 = vmatpush1.bf16.msra.mxu1 %v8463_v61  ;;  %v863_v60 = vld [vmem:[%s10598_s17 + $0xe88] sm:$0xff]  ;;  %v8592_v61 = vcombine.high %v847_v52, %v855_v54 }
 0x11b   : > { %3605 = vmatprep.subr.bf16.mxu0 %v8478_v62  ;;  %3687 = vmatprep.subr.bf16.mxu1 %v8480_v2  ;;  %v871_v62 = vld [vmem:[%s10598_s17 + $0xec8] sm:$0xff]  ;;  %v878_v2 = vld [vmem:[%s10598_s17 + $0xf00] sm:$0xff] }
 0x11c   : > { %v8607_v9 = vcombine.low %v863_v60, %v871_v62  ;;  %v8622_v10 = vcombine.high %v878_v2, %v886_v3  ;;  %v8621_v16 = vcombine.low %v878_v2, %v886_v3  ;;  %v489_v3 = vld [vmem:[%s10598_s17 + $0x2d8] sm:$0xff] }
 0x11e   : > { %3606 = vmatpush1.bf16.msra.mxu0 %v8477_v5  ;;  %3688 = vmatpush1.bf16.msra.mxu1 %v8479_v6  ;;  %v879_v5 = vld [vmem:[%s10598_s17 + $0xf08] sm:$0xff]  ;;  %v8608_v6 = vcombine.high %v863_v60, %v871_v62 }
 0x11f   : > { %3607 = vmatprep.subr.bf16.mxu0 %v8494_v7  ;;  %3689 = vmatprep.subr.bf16.mxu1 %v8496_v11  ;;  %v887_v7 = vld [vmem:[%s10598_s17 + $0xf48] sm:$0xff]  ;;  %v894_v11 = vld [vmem:[%s10598_s17 + $0xf80] sm:$0xff] }
 0x120   : > { %v8623_v17 = vcombine.low %v879_v5, %v887_v7  ;;  %v8638_v18 = vcombine.high %v894_v11, %v902_v12  ;;  %v8637_v26 = vcombine.low %v894_v11, %v902_v12  ;;  %v505_v12 = vld [vmem:[%s10598_s17 + $0x358] sm:$0xff] }
 0x122   : > { %3608 = vmatpush1.bf16.msra.mxu0 %v8493_v13  ;;  %3690 = vmatpush1.bf16.msra.mxu1 %v8495_v14  ;;  %v895_v13 = vld [vmem:[%s10598_s17 + $0xf88] sm:$0xff]  ;;  %v8624_v14 = vcombine.high %v879_v5, %v887_v7 }
 0x123   : > { %3609 = vmatprep.subr.bf16.mxu0 %v8510_v15  ;;  %3691 = vmatprep.subr.bf16.mxu1 %v8512_v19  ;;  %v903_v15 = vld [vmem:[%s10598_s17 + $0xfc8] sm:$0xff]  ;;  %v400_v19 = vld [vmem:[%s10598_s17 + $0x10] sm:$0xff] }
 0x124   : > { %v8639_v27 = vcombine.low %v895_v13, %v903_v15  ;;  %v8145_v36 = vcombine.low %v400_v19, %v408_v20 }
 0x126   : > { %3610 = vmatpush1.bf16.msra.mxu0 %v8509_v21  ;;  %3692 = vmatpush1.bf16.msra.mxu1 %v8511_v22  ;;  %v401_v21 = vld [vmem:[%s10598_s17 + $0x18] sm:$0xff]  ;;  %v8640_v22 = vcombine.high %v895_v13, %v903_v15 }
 0x127   : > { %3611 = vmatprep.subr.bf16.mxu0 %v8526_v24  ;;  %3693 = vmatprep.subr.bf16.mxu1 %v8528_v28  ;;  %v392_v24 = vld [vmem:[#allocation2 + $0x10] sm:$0xff]  ;;  %v8146_v28 = vcombine.high %v400_v19, %v408_v20  ;;  %v521_v20 = vld [vmem:[%s10598_s17 + $0x3d8] sm:$0xff] }
 0x128   : > { %v10766_v34 = vpack.c.bf16 %v392_v24, %v392_v24 }
 0x12a   : > { %3612 = vmatpush1.bf16.msra.mxu0 %v8525_v30  ;;  %3694 = vmatpush1.bf16.msra.mxu1 %v8527_v31  ;;  %v424_v30 = vld [vmem:[%s10598_s17 + $0xd0] sm:$0xff]  ;;  %v417_v31 = vld [vmem:[%s10598_s17 + $0x98] sm:$0xff] }
 0x12b   : > { %3613 = vmatprep.subr.bf16.mxu0 %v8542_v32  ;;  %3695 = vmatprep.subr.bf16.mxu1 %v8544_v37  ;;  %v8148_v32 = vcombine.high %v401_v21, %v409_v25  ;;  %v8147_v37 = vcombine.low %v401_v21, %v409_v25  ;;  %v8162_v38 = vcombine.high %v416_v29, %v424_v30  ;;  %v528_v25 = vld [vmem:[%s10598_s17 + $0x410] sm:$0xff] }
 0x12c   : > { %v8164_v42 = vcombine.high %v417_v31, %v425_v33  ;;  %v8161_v44 = vcombine.low %v416_v29, %v424_v30  ;;  %v537_v29 = vld [vmem:[%s10598_s17 + $0x458] sm:$0xff] }
 0x12e   : > { %3614 = vmatpush1.bf16.msra.mxu0 %v8541_v39  ;;  %3696 = vmatpush1.bf16.msra.mxu1 %v8543_v40  ;;  %v432_v39 = vld [vmem:[%s10598_s17 + $0x110] sm:$0xff] }
 0x12f   : > { %3615 = vmatprep.subr.bf16.mxu0 %v8558_v41  ;;  %3697 = vmatprep.subr.bf16.mxu1 %v8560_v45  ;;  %v440_v40 = vld [vmem:[%s10598_s17 + $0x150] sm:$0xff]  ;;  %v433_v41 = vld [vmem:[%s10598_s17 + $0x118] sm:$0xff]  ;;  %v8163_v45 = vcombine.low %v417_v31, %v425_v33 }
 0x130   : > { %v8178_v46 = vcombine.high %v432_v39, %v440_v40  ;;  %v8180_v50 = vcombine.high %v433_v41, %v441_v43  ;;  %v8177_v52 = vcombine.low %v432_v39, %v440_v40  ;;  %v544_v33 = vld [vmem:[%s10598_s17 + $0x490] sm:$0xff]  ;;  %v553_v39 = vld [vmem:[%s10598_s17 + $0x4d8] sm:$0xff] }
 0x132   : > { %3616 = vmatpush1.bf16.msra.mxu0 %v8557_v47  ;;  %3698 = vmatpush1.bf16.msra.mxu1 %v8559_v48  ;;  %v448_v47 = vld [vmem:[%s10598_s17 + $0x190] sm:$0xff] }
 0x133   : > { %3617 = vmatprep.subr.bf16.mxu0 %v8574_v49  ;;  %3699 = vmatprep.subr.bf16.mxu1 %v8576_v53  ;;  %v456_v48 = vld [vmem:[%s10598_s17 + $0x1d0] sm:$0xff]  ;;  %v449_v49 = vld [vmem:[%s10598_s17 + $0x198] sm:$0xff]  ;;  %v8179_v53 = vcombine.low %v433_v41, %v441_v43 }
 0x134   : > { %v8194_v54 = vcombine.high %v448_v47, %v456_v48  ;;  %v8196_v58 = vcombine.high %v449_v49, %v457_v51  ;;  %v8193_v60 = vcombine.low %v448_v47, %v456_v48  ;;  %v560_v43 = vld [vmem:[%s10598_s17 + $0x510] sm:$0xff]  ;;  %v569_v47 = vld [vmem:[%s10598_s17 + $0x558] sm:$0xff] }
 0x136   : > { %3618 = vmatpush1.bf16.msra.mxu0 %v8573_v55  ;;  %3700 = vmatpush1.bf16.msra.mxu1 %v8575_v56  ;;  %v464_v55 = vld [vmem:[%s10598_s17 + $0x210] sm:$0xff] }
 0x137   : > { %3619 = vmatprep.subr.bf16.mxu0 %v8590_v57  ;;  %3701 = vmatprep.subr.bf16.mxu1 %v8592_v61  ;;  %v472_v56 = vld [vmem:[%s10598_s17 + $0x250] sm:$0xff]  ;;  %v465_v57 = vld [vmem:[%s10598_s17 + $0x218] sm:$0xff]  ;;  %v8195_v61 = vcombine.low %v449_v49, %v457_v51 }
 0x138   : > { %v8210_v62 = vcombine.high %v464_v55, %v472_v56  ;;  %v8212_v2 = vcombine.high %v465_v57, %v473_v59  ;;  %v8209_v5 = vcombine.low %v464_v55, %v472_v56  ;;  %v576_v51 = vld [vmem:[%s10598_s17 + $0x590] sm:$0xff]  ;;  %v585_v55 = vld [vmem:[%s10598_s17 + $0x5d8] sm:$0xff] }
 0x13a   : > { %3620 = vmatpush1.bf16.msra.mxu0 %v8589_v63  ;;  %3702 = vmatpush1.bf16.msra.mxu1 %v8591_v0  ;;  %v480_v63 = vld [vmem:[%s10598_s17 + $0x290] sm:$0xff] }
 0x13b   : > { %3621 = vmatprep.subr.bf16.mxu0 %v8606_v1  ;;  %3703 = vmatprep.subr.bf16.mxu1 %v8608_v6  ;;  %v488_v0 = vld [vmem:[%s10598_s17 + $0x2d0] sm:$0xff]  ;;  %v481_v1 = vld [vmem:[%s10598_s17 + $0x298] sm:$0xff]  ;;  %v8211_v6 = vcombine.low %v465_v57, %v473_v59 }
 0x13c   : > { %v8226_v7 = vcombine.high %v480_v63, %v488_v0  ;;  %v8228_v11 = vcombine.high %v481_v1, %v489_v3  ;;  %v8225_v13 = vcombine.low %v480_v63, %v488_v0  ;;  %v592_v59 = vld [vmem:[%s10598_s17 + $0x610] sm:$0xff]  ;;  %v601_v63 = vld [vmem:[%s10598_s17 + $0x658] sm:$0xff] }
 0x13e   : > { %3622 = vmatpush1.bf16.msra.mxu0 %v8605_v8  ;;  %3704 = vmatpush1.bf16.msra.mxu1 %v8607_v9  ;;  %v496_v8 = vld [vmem:[%s10598_s17 + $0x310] sm:$0xff] }
 0x13f   : > { %3623 = vmatprep.subr.bf16.mxu0 %v8622_v10  ;;  %3705 = vmatprep.subr.bf16.mxu1 %v8624_v14  ;;  %v504_v9 = vld [vmem:[%s10598_s17 + $0x350] sm:$0xff]  ;;  %v497_v10 = vld [vmem:[%s10598_s17 + $0x318] sm:$0xff]  ;;  %v8227_v14 = vcombine.low %v481_v1, %v489_v3 }
 0x140   : > { %v8242_v15 = vcombine.high %v496_v8, %v504_v9  ;;  %v8244_v19 = vcombine.high %v497_v10, %v505_v12  ;;  %v8241_v21 = vcombine.low %v496_v8, %v504_v9  ;;  %v608_v3 = vld [vmem:[%s10598_s17 + $0x690] sm:$0xff]  ;;  %v617_v8 = vld [vmem:[%s10598_s17 + $0x6d8] sm:$0xff] }
 0x142   : > { %3624 = vmatpush1.bf16.msra.mxu0 %v8621_v16  ;;  %3706 = vmatpush1.bf16.msra.mxu1 %v8623_v17  ;;  %v512_v16 = vld [vmem:[%s10598_s17 + $0x390] sm:$0xff] }
 0x143   : > { %3625 = vmatprep.subr.bf16.mxu0 %v8638_v18  ;;  %3707 = vmatprep.subr.bf16.mxu1 %v8640_v22  ;;  %v520_v17 = vld [vmem:[%s10598_s17 + $0x3d0] sm:$0xff]  ;;  %v513_v18 = vld [vmem:[%s10598_s17 + $0x398] sm:$0xff]  ;;  %v8243_v22 = vcombine.low %v497_v10, %v505_v12 }
 0x144   : > { %v8258_v24 = vcombine.high %v512_v16, %v520_v17  ;;  %v8257_v30 = vcombine.low %v512_v16, %v520_v17  ;;  %v8259_v31 = vcombine.low %v513_v18, %v521_v20  ;;  %v624_v12 = vld [vmem:[%s10598_s17 + $0x710] sm:$0xff]  ;;  %v633_v16 = vld [vmem:[%s10598_s17 + $0x758] sm:$0xff] }
 0x146   : > { %3626 = vmatpush1.bf16.msra.mxu0 %v8637_v26  ;;  %3708 = vmatpush1.bf16.msra.mxu1 %v8639_v27  ;;  %v536_v26 = vld [vmem:[%s10598_s17 + $0x450] sm:$0xff]  ;;  %v529_v27 = vld [vmem:[%s10598_s17 + $0x418] sm:$0xff] }
 0x147   : > { %3718 = vmatprep.subr.bf16.mxu0 %v8146_v28  ;;  %3800 = vmatprep.subr.bf16.mxu1 %v8148_v32  ;;  %v8260_v28 = vcombine.high %v513_v18, %v521_v20  ;;  %v8274_v32 = vcombine.high %v528_v25, %v536_v26  ;;  %v8273_v40 = vcombine.low %v528_v25, %v536_v26  ;;  %v640_v20 = vld [vmem:[%s10598_s17 + $0x790] sm:$0xff]  ;;  %v649_v25 = vld [vmem:[%s10598_s17 + $0x7d8] sm:$0xff] }
 0x148   : > { %v8275_v41 = vcombine.low %v529_v27, %v537_v29 }
 0x149   : > { %3628 = vmatmul.mubr.bf16.vlgmr.msra.gmra.mrb[0].mxu0 %v10766_v34  ;;  %3710 = vmatmul.mubr.bf16.vlgmr.msra.gmra.mrb[0].mxu1 %v10766_v34 }
 0x14a   : > { %3719 = vmatpush1.bf16.msra.mxu0 %v8145_v36  ;;  %3801 = vmatpush1.bf16.msra.mxu1 %v8147_v37  ;;  %v552_v36 = vld [vmem:[%s10598_s17 + $0x4d0] sm:$0xff]  ;;  %v545_v37 = vld [vmem:[%s10598_s17 + $0x498] sm:$0xff] }
 0x14b   : > { %3720 = vmatprep.subr.bf16.mxu0 %v8162_v38  ;;  %3802 = vmatprep.subr.bf16.mxu1 %v8164_v42  ;;  %v8276_v38 = vcombine.high %v529_v27, %v537_v29  ;;  %v8290_v42 = vcombine.high %v544_v33, %v552_v36  ;;  %v8289_v48 = vcombine.low %v544_v33, %v552_v36  ;;  %v656_v29 = vld [vmem:[%s10598_s17 + $0x810] sm:$0xff]  ;;  %v665_v33 = vld [vmem:[%s10598_s17 + $0x858] sm:$0xff] }
 0x14c   : > { %3750 = vmatprep.mubr.bf16.mxu0 %v10648_v4  ;;  %3832 = vmatprep.mubr.bf16.mxu1 %v10648_v4  ;;  %v8291_v49 = vcombine.low %v545_v37, %v553_v39 }
 0x14e   : > { %3721 = vmatpush1.bf16.msra.mxu0 %v8161_v44  ;;  %3803 = vmatpush1.bf16.msra.mxu1 %v8163_v45  ;;  %v568_v44 = vld [vmem:[%s10598_s17 + $0x550] sm:$0xff]  ;;  %v561_v45 = vld [vmem:[%s10598_s17 + $0x518] sm:$0xff] }
 0x14f   : > { %3722 = vmatprep.subr.bf16.mxu0 %v8178_v46  ;;  %3804 = vmatprep.subr.bf16.mxu1 %v8180_v50  ;;  %v8292_v46 = vcombine.high %v545_v37, %v553_v39  ;;  %v8306_v50 = vcombine.high %v560_v43, %v568_v44  ;;  %v8305_v56 = vcombine.low %v560_v43, %v568_v44  ;;  %v672_v39 = vld [vmem:[%s10598_s17 + $0x890] sm:$0xff]  ;;  %v681_v43 = vld [vmem:[%s10598_s17 + $0x8d8] sm:$0xff] }
 0x150   : > { %v8307_v57 = vcombine.low %v561_v45, %v569_v47 }
 0x152   : > { %3723 = vmatpush1.bf16.msra.mxu0 %v8177_v52  ;;  %3805 = vmatpush1.bf16.msra.mxu1 %v8179_v53  ;;  %v584_v52 = vld [vmem:[%s10598_s17 + $0x5d0] sm:$0xff]  ;;  %v577_v53 = vld [vmem:[%s10598_s17 + $0x598] sm:$0xff] }
 0x153   : > { %3724 = vmatprep.subr.bf16.mxu0 %v8194_v54  ;;  %3806 = vmatprep.subr.bf16.mxu1 %v8196_v58  ;;  %v8308_v54 = vcombine.high %v561_v45, %v569_v47  ;;  %v8322_v58 = vcombine.high %v576_v51, %v584_v52  ;;  %v8321_v0 = vcombine.low %v576_v51, %v584_v52  ;;  %v688_v47 = vld [vmem:[%s10598_s17 + $0x910] sm:$0xff]  ;;  %v697_v51 = vld [vmem:[%s10598_s17 + $0x958] sm:$0xff] }
 0x154   : > { %v8323_v1 = vcombine.low %v577_v53, %v585_v55 }
 0x156   : > { %3725 = vmatpush1.bf16.msra.mxu0 %v8193_v60  ;;  %3807 = vmatpush1.bf16.msra.mxu1 %v8195_v61  ;;  %v600_v60 = vld [vmem:[%s10598_s17 + $0x650] sm:$0xff]  ;;  %v593_v61 = vld [vmem:[%s10598_s17 + $0x618] sm:$0xff] }
 0x157   : > { %3726 = vmatprep.subr.bf16.mxu0 %v8210_v62  ;;  %3808 = vmatprep.subr.bf16.mxu1 %v8212_v2  ;;  %v8324_v62 = vcombine.high %v577_v53, %v585_v55  ;;  %v8338_v2 = vcombine.high %v592_v59, %v600_v60  ;;  %v8337_v9 = vcombine.low %v592_v59, %v600_v60  ;;  %v704_v55 = vld [vmem:[%s10598_s17 + $0x990] sm:$0xff]  ;;  %v713_v59 = vld [vmem:[%s10598_s17 + $0x9d8] sm:$0xff] }
 0x158   : > { %v8339_v10 = vcombine.low %v593_v61, %v601_v63 }
 0x15a   : > { %3727 = vmatpush1.bf16.msra.mxu0 %v8209_v5  ;;  %3809 = vmatpush1.bf16.msra.mxu1 %v8211_v6  ;;  %v616_v5 = vld [vmem:[%s10598_s17 + $0x6d0] sm:$0xff]  ;;  %v609_v6 = vld [vmem:[%s10598_s17 + $0x698] sm:$0xff] }
 0x15b   : > { %3728 = vmatprep.subr.bf16.mxu0 %v8226_v7  ;;  %3810 = vmatprep.subr.bf16.mxu1 %v8228_v11  ;;  %v8340_v7 = vcombine.high %v593_v61, %v601_v63  ;;  %v8354_v11 = vcombine.high %v608_v3, %v616_v5  ;;  %v8353_v17 = vcombine.low %v608_v3, %v616_v5  ;;  %v720_v63 = vld [vmem:[%s10598_s17 + $0xa10] sm:$0xff]  ;;  %v729_v3 = vld [vmem:[%s10598_s17 + $0xa58] sm:$0xff] }
 0x15c   : > { %v8355_v18 = vcombine.low %v609_v6, %v617_v8 }
 0x15e   : > { %3729 = vmatpush1.bf16.msra.mxu0 %v8225_v13  ;;  %3811 = vmatpush1.bf16.msra.mxu1 %v8227_v14  ;;  %v632_v13 = vld [vmem:[%s10598_s17 + $0x750] sm:$0xff]  ;;  %v625_v14 = vld [vmem:[%s10598_s17 + $0x718] sm:$0xff] }
 0x15f   : > { %3730 = vmatprep.subr.bf16.mxu0 %v8242_v15  ;;  %3812 = vmatprep.subr.bf16.mxu1 %v8244_v19  ;;  %v8356_v15 = vcombine.high %v609_v6, %v617_v8  ;;  %v8370_v19 = vcombine.high %v624_v12, %v632_v13  ;;  %v8369_v26 = vcombine.low %v624_v12, %v632_v13  ;;  %v736_v8 = vld [vmem:[%s10598_s17 + $0xa90] sm:$0xff]  ;;  %v745_v12 = vld [vmem:[%s10598_s17 + $0xad8] sm:$0xff] }
 0x160   : > { %v8371_v27 = vcombine.low %v625_v14, %v633_v16 }
 0x162   : > { %3731 = vmatpush1.bf16.msra.mxu0 %v8241_v21  ;;  %3813 = vmatpush1.bf16.msra.mxu1 %v8243_v22  ;;  %v648_v21 = vld [vmem:[%s10598_s17 + $0x7d0] sm:$0xff]  ;;  %v641_v22 = vld [vmem:[%s10598_s17 + $0x798] sm:$0xff] }
 0x163   : > { %3732 = vmatprep.subr.bf16.mxu0 %v8258_v24  ;;  %3814 = vmatprep.subr.bf16.mxu1 %v8260_v28  ;;  %v8372_v24 = vcombine.high %v625_v14, %v633_v16  ;;  %v8386_v28 = vcombine.high %v640_v20, %v648_v21  ;;  %v8385_v36 = vcombine.low %v640_v20, %v648_v21  ;;  %v752_v16 = vld [vmem:[%s10598_s17 + $0xb10] sm:$0xff]  ;;  %v761_v20 = vld [vmem:[%s10598_s17 + $0xb58] sm:$0xff] }
 0x164   : > { %v8387_v37 = vcombine.low %v641_v22, %v649_v25 }
 0x166   : > { %3733 = vmatpush1.bf16.msra.mxu0 %v8257_v30  ;;  %3815 = vmatpush1.bf16.msra.mxu1 %v8259_v31  ;;  %v664_v30 = vld [vmem:[%s10598_s17 + $0x850] sm:$0xff]  ;;  %v657_v31 = vld [vmem:[%s10598_s17 + $0x818] sm:$0xff] }
 0x167   : > { %3734 = vmatprep.subr.bf16.mxu0 %v8274_v32  ;;  %3816 = vmatprep.subr.bf16.mxu1 %v8276_v38  ;;  %v8388_v32 = vcombine.high %v641_v22, %v649_v25  ;;  %v8402_v38 = vcombine.high %v656_v29, %v664_v30  ;;  %v8401_v44 = vcombine.low %v656_v29, %v664_v30  ;;  %v768_v25 = vld [vmem:[%s10598_s17 + $0xb90] sm:$0xff]  ;;  %v777_v29 = vld [vmem:[%s10598_s17 + $0xbd8] sm:$0xff] }
 0x168   : > { %v8403_v45 = vcombine.low %v657_v31, %v665_v33 }
 0x16a   : > { %3735 = vmatpush1.bf16.msra.mxu0 %v8273_v40  ;;  %3817 = vmatpush1.bf16.msra.mxu1 %v8275_v41  ;;  %v680_v40 = vld [vmem:[%s10598_s17 + $0x8d0] sm:$0xff]  ;;  %v673_v41 = vld [vmem:[%s10598_s17 + $0x898] sm:$0xff] }
 0x16b   : > { %3736 = vmatprep.subr.bf16.mxu0 %v8290_v42  ;;  %3818 = vmatprep.subr.bf16.mxu1 %v8292_v46  ;;  %v8404_v42 = vcombine.high %v657_v31, %v665_v33  ;;  %v8418_v46 = vcombine.high %v672_v39, %v680_v40  ;;  %v8417_v52 = vcombine.low %v672_v39, %v680_v40  ;;  %v784_v33 = vld [vmem:[%s10598_s17 + $0xc10] sm:$0xff]  ;;  %v793_v39 = vld [vmem:[%s10598_s17 + $0xc58] sm:$0xff] }
 0x16c   : > { %v8419_v53 = vcombine.low %v673_v41, %v681_v43 }
 0x16e   : > { %3737 = vmatpush1.bf16.msra.mxu0 %v8289_v48  ;;  %3819 = vmatpush1.bf16.msra.mxu1 %v8291_v49  ;;  %v696_v48 = vld [vmem:[%s10598_s17 + $0x950] sm:$0xff]  ;;  %v689_v49 = vld [vmem:[%s10598_s17 + $0x918] sm:$0xff] }
 0x16f   : > { %3738 = vmatprep.subr.bf16.mxu0 %v8306_v50  ;;  %3820 = vmatprep.subr.bf16.mxu1 %v8308_v54  ;;  %v8420_v50 = vcombine.high %v673_v41, %v681_v43  ;;  %v8434_v54 = vcombine.high %v688_v47, %v696_v48  ;;  %v8433_v60 = vcombine.low %v688_v47, %v696_v48  ;;  %v800_v43 = vld [vmem:[%s10598_s17 + $0xc90] sm:$0xff]  ;;  %v809_v47 = vld [vmem:[%s10598_s17 + $0xcd8] sm:$0xff] }
 0x170   : > { %v8435_v61 = vcombine.low %v689_v49, %v697_v51 }
 0x172   : > { %3739 = vmatpush1.bf16.msra.mxu0 %v8305_v56  ;;  %3821 = vmatpush1.bf16.msra.mxu1 %v8307_v57  ;;  %v712_v56 = vld [vmem:[%s10598_s17 + $0x9d0] sm:$0xff]  ;;  %v705_v57 = vld [vmem:[%s10598_s17 + $0x998] sm:$0xff] }
 0x173   : > { %3740 = vmatprep.subr.bf16.mxu0 %v8322_v58  ;;  %3822 = vmatprep.subr.bf16.mxu1 %v8324_v62  ;;  %v8436_v58 = vcombine.high %v689_v49, %v697_v51  ;;  %v8450_v62 = vcombine.high %v704_v55, %v712_v56  ;;  %v8449_v5 = vcombine.low %v704_v55, %v712_v56  ;;  %v816_v51 = vld [vmem:[%s10598_s17 + $0xd10] sm:$0xff]  ;;  %v825_v55 = vld [vmem:[%s10598_s17 + $0xd58] sm:$0xff] }
 0x174   : > { %v8451_v6 = vcombine.low %v705_v57, %v713_v59 }
 0x176   : > { %3741 = vmatpush1.bf16.msra.mxu0 %v8321_v0  ;;  %3823 = vmatpush1.bf16.msra.mxu1 %v8323_v1  ;;  %v728_v0 = vld [vmem:[%s10598_s17 + $0xa50] sm:$0xff]  ;;  %v721_v1 = vld [vmem:[%s10598_s17 + $0xa18] sm:$0xff] }
 0x177   : > { %3742 = vmatprep.subr.bf16.mxu0 %v8338_v2  ;;  %3824 = vmatprep.subr.bf16.mxu1 %v8340_v7  ;;  %v8452_v2 = vcombine.high %v705_v57, %v713_v59  ;;  %v8466_v7 = vcombine.high %v720_v63, %v728_v0  ;;  %v8465_v13 = vcombine.low %v720_v63, %v728_v0  ;;  %v832_v59 = vld [vmem:[%s10598_s17 + $0xd90] sm:$0xff]  ;;  %v841_v63 = vld [vmem:[%s10598_s17 + $0xdd8] sm:$0xff] }
 0x178   : > { %v8467_v14 = vcombine.low %v721_v1, %v729_v3 }
 0x17a   : > { %3743 = vmatpush1.bf16.msra.mxu0 %v8337_v9  ;;  %3825 = vmatpush1.bf16.msra.mxu1 %v8339_v10  ;;  %v744_v9 = vld [vmem:[%s10598_s17 + $0xad0] sm:$0xff]  ;;  %v737_v10 = vld [vmem:[%s10598_s17 + $0xa98] sm:$0xff] }
 0x17b   : > { %3744 = vmatprep.subr.bf16.mxu0 %v8354_v11  ;;  %3826 = vmatprep.subr.bf16.mxu1 %v8356_v15  ;;  %v8468_v11 = vcombine.high %v721_v1, %v729_v3  ;;  %v8482_v15 = vcombine.high %v736_v8, %v744_v9  ;;  %v8481_v21 = vcombine.low %v736_v8, %v744_v9  ;;  %v848_v3 = vld [vmem:[%s10598_s17 + $0xe10] sm:$0xff]  ;;  %v857_v8 = vld [vmem:[%s10598_s17 + $0xe58] sm:$0xff] }
 0x17c   : > { %v8483_v22 = vcombine.low %v737_v10, %v745_v12 }
 0x17e   : > { %3745 = vmatpush1.bf16.msra.mxu0 %v8353_v17  ;;  %3827 = vmatpush1.bf16.msra.mxu1 %v8355_v18  ;;  %v760_v17 = vld [vmem:[%s10598_s17 + $0xb50] sm:$0xff]  ;;  %v753_v18 = vld [vmem:[%s10598_s17 + $0xb18] sm:$0xff] }
 0x17f   : > { %3746 = vmatprep.subr.bf16.mxu0 %v8370_v19  ;;  %3828 = vmatprep.subr.bf16.mxu1 %v8372_v24  ;;  %v8484_v19 = vcombine.high %v737_v10, %v745_v12  ;;  %v8498_v24 = vcombine.high %v752_v16, %v760_v17  ;;  %v8497_v30 = vcombine.low %v752_v16, %v760_v17  ;;  %v864_v12 = vld [vmem:[%s10598_s17 + $0xe90] sm:$0xff]  ;;  %v873_v16 = vld [vmem:[%s10598_s17 + $0xed8] sm:$0xff] }
 0x180   : > { %v8499_v31 = vcombine.low %v753_v18, %v761_v20 }
 0x182   : > { %3747 = vmatpush1.bf16.msra.mxu0 %v8369_v26  ;;  %3829 = vmatpush1.bf16.msra.mxu1 %v8371_v27  ;;  %v776_v26 = vld [vmem:[%s10598_s17 + $0xbd0] sm:$0xff]  ;;  %v8500_v27 = vcombine.high %v753_v18, %v761_v20 }
 0x183   : > { %3748 = vmatprep.subr.bf16.mxu0 %v8386_v28  ;;  %3830 = vmatprep.subr.bf16.mxu1 %v8388_v32  ;;  %v769_v28 = vld [vmem:[%s10598_s17 + $0xb98] sm:$0xff]  ;;  %v8514_v32 = vcombine.high %v768_v25, %v776_v26  ;;  %v8513_v40 = vcombine.low %v768_v25, %v776_v26  ;;  %v880_v20 = vld [vmem:[%s10598_s17 + $0xf10] sm:$0xff] }
 0x184   : > { %v8515_v41 = vcombine.low %v769_v28, %v777_v29  ;;  %v889_v25 = vld [vmem:[%s10598_s17 + $0xf58] sm:$0xff] }
 0x186   : > { %3749 = vmatpush1.bf16.msra.mxu0 %v8385_v36  ;;  %3831 = vmatpush1.bf16.msra.mxu1 %v8387_v37  ;;  %v792_v36 = vld [vmem:[%s10598_s17 + $0xc50] sm:$0xff]  ;;  %v785_v37 = vld [vmem:[%s10598_s17 + $0xc18] sm:$0xff] }
 0x187   : > { %3759 = vmatprep.subr.bf16.mxu0 %v8402_v38  ;;  %3841 = vmatprep.subr.bf16.mxu1 %v8404_v42  ;;  %v8516_v38 = vcombine.high %v769_v28, %v777_v29  ;;  %v8530_v42 = vcombine.high %v784_v33, %v792_v36  ;;  %v8529_v48 = vcombine.low %v784_v33, %v792_v36  ;;  %v896_v29 = vld [vmem:[%s10598_s17 + $0xf90] sm:$0xff]  ;;  %v905_v33 = vld [vmem:[%s10598_s17 + $0xfd8] sm:$0xff] }
 0x188   : > { %v8531_v49 = vcombine.low %v785_v37, %v793_v39 }
 0x189   : > { %3751 = vmatmul.mubr.bf16.vlgmr.msra.gmra.mrb[4].mxu0 %v10692_v23  ;;  %3833 = vmatmul.mubr.bf16.vlgmr.msra.gmra.mrb[4].mxu1 %v10692_v23 }
 0x18a   : > { %3760 = vmatpush1.bf16.msra.mxu0 %v8401_v44  ;;  %3842 = vmatpush1.bf16.msra.mxu1 %v8403_v45  ;;  %v808_v44 = vld [vmem:[%s10598_s17 + $0xcd0] sm:$0xff]  ;;  %v801_v45 = vld [vmem:[%s10598_s17 + $0xc98] sm:$0xff] }
 0x18b   : > { %3761 = vmatprep.subr.bf16.mxu0 %v8418_v46  ;;  %3843 = vmatprep.subr.bf16.mxu1 %v8420_v50  ;;  %v8532_v46 = vcombine.high %v785_v37, %v793_v39  ;;  %v8546_v50 = vcombine.high %v800_v43, %v808_v44  ;;  %v8545_v56 = vcombine.low %v800_v43, %v808_v44  ;;  %v402_v39 = vld [vmem:[%s10598_s17 + $0x20] sm:$0xff]  ;;  %v411_v43 = vld [vmem:[%s10598_s17 + $0x68] sm:$0xff] }
 0x18c   : > { %3791 = vmatprep.mubr.bf16.mxu0 %v10700_v35  ;;  %3873 = vmatprep.mubr.bf16.mxu1 %v10700_v35  ;;  %v8547_v57 = vcombine.low %v801_v45, %v809_v47 }
 0x18e   : > { %3762 = vmatpush1.bf16.msra.mxu0 %v8417_v52  ;;  %3844 = vmatpush1.bf16.msra.mxu1 %v8419_v53  ;;  %v824_v52 = vld [vmem:[%s10598_s17 + $0xd50] sm:$0xff]  ;;  %v817_v53 = vld [vmem:[%s10598_s17 + $0xd18] sm:$0xff] }
 0x18f   : > { %3763 = vmatprep.subr.bf16.mxu0 %v8434_v54  ;;  %3845 = vmatprep.subr.bf16.mxu1 %v8436_v58  ;;  %v8548_v54 = vcombine.high %v801_v45, %v809_v47  ;;  %v8562_v58 = vcombine.high %v816_v51, %v824_v52  ;;  %v8561_v0 = vcombine.low %v816_v51, %v824_v52  ;;  %v418_v47 = vld [vmem:[%s10598_s17 + $0xa0] sm:$0xff]  ;;  %v427_v51 = vld [vmem:[%s10598_s17 + $0xe8] sm:$0xff] }
 0x190   : > { %v8563_v1 = vcombine.low %v817_v53, %v825_v55 }
 0x192   : > { %3764 = vmatpush1.bf16.msra.mxu0 %v8433_v60  ;;  %3846 = vmatpush1.bf16.msra.mxu1 %v8435_v61  ;;  %v840_v60 = vld [vmem:[%s10598_s17 + $0xdd0] sm:$0xff]  ;;  %v833_v61 = vld [vmem:[%s10598_s17 + $0xd98] sm:$0xff] }
 0x193   : > { %3765 = vmatprep.subr.bf16.mxu0 %v8450_v62  ;;  %3847 = vmatprep.subr.bf16.mxu1 %v8452_v2  ;;  %v8564_v62 = vcombine.high %v817_v53, %v825_v55  ;;  %v8578_v2 = vcombine.high %v832_v59, %v840_v60  ;;  %v8577_v9 = vcombine.low %v832_v59, %v840_v60  ;;  %v434_v55 = vld [vmem:[%s10598_s17 + $0x120] sm:$0xff]  ;;  %v443_v59 = vld [vmem:[%s10598_s17 + $0x168] sm:$0xff] }
 0x194   : > { %v8579_v10 = vcombine.low %v833_v61, %v841_v63 }
 0x196   : > { %3766 = vmatpush1.bf16.msra.mxu0 %v8449_v5  ;;  %3848 = vmatpush1.bf16.msra.mxu1 %v8451_v6  ;;  %v856_v5 = vld [vmem:[%s10598_s17 + $0xe50] sm:$0xff]  ;;  %v849_v6 = vld [vmem:[%s10598_s17 + $0xe18] sm:$0xff] }
 0x197   : > { %3767 = vmatprep.subr.bf16.mxu0 %v8466_v7  ;;  %3849 = vmatprep.subr.bf16.mxu1 %v8468_v11  ;;  %v8580_v7 = vcombine.high %v833_v61, %v841_v63  ;;  %v8594_v11 = vcombine.high %v848_v3, %v856_v5  ;;  %v8593_v17 = vcombine.low %v848_v3, %v856_v5  ;;  %v450_v63 = vld [vmem:[%s10598_s17 + $0x1a0] sm:$0xff]  ;;  %v459_v3 = vld [vmem:[%s10598_s17 + $0x1e8] sm:$0xff] }
 0x198   : > { %v8595_v18 = vcombine.low %v849_v6, %v857_v8 }
 0x19a   : > { %3768 = vmatpush1.bf16.msra.mxu0 %v8465_v13  ;;  %3850 = vmatpush1.bf16.msra.mxu1 %v8467_v14  ;;  %v872_v13 = vld [vmem:[%s10598_s17 + $0xed0] sm:$0xff]  ;;  %v865_v14 = vld [vmem:[%s10598_s17 + $0xe98] sm:$0xff] }
 0x19b   : > { %3769 = vmatprep.subr.bf16.mxu0 %v8482_v15  ;;  %3851 = vmatprep.subr.bf16.mxu1 %v8484_v19  ;;  %v8596_v15 = vcombine.high %v849_v6, %v857_v8  ;;  %v8610_v19 = vcombine.high %v864_v12, %v872_v13  ;;  %v8609_v26 = vcombine.low %v864_v12, %v872_v13  ;;  %v466_v8 = vld [vmem:[%s10598_s17 + $0x220] sm:$0xff]  ;;  %v475_v12 = vld [vmem:[%s10598_s17 + $0x268] sm:$0xff] }
 0x19e   : > { %3770 = vmatpush1.bf16.msra.mxu0 %v8481_v21  ;;  %3852 = vmatpush1.bf16.msra.mxu1 %v8483_v22  ;;  %v888_v21 = vld [vmem:[%s10598_s17 + $0xf50] sm:$0xff]  ;;  %v881_v22 = vld [vmem:[%s10598_s17 + $0xf18] sm:$0xff] }
 0x19f   : > { %3771 = vmatprep.subr.bf16.mxu0 %v8498_v24  ;;  %3853 = vmatprep.subr.bf16.mxu1 %v8500_v27  ;;  %v8612_v24 = vcombine.high %v865_v14, %v873_v16  ;;  %v8611_v27 = vcombine.low %v865_v14, %v873_v16  ;;  %v8626_v28 = vcombine.high %v880_v20, %v888_v21  ;;  %v482_v16 = vld [vmem:[%s10598_s17 + $0x2a0] sm:$0xff] }
 0x1a0   : > { %v8625_v36 = vcombine.low %v880_v20, %v888_v21  ;;  %v8627_v37 = vcombine.low %v881_v22, %v889_v25  ;;  %v491_v20 = vld [vmem:[%s10598_s17 + $0x2e8] sm:$0xff] }
 0x1a2   : > { %3772 = vmatpush1.bf16.msra.mxu0 %v8497_v30  ;;  %3854 = vmatpush1.bf16.msra.mxu1 %v8499_v31  ;;  %v904_v30 = vld [vmem:[%s10598_s17 + $0xfd0] sm:$0xff]  ;;  %v897_v31 = vld [vmem:[%s10598_s17 + $0xf98] sm:$0xff] }
 0x1a3   : > { %3773 = vmatprep.subr.bf16.mxu0 %v8514_v32  ;;  %3855 = vmatprep.subr.bf16.mxu1 %v8516_v38  ;;  %v8628_v32 = vcombine.high %v881_v22, %v889_v25  ;;  %v8642_v38 = vcombine.high %v896_v29, %v904_v30  ;;  %v8641_v44 = vcombine.low %v896_v29, %v904_v30  ;;  %v498_v25 = vld [vmem:[%s10598_s17 + $0x320] sm:$0xff]  ;;  %v507_v29 = vld [vmem:[%s10598_s17 + $0x368] sm:$0xff] }
 0x1a4   : > { %v8643_v45 = vcombine.low %v897_v31, %v905_v33 }
 0x1a6   : > { %3774 = vmatpush1.bf16.msra.mxu0 %v8513_v40  ;;  %3856 = vmatpush1.bf16.msra.mxu1 %v8515_v41  ;;  %v410_v40 = vld [vmem:[%s10598_s17 + $0x60] sm:$0xff]  ;;  %v403_v41 = vld [vmem:[%s10598_s17 + $0x28] sm:$0xff] }
 0x1a7   : > { %3775 = vmatprep.subr.bf16.mxu0 %v8530_v42  ;;  %3857 = vmatprep.subr.bf16.mxu1 %v8532_v46  ;;  %v8644_v42 = vcombine.high %v897_v31, %v905_v33  ;;  %v8150_v46 = vcombine.high %v402_v39, %v410_v40  ;;  %v8149_v52 = vcombine.low %v402_v39, %v410_v40  ;;  %v514_v33 = vld [vmem:[%s10598_s17 + $0x3a0] sm:$0xff]  ;;  %v523_v39 = vld [vmem:[%s10598_s17 + $0x3e8] sm:$0xff] }
 0x1a8   : > { %v8151_v53 = vcombine.low %v403_v41, %v411_v43 }
 0x1aa   : > { %3776 = vmatpush1.bf16.msra.mxu0 %v8529_v48  ;;  %3858 = vmatpush1.bf16.msra.mxu1 %v8531_v49  ;;  %v426_v48 = vld [vmem:[%s10598_s17 + $0xe0] sm:$0xff]  ;;  %v419_v49 = vld [vmem:[%s10598_s17 + $0xa8] sm:$0xff] }
 0x1ab   : > { %3777 = vmatprep.subr.bf16.mxu0 %v8546_v50  ;;  %3859 = vmatprep.subr.bf16.mxu1 %v8548_v54  ;;  %v8152_v50 = vcombine.high %v403_v41, %v411_v43  ;;  %v8166_v54 = vcombine.high %v418_v47, %v426_v48  ;;  %v8165_v60 = vcombine.low %v418_v47, %v426_v48  ;;  %v530_v43 = vld [vmem:[%s10598_s17 + $0x420] sm:$0xff]  ;;  %v539_v47 = vld [vmem:[%s10598_s17 + $0x468] sm:$0xff] }
 0x1ac   : > { %v8167_v61 = vcombine.low %v419_v49, %v427_v51 }
 0x1ae   : > { %3778 = vmatpush1.bf16.msra.mxu0 %v8545_v56  ;;  %3860 = vmatpush1.bf16.msra.mxu1 %v8547_v57  ;;  %v442_v56 = vld [vmem:[%s10598_s17 + $0x160] sm:$0xff]  ;;  %v435_v57 = vld [vmem:[%s10598_s17 + $0x128] sm:$0xff] }
 0x1af   : > { %3779 = vmatprep.subr.bf16.mxu0 %v8562_v58  ;;  %3861 = vmatprep.subr.bf16.mxu1 %v8564_v62  ;;  %v8168_v58 = vcombine.high %v419_v49, %v427_v51  ;;  %v8182_v62 = vcombine.high %v434_v55, %v442_v56  ;;  %v8181_v5 = vcombine.low %v434_v55, %v442_v56  ;;  %v546_v51 = vld [vmem:[%s10598_s17 + $0x4a0] sm:$0xff]  ;;  %v555_v55 = vld [vmem:[%s10598_s17 + $0x4e8] sm:$0xff] }
 0x1b0   : > { %v8183_v6 = vcombine.low %v435_v57, %v443_v59 }
 0x1b2   : > { %3780 = vmatpush1.bf16.msra.mxu0 %v8561_v0  ;;  %3862 = vmatpush1.bf16.msra.mxu1 %v8563_v1  ;;  %v458_v0 = vld [vmem:[%s10598_s17 + $0x1e0] sm:$0xff]  ;;  %v451_v1 = vld [vmem:[%s10598_s17 + $0x1a8] sm:$0xff] }
 0x1b3   : > { %3781 = vmatprep.subr.bf16.mxu0 %v8578_v2  ;;  %3863 = vmatprep.subr.bf16.mxu1 %v8580_v7  ;;  %v8184_v2 = vcombine.high %v435_v57, %v443_v59  ;;  %v8198_v7 = vcombine.high %v450_v63, %v458_v0  ;;  %v8197_v13 = vcombine.low %v450_v63, %v458_v0  ;;  %v562_v59 = vld [vmem:[%s10598_s17 + $0x520] sm:$0xff]  ;;  %v571_v63 = vld [vmem:[%s10598_s17 + $0x568] sm:$0xff] }
 0x1b4   : > { %v8199_v14 = vcombine.low %v451_v1, %v459_v3 }
 0x1b6   : > { %3782 = vmatpush1.bf16.msra.mxu0 %v8577_v9  ;;  %3864 = vmatpush1.bf16.msra.mxu1 %v8579_v10  ;;  %v474_v9 = vld [vmem:[%s10598_s17 + $0x260] sm:$0xff]  ;;  %v467_v10 = vld [vmem:[%s10598_s17 + $0x228] sm:$0xff] }
 0x1b7   : > { %3783 = vmatprep.subr.bf16.mxu0 %v8594_v11  ;;  %3865 = vmatprep.subr.bf16.mxu1 %v8596_v15  ;;  %v8200_v11 = vcombine.high %v451_v1, %v459_v3  ;;  %v8214_v15 = vcombine.high %v466_v8, %v474_v9  ;;  %v8213_v21 = vcombine.low %v466_v8, %v474_v9  ;;  %v578_v3 = vld [vmem:[%s10598_s17 + $0x5a0] sm:$0xff]  ;;  %v587_v8 = vld [vmem:[%s10598_s17 + $0x5e8] sm:$0xff] }
 0x1b8   : > { %v8215_v22 = vcombine.low %v467_v10, %v475_v12 }
 0x1ba   : > { %3784 = vmatpush1.bf16.msra.mxu0 %v8593_v17  ;;  %3866 = vmatpush1.bf16.msra.mxu1 %v8595_v18  ;;  %v490_v17 = vld [vmem:[%s10598_s17 + $0x2e0] sm:$0xff]  ;;  %v483_v18 = vld [vmem:[%s10598_s17 + $0x2a8] sm:$0xff] }
 0x1bb   : > { %3785 = vmatprep.subr.bf16.mxu0 %v8610_v19  ;;  %3867 = vmatprep.subr.bf16.mxu1 %v8612_v24  ;;  %v8216_v19 = vcombine.high %v467_v10, %v475_v12  ;;  %v8230_v24 = vcombine.high %v482_v16, %v490_v17  ;;  %v8229_v30 = vcombine.low %v482_v16, %v490_v17  ;;  %v594_v12 = vld [vmem:[%s10598_s17 + $0x620] sm:$0xff]  ;;  %v603_v16 = vld [vmem:[%s10598_s17 + $0x668] sm:$0xff] }
 0x1bc   : > { %v8231_v31 = vcombine.low %v483_v18, %v491_v20 }
 0x1be   : > { %3786 = vmatpush1.bf16.msra.mxu0 %v8609_v26  ;;  %3868 = vmatpush1.bf16.msra.mxu1 %v8611_v27  ;;  %v506_v26 = vld [vmem:[%s10598_s17 + $0x360] sm:$0xff]  ;;  %v499_v27 = vld [vmem:[%s10598_s17 + $0x328] sm:$0xff] }
 0x1bf   : > { %3787 = vmatprep.subr.bf16.mxu0 %v8626_v28  ;;  %3869 = vmatprep.subr.bf16.mxu1 %v8628_v32  ;;  %v8232_v28 = vcombine.high %v483_v18, %v491_v20  ;;  %v8246_v32 = vcombine.high %v498_v25, %v506_v26  ;;  %v8245_v40 = vcombine.low %v498_v25, %v506_v26  ;;  %v610_v20 = vld [vmem:[%s10598_s17 + $0x6a0] sm:$0xff]  ;;  %v619_v25 = vld [vmem:[%s10598_s17 + $0x6e8] sm:$0xff] }
 0x1c0   : > { %v8247_v41 = vcombine.low %v499_v27, %v507_v29 }
 0x1c2   : > { %3788 = vmatpush1.bf16.msra.mxu0 %v8625_v36  ;;  %3870 = vmatpush1.bf16.msra.mxu1 %v8627_v37  ;;  %v522_v36 = vld [vmem:[%s10598_s17 + $0x3e0] sm:$0xff]  ;;  %v515_v37 = vld [vmem:[%s10598_s17 + $0x3a8] sm:$0xff] }
 0x1c3   : > { %3789 = vmatprep.subr.bf16.mxu0 %v8642_v38  ;;  %3871 = vmatprep.subr.bf16.mxu1 %v8644_v42  ;;  %v8248_v38 = vcombine.high %v499_v27, %v507_v29  ;;  %v8262_v42 = vcombine.high %v514_v33, %v522_v36  ;;  %v8261_v48 = vcombine.low %v514_v33, %v522_v36  ;;  %v626_v29 = vld [vmem:[%s10598_s17 + $0x720] sm:$0xff]  ;;  %v635_v33 = vld [vmem:[%s10598_s17 + $0x768] sm:$0xff] }
 0x1c4   : > { %v8263_v49 = vcombine.low %v515_v37, %v523_v39 }
 0x1c6   : > { %3790 = vmatpush1.bf16.msra.mxu0 %v8641_v44  ;;  %3872 = vmatpush1.bf16.msra.mxu1 %v8643_v45  ;;  %v538_v44 = vld [vmem:[%s10598_s17 + $0x460] sm:$0xff]  ;;  %v531_v45 = vld [vmem:[%s10598_s17 + $0x428] sm:$0xff] }
 0x1c7   : > { %3882 = vmatprep.subr.bf16.mxu0 %v8150_v46  ;;  %3964 = vmatprep.subr.bf16.mxu1 %v8152_v50  ;;  %v8264_v46 = vcombine.high %v515_v37, %v523_v39  ;;  %v8278_v50 = vcombine.high %v530_v43, %v538_v44  ;;  %v8277_v56 = vcombine.low %v530_v43, %v538_v44  ;;  %v642_v39 = vld [vmem:[%s10598_s17 + $0x7a0] sm:$0xff]  ;;  %v651_v43 = vld [vmem:[%s10598_s17 + $0x7e8] sm:$0xff] }
 0x1c8   : > { %v8279_v57 = vcombine.low %v531_v45, %v539_v47 }
 0x1c9   : > { %3792 = vmatmul.mubr.bf16.vlgmr.msra.gmra.mrb[4].mxu0 %v10766_v34  ;;  %3874 = vmatmul.mubr.bf16.vlgmr.msra.gmra.mrb[4].mxu1 %v10766_v34 }
 0x1ca   : > { %3883 = vmatpush1.bf16.msra.mxu0 %v8149_v52  ;;  %3965 = vmatpush1.bf16.msra.mxu1 %v8151_v53  ;;  %v554_v52 = vld [vmem:[%s10598_s17 + $0x4e0] sm:$0xff]  ;;  %v547_v53 = vld [vmem:[%s10598_s17 + $0x4a8] sm:$0xff] }
 0x1cb   : > { %3884 = vmatprep.subr.bf16.mxu0 %v8166_v54  ;;  %3966 = vmatprep.subr.bf16.mxu1 %v8168_v58  ;;  %v8280_v54 = vcombine.high %v531_v45, %v539_v47  ;;  %v8294_v58 = vcombine.high %v546_v51, %v554_v52  ;;  %v8293_v0 = vcombine.low %v546_v51, %v554_v52  ;;  %v658_v47 = vld [vmem:[%s10598_s17 + $0x820] sm:$0xff]  ;;  %v667_v51 = vld [vmem:[%s10598_s17 + $0x868] sm:$0xff] }
 0x1cc   : > { %3914 = vmatprep.mubr.bf16.mxu0 %v10648_v4  ;;  %3996 = vmatprep.mubr.bf16.mxu1 %v10648_v4  ;;  %v8295_v1 = vcombine.low %v547_v53, %v555_v55 }
 0x1ce   : > { %3885 = vmatpush1.bf16.msra.mxu0 %v8165_v60  ;;  %3967 = vmatpush1.bf16.msra.mxu1 %v8167_v61  ;;  %v570_v60 = vld [vmem:[%s10598_s17 + $0x560] sm:$0xff]  ;;  %v563_v61 = vld [vmem:[%s10598_s17 + $0x528] sm:$0xff] }
 0x1cf   : > { %3886 = vmatprep.subr.bf16.mxu0 %v8182_v62  ;;  %3968 = vmatprep.subr.bf16.mxu1 %v8184_v2  ;;  %v8296_v62 = vcombine.high %v547_v53, %v555_v55  ;;  %v8310_v2 = vcombine.high %v562_v59, %v570_v60  ;;  %v8309_v9 = vcombine.low %v562_v59, %v570_v60  ;;  %v674_v55 = vld [vmem:[%s10598_s17 + $0x8a0] sm:$0xff]  ;;  %v683_v59 = vld [vmem:[%s10598_s17 + $0x8e8] sm:$0xff] }
 0x1d0   : > { %v8311_v10 = vcombine.low %v563_v61, %v571_v63 }
 0x1d2   : > { %3887 = vmatpush1.bf16.msra.mxu0 %v8181_v5  ;;  %3969 = vmatpush1.bf16.msra.mxu1 %v8183_v6  ;;  %v586_v5 = vld [vmem:[%s10598_s17 + $0x5e0] sm:$0xff]  ;;  %v579_v6 = vld [vmem:[%s10598_s17 + $0x5a8] sm:$0xff] }
 0x1d3   : > { %3888 = vmatprep.subr.bf16.mxu0 %v8198_v7  ;;  %3970 = vmatprep.subr.bf16.mxu1 %v8200_v11  ;;  %v8312_v7 = vcombine.high %v563_v61, %v571_v63  ;;  %v8326_v11 = vcombine.high %v578_v3, %v586_v5  ;;  %v8325_v17 = vcombine.low %v578_v3, %v586_v5  ;;  %v690_v63 = vld [vmem:[%s10598_s17 + $0x920] sm:$0xff]  ;;  %v699_v3 = vld [vmem:[%s10598_s17 + $0x968] sm:$0xff] }
 0x1d4   : > { %v8327_v18 = vcombine.low %v579_v6, %v587_v8 }
 0x1d6   : > { %3889 = vmatpush1.bf16.msra.mxu0 %v8197_v13  ;;  %3971 = vmatpush1.bf16.msra.mxu1 %v8199_v14  ;;  %v602_v13 = vld [vmem:[%s10598_s17 + $0x660] sm:$0xff]  ;;  %v595_v14 = vld [vmem:[%s10598_s17 + $0x628] sm:$0xff] }
 0x1d7   : > { %3890 = vmatprep.subr.bf16.mxu0 %v8214_v15  ;;  %3972 = vmatprep.subr.bf16.mxu1 %v8216_v19  ;;  %v8328_v15 = vcombine.high %v579_v6, %v587_v8  ;;  %v8342_v19 = vcombine.high %v594_v12, %v602_v13  ;;  %v8341_v26 = vcombine.low %v594_v12, %v602_v13  ;;  %v715_v12 = vld [vmem:[%s10598_s17 + $0x9e8] sm:$0xff] }
 0x1d8   : > { %v8343_v27 = vcombine.low %v595_v14, %v603_v16 }
 0x1da   : > { %3891 = vmatpush1.bf16.msra.mxu0 %v8213_v21  ;;  %3973 = vmatpush1.bf16.msra.mxu1 %v8215_v22  ;;  %v618_v21 = vld [vmem:[%s10598_s17 + $0x6e0] sm:$0xff]  ;;  %v611_v22 = vld [vmem:[%s10598_s17 + $0x6a8] sm:$0xff] }
 0x1db   : > { %3892 = vmatprep.subr.bf16.mxu0 %v8230_v24  ;;  %3974 = vmatprep.subr.bf16.mxu1 %v8232_v28  ;;  %v8344_v24 = vcombine.high %v595_v14, %v603_v16  ;;  %v8358_v28 = vcombine.high %v610_v20, %v618_v21  ;;  %v8357_v36 = vcombine.low %v610_v20, %v618_v21  ;;  %v731_v20 = vld [vmem:[%s10598_s17 + $0xa68] sm:$0xff] }
 0x1dc   : > { %v8359_v37 = vcombine.low %v611_v22, %v619_v25 }
 0x1de   : > { %3893 = vmatpush1.bf16.msra.mxu0 %v8229_v30  ;;  %3975 = vmatpush1.bf16.msra.mxu1 %v8231_v31  ;;  %v634_v30 = vld [vmem:[%s10598_s17 + $0x760] sm:$0xff]  ;;  %v627_v31 = vld [vmem:[%s10598_s17 + $0x728] sm:$0xff] }
 0x1df   : > { %3894 = vmatprep.subr.bf16.mxu0 %v8246_v32  ;;  %3976 = vmatprep.subr.bf16.mxu1 %v8248_v38  ;;  %v8360_v32 = vcombine.high %v611_v22, %v619_v25  ;;  %v8374_v38 = vcombine.high %v626_v29, %v634_v30  ;;  %v8373_v44 = vcombine.low %v626_v29, %v634_v30  ;;  %v747_v29 = vld [vmem:[%s10598_s17 + $0xae8] sm:$0xff] }
 0x1e0   : > { %v8375_v45 = vcombine.low %v627_v31, %v635_v33 }
 0x1e2   : > { %3895 = vmatpush1.bf16.msra.mxu0 %v8245_v40  ;;  %3977 = vmatpush1.bf16.msra.mxu1 %v8247_v41  ;;  %v650_v40 = vld [vmem:[%s10598_s17 + $0x7e0] sm:$0xff]  ;;  %v643_v41 = vld [vmem:[%s10598_s17 + $0x7a8] sm:$0xff] }
 0x1e3   : > { %3896 = vmatprep.subr.bf16.mxu0 %v8262_v42  ;;  %3978 = vmatprep.subr.bf16.mxu1 %v8264_v46  ;;  %v8376_v42 = vcombine.high %v627_v31, %v635_v33  ;;  %v8390_v46 = vcombine.high %v642_v39, %v650_v40  ;;  %v8389_v52 = vcombine.low %v642_v39, %v650_v40  ;;  %v763_v39 = vld [vmem:[%s10598_s17 + $0xb68] sm:$0xff] }
 0x1e4   : > { %v8391_v53 = vcombine.low %v643_v41, %v651_v43 }
 0x1e6   : > { %3897 = vmatpush1.bf16.msra.mxu0 %v8261_v48  ;;  %3979 = vmatpush1.bf16.msra.mxu1 %v8263_v49  ;;  %v666_v48 = vld [vmem:[%s10598_s17 + $0x860] sm:$0xff]  ;;  %v659_v49 = vld [vmem:[%s10598_s17 + $0x828] sm:$0xff] }
 0x1e7   : > { %3898 = vmatprep.subr.bf16.mxu0 %v8278_v50  ;;  %3980 = vmatprep.subr.bf16.mxu1 %v8280_v54  ;;  %v8392_v50 = vcombine.high %v643_v41, %v651_v43  ;;  %v8406_v54 = vcombine.high %v658_v47, %v666_v48  ;;  %v8405_v60 = vcombine.low %v658_v47, %v666_v48 }
 0x1e8   : > { %v8407_v61 = vcombine.low %v659_v49, %v667_v51 }
 0x1ea   : > { %3899 = vmatpush1.bf16.msra.mxu0 %v8277_v56  ;;  %3981 = vmatpush1.bf16.msra.mxu1 %v8279_v57  ;;  %v682_v56 = vld [vmem:[%s10598_s17 + $0x8e0] sm:$0xff]  ;;  %v675_v57 = vld [vmem:[%s10598_s17 + $0x8a8] sm:$0xff] }
 0x1eb   : > { %3900 = vmatprep.subr.bf16.mxu0 %v8294_v58  ;;  %3982 = vmatprep.subr.bf16.mxu1 %v8296_v62  ;;  %v8408_v58 = vcombine.high %v659_v49, %v667_v51  ;;  %v8422_v62 = vcombine.high %v674_v55, %v682_v56  ;;  %v8421_v5 = vcombine.low %v674_v55, %v682_v56  ;;  %v771_v49 = vld [vmem:[%s10598_s17 + $0xba8] sm:$0xff] }
 0x1ec   : > { %v8423_v6 = vcombine.low %v675_v57, %v683_v59 }
 0x1ee   : > { %3901 = vmatpush1.bf16.msra.mxu0 %v8293_v0  ;;  %3983 = vmatpush1.bf16.msra.mxu1 %v8295_v1  ;;  %v8424_v0 = vcombine.high %v675_v57, %v683_v59  ;;  %v698_v1 = vld [vmem:[%s10598_s17 + $0x960] sm:$0xff] }
 0x1ef   : > { %3902 = vmatprep.subr.bf16.mxu0 %v8310_v2  ;;  %3984 = vmatprep.subr.bf16.mxu1 %v8312_v7  ;;  %v691_v2 = vld [vmem:[%s10598_s17 + $0x928] sm:$0xff]  ;;  %v8438_v7 = vcombine.high %v690_v63, %v698_v1  ;;  %v8437_v13 = vcombine.low %v690_v63, %v698_v1 }
 0x1f0   : > { %v8440_v8 = vcombine.high %v691_v2, %v699_v3  ;;  %v8439_v14 = vcombine.low %v691_v2, %v699_v3  ;;  %v795_v63 = vld [vmem:[%s10598_s17 + $0xc68] sm:$0xff] }
 0x1f2   : > { %3903 = vmatpush1.bf16.msra.mxu0 %v8309_v9  ;;  %3985 = vmatpush1.bf16.msra.mxu1 %v8311_v10  ;;  %v706_v9 = vld [vmem:[%s10598_s17 + $0x9a0] sm:$0xff] }
 0x1f3   : > { %3904 = vmatprep.subr.bf16.mxu0 %v8326_v11  ;;  %3986 = vmatprep.subr.bf16.mxu1 %v8328_v15  ;;  %v714_v10 = vld [vmem:[%s10598_s17 + $0x9e0] sm:$0xff]  ;;  %v707_v11 = vld [vmem:[%s10598_s17 + $0x9a8] sm:$0xff] }
 0x1f4   : > { %v8454_v15 = vcombine.high %v706_v9, %v714_v10  ;;  %v8456_v16 = vcombine.high %v707_v11, %v715_v12  ;;  %v8453_v21 = vcombine.low %v706_v9, %v714_v10  ;;  %v8455_v22 = vcombine.low %v707_v11, %v715_v12 }
 0x1f6   : > { %3905 = vmatpush1.bf16.msra.mxu0 %v8325_v17  ;;  %3987 = vmatpush1.bf16.msra.mxu1 %v8327_v18  ;;  %v722_v17 = vld [vmem:[%s10598_s17 + $0xa20] sm:$0xff] }
 0x1f7   : > { %3906 = vmatprep.subr.bf16.mxu0 %v8342_v19  ;;  %3988 = vmatprep.subr.bf16.mxu1 %v8344_v24  ;;  %v730_v18 = vld [vmem:[%s10598_s17 + $0xa60] sm:$0xff]  ;;  %v723_v19 = vld [vmem:[%s10598_s17 + $0xa28] sm:$0xff] }
 0x1f8   : > { %v8470_v24 = vcombine.high %v722_v17, %v730_v18  ;;  %v8472_v25 = vcombine.high %v723_v19, %v731_v20  ;;  %v8469_v30 = vcombine.low %v722_v17, %v730_v18  ;;  %v8471_v31 = vcombine.low %v723_v19, %v731_v20 }
 0x1fa   : > { %3907 = vmatpush1.bf16.msra.mxu0 %v8341_v26  ;;  %3989 = vmatpush1.bf16.msra.mxu1 %v8343_v27  ;;  %v738_v26 = vld [vmem:[%s10598_s17 + $0xaa0] sm:$0xff] }
 0x1fb   : > { %3908 = vmatprep.subr.bf16.mxu0 %v8358_v28  ;;  %3990 = vmatprep.subr.bf16.mxu1 %v8360_v32  ;;  %v746_v27 = vld [vmem:[%s10598_s17 + $0xae0] sm:$0xff]  ;;  %v739_v28 = vld [vmem:[%s10598_s17 + $0xaa8] sm:$0xff] }
 0x1fc   : > { %v8486_v32 = vcombine.high %v738_v26, %v746_v27  ;;  %v8488_v33 = vcombine.high %v739_v28, %v747_v29  ;;  %v8485_v40 = vcombine.low %v738_v26, %v746_v27  ;;  %v8487_v41 = vcombine.low %v739_v28, %v747_v29 }
 0x1fe   : > { %3909 = vmatpush1.bf16.msra.mxu0 %v8357_v36  ;;  %3991 = vmatpush1.bf16.msra.mxu1 %v8359_v37  ;;  %v754_v36 = vld [vmem:[%s10598_s17 + $0xb20] sm:$0xff] }
 0x1ff   : > { %3910 = vmatprep.subr.bf16.mxu0 %v8374_v38  ;;  %3992 = vmatprep.subr.bf16.mxu1 %v8376_v42  ;;  %v762_v37 = vld [vmem:[%s10598_s17 + $0xb60] sm:$0xff]  ;;  %v755_v38 = vld [vmem:[%s10598_s17 + $0xb28] sm:$0xff] }
 0x200   : > { %v8502_v42 = vcombine.high %v754_v36, %v762_v37  ;;  %v8503_v56 = vcombine.low %v755_v38, %v763_v39 }
 0x202   : > { %3911 = vmatpush1.bf16.msra.mxu0 %v8373_v44  ;;  %3993 = vmatpush1.bf16.msra.mxu1 %v8375_v45  ;;  %v8504_v44 = vcombine.high %v755_v38, %v763_v39  ;;  %v770_v45 = vld [vmem:[%s10598_s17 + $0xba0] sm:$0xff] }
 0x203   : > { %3912 = vmatprep.subr.bf16.mxu0 %v8390_v46  ;;  %3994 = vmatprep.subr.bf16.mxu1 %v8392_v50  ;;  %v778_v46 = vld [vmem:[%s10598_s17 + $0xbe0] sm:$0xff]  ;;  %v779_v50 = vld [vmem:[%s10598_s17 + $0xbe8] sm:$0xff] }
 0x204   : > { %v8518_v57 = vcombine.high %v770_v45, %v778_v46  ;;  %v8520_v59 = vcombine.high %v771_v49, %v779_v50  ;;  %v8519_v1 = vcombine.low %v771_v49, %v779_v50 }
 0x206   : > { %3913 = vmatpush1.bf16.msra.mxu0 %v8389_v52  ;;  %3995 = vmatpush1.bf16.msra.mxu1 %v8391_v53  ;;  %v8501_v53 = vcombine.low %v754_v36, %v762_v37 }
 0x207   : > { %3923 = vmatprep.subr.bf16.mxu0 %v8406_v54  ;;  %4005 = vmatprep.subr.bf16.mxu1 %v8408_v58 }
 0x209   : > { %3915 = vmatmul.mubr.bf16.vlgmr.msra.gmra.mrb[8].mxu0 %v10692_v23  ;;  %3997 = vmatmul.mubr.bf16.vlgmr.msra.gmra.mrb[8].mxu1 %v10692_v23 }
 0x20a   : > { %3924 = vmatpush1.bf16.msra.mxu0 %v8405_v60  ;;  %4006 = vmatpush1.bf16.msra.mxu1 %v8407_v61  ;;  %v786_v60 = vld [vmem:[%s10598_s17 + $0xc20] sm:$0xff] }
 0x20b   : > { %3925 = vmatprep.subr.bf16.mxu0 %v8422_v62  ;;  %4007 = vmatprep.subr.bf16.mxu1 %v8424_v0  ;;  %v794_v61 = vld [vmem:[%s10598_s17 + $0xc60] sm:$0xff]  ;;  %v787_v62 = vld [vmem:[%s10598_s17 + $0xc28] sm:$0xff]  ;;  %v8517_v0 = vcombine.low %v770_v45, %v778_v46 }
 0x20c   : > { %3955 = vmatprep.mubr.bf16.mxu0 %v10700_v35  ;;  %4037 = vmatprep.mubr.bf16.mxu1 %v10700_v35  ;;  %v8534_v2 = vcombine.high %v786_v60, %v794_v61  ;;  %v8536_v3 = vcombine.high %v787_v62, %v795_v63  ;;  %v8533_v9 = vcombine.low %v786_v60, %v794_v61  ;;  %v898_v60 = vld [vmem:[%s10598_s17 + $0xfa0] sm:$0xff] }
 0x20d   : > { %v8535_v10 = vcombine.low %v787_v62, %v795_v63  ;;  %v906_v61 = vld [vmem:[%s10598_s17 + $0xfe0] sm:$0xff]  ;;  %v899_v62 = vld [vmem:[%s10598_s17 + $0xfa8] sm:$0xff] }
 0x20e   : > { %3926 = vmatpush1.bf16.msra.mxu0 %v8421_v5  ;;  %4008 = vmatpush1.bf16.msra.mxu1 %v8423_v6  ;;  %v802_v5 = vld [vmem:[%s10598_s17 + $0xca0] sm:$0xff]  ;;  %v907_v63 = vld [vmem:[%s10598_s17 + $0xfe8] sm:$0xff] }
 0x20f   : > { %3927 = vmatprep.subr.bf16.mxu0 %v8438_v7  ;;  %4009 = vmatprep.subr.bf16.mxu1 %v8440_v8  ;;  %v810_v6 = vld [vmem:[%s10598_s17 + $0xce0] sm:$0xff]  ;;  %v803_v7 = vld [vmem:[%s10598_s17 + $0xca8] sm:$0xff] }
 0x210   : > { %v811_v8 = vld [vmem:[%s10598_s17 + $0xce8] sm:$0xff]  ;;  %v8550_v11 = vcombine.high %v802_v5, %v810_v6  ;;  %v8549_v17 = vcombine.low %v802_v5, %v810_v6  ;;  %v404_v5 = vld [vmem:[%s10598_s17 + $0x30] sm:$0xff] }
 0x211   : > { %v8552_v12 = vcombine.high %v803_v7, %v811_v8  ;;  %v8551_v18 = vcombine.low %v803_v7, %v811_v8  ;;  %v412_v6 = vld [vmem:[%s10598_s17 + $0x70] sm:$0xff]  ;;  %v405_v7 = vld [vmem:[%s10598_s17 + $0x38] sm:$0xff] }
 0x212   : > { %3928 = vmatpush1.bf16.msra.mxu0 %v8437_v13  ;;  %4010 = vmatpush1.bf16.msra.mxu1 %v8439_v14  ;;  %v818_v13 = vld [vmem:[%s10598_s17 + $0xd20] sm:$0xff]  ;;  %v413_v8 = vld [vmem:[%s10598_s17 + $0x78] sm:$0xff] }
 0x213   : > { %3929 = vmatprep.subr.bf16.mxu0 %v8454_v15  ;;  %4011 = vmatprep.subr.bf16.mxu1 %v8456_v16  ;;  %v826_v14 = vld [vmem:[%s10598_s17 + $0xd60] sm:$0xff]  ;;  %v819_v15 = vld [vmem:[%s10598_s17 + $0xd28] sm:$0xff] }
 0x214   : > { %v827_v16 = vld [vmem:[%s10598_s17 + $0xd68] sm:$0xff]  ;;  %v8566_v19 = vcombine.high %v818_v13, %v826_v14  ;;  %v8565_v26 = vcombine.low %v818_v13, %v826_v14  ;;  %v420_v13 = vld [vmem:[%s10598_s17 + $0xb0] sm:$0xff] }
 0x215   : > { %v8568_v20 = vcombine.high %v819_v15, %v827_v16  ;;  %v8567_v27 = vcombine.low %v819_v15, %v827_v16  ;;  %v428_v14 = vld [vmem:[%s10598_s17 + $0xf0] sm:$0xff]  ;;  %v421_v15 = vld [vmem:[%s10598_s17 + $0xb8] sm:$0xff] }
 0x216   : > { %3930 = vmatpush1.bf16.msra.mxu0 %v8453_v21  ;;  %4012 = vmatpush1.bf16.msra.mxu1 %v8455_v22  ;;  %v834_v21 = vld [vmem:[%s10598_s17 + $0xda0] sm:$0xff]  ;;  %v429_v16 = vld [vmem:[%s10598_s17 + $0xf8] sm:$0xff] }
 0x217   : > { %3931 = vmatprep.subr.bf16.mxu0 %v8470_v24  ;;  %4013 = vmatprep.subr.bf16.mxu1 %v8472_v25  ;;  %v842_v22 = vld [vmem:[%s10598_s17 + $0xde0] sm:$0xff]  ;;  %v835_v24 = vld [vmem:[%s10598_s17 + $0xda8] sm:$0xff] }
 0x218   : > { %v843_v25 = vld [vmem:[%s10598_s17 + $0xde8] sm:$0xff]  ;;  %v8582_v28 = vcombine.high %v834_v21, %v842_v22  ;;  %v8581_v36 = vcombine.low %v834_v21, %v842_v22  ;;  %v436_v21 = vld [vmem:[%s10598_s17 + $0x130] sm:$0xff] }
 0x219   : > { %v8584_v29 = vcombine.high %v835_v24, %v843_v25  ;;  %v8583_v37 = vcombine.low %v835_v24, %v843_v25  ;;  %v444_v22 = vld [vmem:[%s10598_s17 + $0x170] sm:$0xff]  ;;  %v437_v24 = vld [vmem:[%s10598_s17 + $0x138] sm:$0xff] }
 0x21a   : > { %3932 = vmatpush1.bf16.msra.mxu0 %v8469_v30  ;;  %4014 = vmatpush1.bf16.msra.mxu1 %v8471_v31  ;;  %v850_v30 = vld [vmem:[%s10598_s17 + $0xe20] sm:$0xff]  ;;  %v445_v25 = vld [vmem:[%s10598_s17 + $0x178] sm:$0xff] }
 0x21b   : > { %3933 = vmatprep.subr.bf16.mxu0 %v8486_v32  ;;  %4015 = vmatprep.subr.bf16.mxu1 %v8488_v33  ;;  %v858_v31 = vld [vmem:[%s10598_s17 + $0xe60] sm:$0xff]  ;;  %v851_v32 = vld [vmem:[%s10598_s17 + $0xe28] sm:$0xff] }
 0x21c   : > { %v10996_v43 = vpop.f32.mrb[0].mxu0  ;;  %v11000_v47 = vpop.f32.mrb[0].mxu1  ;;  %v859_v33 = vld [vmem:[%s10598_s17 + $0xe68] sm:$0xff]  ;;  %v8598_v38 = vcombine.high %v850_v30, %v858_v31  ;;  %v8597_v45 = vcombine.low %v850_v30, %v858_v31  ;;  %v452_v30 = vld [vmem:[%s10598_s17 + $0x1b0] sm:$0xff] }
 0x21d   : > { %v11002_v48 = vpop.f32.mrb[1].mxu0  ;;  %v11006_v51 = vpop.f32.mrb[1].mxu1  ;;  %v8600_v39 = vcombine.high %v851_v32, %v859_v33  ;;  %v8599_v46 = vcombine.low %v851_v32, %v859_v33  ;;  %v460_v31 = vld [vmem:[%s10598_s17 + $0x1f0] sm:$0xff]  ;;  %v453_v32 = vld [vmem:[%s10598_s17 + $0x1b8] sm:$0xff] }
 0x21e   : > { %v3633_v52 = vpop.f32.mrb[2].mxu0  ;;  %3934 = vmatpush1.bf16.msra.mxu0 %v8485_v40  ;;  %v3715_v54 = vpop.f32.mrb[2].mxu1  ;;  %4016 = vmatpush1.bf16.msra.mxu1 %v8487_v41  ;;  %v866_v40 = vld [vmem:[%s10598_s17 + $0xea0] sm:$0xff]  ;;  %v461_v33 = vld [vmem:[%s10598_s17 + $0x1f8] sm:$0xff] }
 0x21f   : > { %v3634_v55 = vpop.f32.mrb[3].mxu0  ;;  %3935 = vmatprep.subr.bf16.mxu0 %v8502_v42  ;;  %v3716_v58 = vpop.f32.mrb[3].mxu1  ;;  %4017 = vmatprep.subr.bf16.mxu1 %v8504_v44  ;;  %v874_v41 = vld [vmem:[%s10598_s17 + $0xee0] sm:$0xff]  ;;  %v867_v42 = vld [vmem:[%s10598_s17 + $0xea8] sm:$0xff] }
 0x220   : > { %v875_v44 = vld [vmem:[%s10598_s17 + $0xee8] sm:$0xff]  ;;  %v8614_v49 = vcombine.high %v866_v40, %v874_v41  ;;  %v882_v52 = vld [vmem:[%s10598_s17 + $0xf20] sm:$0xff] }
 0x221   : > { %v8616_v50 = vcombine.high %v867_v42, %v875_v44  ;;  %v883_v54 = vld [vmem:[%s10598_s17 + $0xf28] sm:$0xff] }
 0x222   : > { %3936 = vmatpush1.bf16.msra.mxu0 %v8501_v53  ;;  %4018 = vmatpush1.bf16.msra.mxu1 %v8503_v56  ;;  %v890_v53 = vld [vmem:[%s10598_s17 + $0xf60] sm:$0xff]  ;;  %v891_v55 = vld [vmem:[%s10598_s17 + $0xf68] sm:$0xff]  ;;  %v8613_v56 = vcombine.low %v866_v40, %v874_v41  ;;  %v468_v40 = vld [vmem:[%s10598_s17 + $0x230] sm:$0xff] }
 0x223   : > { %3937 = vmatprep.subr.bf16.mxu0 %v8518_v57  ;;  %4019 = vmatprep.subr.bf16.mxu1 %v8520_v59  ;;  %v8615_v57 = vcombine.low %v867_v42, %v875_v44  ;;  %v8630_v58 = vcombine.high %v882_v52, %v890_v53  ;;  %v8632_v59 = vcombine.high %v883_v54, %v891_v55  ;;  %v476_v41 = vld [vmem:[%s10598_s17 + $0x270] sm:$0xff]  ;;  %v469_v42 = vld [vmem:[%s10598_s17 + $0x238] sm:$0xff] }
 0x224   : > { %v477_v44 = vld [vmem:[%s10598_s17 + $0x278] sm:$0xff] }
 0x226   : > { %3938 = vmatpush1.bf16.msra.mxu0 %v8517_v0  ;;  %4020 = vmatpush1.bf16.msra.mxu1 %v8519_v1  ;;  %v8629_v0 = vcombine.low %v882_v52, %v890_v53  ;;  %v8631_v1 = vcombine.low %v883_v54, %v891_v55  ;;  %v492_v52 = vld [vmem:[%s10598_s17 + $0x2f0] sm:$0xff]  ;;  %v485_v53 = vld [vmem:[%s10598_s17 + $0x2b8] sm:$0xff]  ;;  %v8217_v55 = vcombine.low %v468_v40, %v476_v41 }
 0x227   : > { %3939 = vmatprep.subr.bf16.mxu0 %v8534_v2  ;;  %4021 = vmatprep.subr.bf16.mxu1 %v8536_v3  ;;  %v8646_v2 = vcombine.high %v898_v60, %v906_v61  ;;  %v8648_v3 = vcombine.high %v899_v62, %v907_v63  ;;  %v493_v54 = vld [vmem:[%s10598_s17 + $0x2f8] sm:$0xff] }
 0x22a   : > { %3940 = vmatpush1.bf16.msra.mxu0 %v8533_v9  ;;  %4022 = vmatpush1.bf16.msra.mxu1 %v8535_v10  ;;  %v8645_v9 = vcombine.low %v898_v60, %v906_v61  ;;  %v8647_v10 = vcombine.low %v899_v62, %v907_v63  ;;  %v508_v60 = vld [vmem:[%s10598_s17 + $0x370] sm:$0xff]  ;;  %v501_v61 = vld [vmem:[%s10598_s17 + $0x338] sm:$0xff] }
 0x22b   : > { %3941 = vmatprep.subr.bf16.mxu0 %v8550_v11  ;;  %4023 = vmatprep.subr.bf16.mxu1 %v8552_v12  ;;  %v8154_v11 = vcombine.high %v404_v5, %v412_v6  ;;  %v8156_v12 = vcombine.high %v405_v7, %v413_v8  ;;  %v509_v62 = vld [vmem:[%s10598_s17 + $0x378] sm:$0xff] }
 0x22e   : > { %3942 = vmatpush1.bf16.msra.mxu0 %v8549_v17  ;;  %4024 = vmatpush1.bf16.msra.mxu1 %v8551_v18  ;;  %v8153_v17 = vcombine.low %v404_v5, %v412_v6  ;;  %v8155_v18 = vcombine.low %v405_v7, %v413_v8  ;;  %v524_v5 = vld [vmem:[%s10598_s17 + $0x3f0] sm:$0xff]  ;;  %v517_v6 = vld [vmem:[%s10598_s17 + $0x3b8] sm:$0xff] }
 0x22f   : > { %3943 = vmatprep.subr.bf16.mxu0 %v8566_v19  ;;  %4025 = vmatprep.subr.bf16.mxu1 %v8568_v20  ;;  %v8170_v19 = vcombine.high %v420_v13, %v428_v14  ;;  %v8172_v20 = vcombine.high %v421_v15, %v429_v16  ;;  %v525_v7 = vld [vmem:[%s10598_s17 + $0x3f8] sm:$0xff] }
 0x232   : > { %3944 = vmatpush1.bf16.msra.mxu0 %v8565_v26  ;;  %4026 = vmatpush1.bf16.msra.mxu1 %v8567_v27  ;;  %v8169_v26 = vcombine.low %v420_v13, %v428_v14  ;;  %v8171_v27 = vcombine.low %v421_v15, %v429_v16  ;;  %v540_v13 = vld [vmem:[%s10598_s17 + $0x470] sm:$0xff]  ;;  %v533_v14 = vld [vmem:[%s10598_s17 + $0x438] sm:$0xff] }
 0x233   : > { %3945 = vmatprep.subr.bf16.mxu0 %v8582_v28  ;;  %4027 = vmatprep.subr.bf16.mxu1 %v8584_v29  ;;  %v8186_v28 = vcombine.high %v436_v21, %v444_v22  ;;  %v8188_v29 = vcombine.high %v437_v24, %v445_v25  ;;  %v541_v15 = vld [vmem:[%s10598_s17 + $0x478] sm:$0xff] }
 0x236   : > { %3946 = vmatpush1.bf16.msra.mxu0 %v8581_v36  ;;  %4028 = vmatpush1.bf16.msra.mxu1 %v8583_v37  ;;  %v8185_v36 = vcombine.low %v436_v21, %v444_v22  ;;  %v8187_v37 = vcombine.low %v437_v24, %v445_v25  ;;  %v556_v21 = vld [vmem:[%s10598_s17 + $0x4f0] sm:$0xff]  ;;  %v549_v22 = vld [vmem:[%s10598_s17 + $0x4b8] sm:$0xff] }
 0x237   : > { %3947 = vmatprep.subr.bf16.mxu0 %v8598_v38  ;;  %4029 = vmatprep.subr.bf16.mxu1 %v8600_v39  ;;  %v8202_v38 = vcombine.high %v452_v30, %v460_v31  ;;  %v8204_v39 = vcombine.high %v453_v32, %v461_v33  ;;  %v557_v24 = vld [vmem:[%s10598_s17 + $0x4f8] sm:$0xff] }
 0x23a   : > { %3948 = vmatpush1.bf16.msra.mxu0 %v8597_v45  ;;  %4030 = vmatpush1.bf16.msra.mxu1 %v8599_v46  ;;  %v8201_v45 = vcombine.low %v452_v30, %v460_v31  ;;  %v8218_v46 = vcombine.high %v468_v40, %v476_v41  ;;  %v572_v30 = vld [vmem:[%s10598_s17 + $0x570] sm:$0xff]  ;;  %v565_v31 = vld [vmem:[%s10598_s17 + $0x538] sm:$0xff] }
 0x23b   : > { %3949 = vmatprep.subr.bf16.mxu0 %v8614_v49  ;;  %4031 = vmatprep.subr.bf16.mxu1 %v8616_v50  ;;  %v8220_v49 = vcombine.high %v469_v42, %v477_v44  ;;  %v484_v50 = vld [vmem:[%s10598_s17 + $0x2b0] sm:$0xff]  ;;  %v581_v41 = vld [vmem:[%s10598_s17 + $0x5b8] sm:$0xff] }
 0x23c   : > { %v8233_v63 = vcombine.low %v484_v50, %v492_v52  ;;  %v588_v40 = vld [vmem:[%s10598_s17 + $0x5f0] sm:$0xff] }
 0x23e   : > { %3950 = vmatpush1.bf16.msra.mxu0 %v8613_v56  ;;  %4032 = vmatpush1.bf16.msra.mxu1 %v8615_v57  ;;  %v8219_v56 = vcombine.low %v469_v42, %v477_v44  ;;  %v8234_v57 = vcombine.high %v484_v50, %v492_v52  ;;  %v589_v42 = vld [vmem:[%s10598_s17 + $0x5f8] sm:$0xff]  ;;  %v604_v50 = vld [vmem:[%s10598_s17 + $0x670] sm:$0xff] }
 0x23f   : > { %3951 = vmatprep.subr.bf16.mxu0 %v8630_v58  ;;  %4033 = vmatprep.subr.bf16.mxu1 %v8632_v59  ;;  %v8236_v58 = vcombine.high %v485_v53, %v493_v54  ;;  %v500_v59 = vld [vmem:[%s10598_s17 + $0x330] sm:$0xff]  ;;  %v597_v52 = vld [vmem:[%s10598_s17 + $0x638] sm:$0xff] }
 0x240   : > { %v8249_v8 = vcombine.low %v500_v59, %v508_v60 }
 0x242   : > { %3952 = vmatpush1.bf16.msra.mxu0 %v8629_v0  ;;  %4034 = vmatpush1.bf16.msra.mxu1 %v8631_v1  ;;  %v8235_v0 = vcombine.low %v485_v53, %v493_v54  ;;  %v8250_v1 = vcombine.high %v500_v59, %v508_v60  ;;  %v605_v53 = vld [vmem:[%s10598_s17 + $0x678] sm:$0xff]  ;;  %v620_v59 = vld [vmem:[%s10598_s17 + $0x6f0] sm:$0xff] }
 0x243   : > { %3953 = vmatprep.subr.bf16.mxu0 %v8646_v2  ;;  %4035 = vmatprep.subr.bf16.mxu1 %v8648_v3  ;;  %v8252_v2 = vcombine.high %v501_v61, %v509_v62  ;;  %v516_v3 = vld [vmem:[%s10598_s17 + $0x3b0] sm:$0xff]  ;;  %v613_v60 = vld [vmem:[%s10598_s17 + $0x6b8] sm:$0xff] }
 0x244   : > { %v8265_v16 = vcombine.low %v516_v3, %v524_v5 }
 0x246   : > { %3954 = vmatpush1.bf16.msra.mxu0 %v8645_v9  ;;  %4036 = vmatpush1.bf16.msra.mxu1 %v8647_v10  ;;  %v8251_v9 = vcombine.low %v501_v61, %v509_v62  ;;  %v8266_v10 = vcombine.high %v516_v3, %v524_v5  ;;  %v621_v61 = vld [vmem:[%s10598_s17 + $0x6f8] sm:$0xff]  ;;  %v636_v3 = vld [vmem:[%s10598_s17 + $0x770] sm:$0xff] }
 0x247   : > { %4046 = vmatprep.subr.bf16.mxu0 %v8154_v11  ;;  %4128 = vmatprep.subr.bf16.mxu1 %v8156_v12  ;;  %v8268_v11 = vcombine.high %v517_v6, %v525_v7  ;;  %v532_v12 = vld [vmem:[%s10598_s17 + $0x430] sm:$0xff]  ;;  %v629_v5 = vld [vmem:[%s10598_s17 + $0x738] sm:$0xff] }
 0x248   : > { %v8281_v25 = vcombine.low %v532_v12, %v540_v13 }
 0x249   : > { %3956 = vmatmul.mubr.bf16.vlgmr.msra.gmra.mrb[8].mxu0 %v10766_v34  ;;  %4038 = vmatmul.mubr.bf16.vlgmr.msra.gmra.mrb[8].mxu1 %v10766_v34 }
 0x24a   : > { %4047 = vmatpush1.bf16.msra.mxu0 %v8153_v17  ;;  %4129 = vmatpush1.bf16.msra.mxu1 %v8155_v18  ;;  %v8267_v17 = vcombine.low %v517_v6, %v525_v7  ;;  %v8282_v18 = vcombine.high %v532_v12, %v540_v13  ;;  %v637_v6 = vld [vmem:[%s10598_s17 + $0x778] sm:$0xff]  ;;  %v652_v12 = vld [vmem:[%s10598_s17 + $0x7f0] sm:$0xff] }
 0x24b   : > { %4048 = vmatprep.subr.bf16.mxu0 %v8170_v19  ;;  %4130 = vmatprep.subr.bf16.mxu1 %v8172_v20  ;;  %v8284_v19 = vcombine.high %v533_v14, %v541_v15  ;;  %v548_v20 = vld [vmem:[%s10598_s17 + $0x4b0] sm:$0xff]  ;;  %v645_v13 = vld [vmem:[%s10598_s17 + $0x7b8] sm:$0xff] }
 0x24c   : > { %4078 = vmatprep.mubr.bf16.mxu0 %v10648_v4  ;;  %4160 = vmatprep.mubr.bf16.mxu1 %v10648_v4  ;;  %v8203_v4 = vcombine.low %v453_v32, %v461_v33  ;;  %v573_v32 = vld [vmem:[%s10598_s17 + $0x578] sm:$0xff]  ;;  %v8297_v33 = vcombine.low %v548_v20, %v556_v21 }
 0x24e   : > { %4049 = vmatpush1.bf16.msra.mxu0 %v8169_v26  ;;  %4131 = vmatpush1.bf16.msra.mxu1 %v8171_v27  ;;  %v8283_v26 = vcombine.low %v533_v14, %v541_v15  ;;  %v8298_v27 = vcombine.high %v548_v20, %v556_v21  ;;  %v653_v14 = vld [vmem:[%s10598_s17 + $0x7f8] sm:$0xff]  ;;  %v668_v20 = vld [vmem:[%s10598_s17 + $0x870] sm:$0xff] }
 0x24f   : > { %4050 = vmatprep.subr.bf16.mxu0 %v8186_v28  ;;  %4132 = vmatprep.subr.bf16.mxu1 %v8188_v29  ;;  %v8300_v28 = vcombine.high %v549_v22, %v557_v24  ;;  %v564_v29 = vld [vmem:[%s10598_s17 + $0x530] sm:$0xff]  ;;  %v661_v21 = vld [vmem:[%s10598_s17 + $0x838] sm:$0xff] }
 0x250   : > { %v8313_v44 = vcombine.low %v564_v29, %v572_v30 }
 0x252   : > { %4051 = vmatpush1.bf16.msra.mxu0 %v8185_v36  ;;  %4133 = vmatpush1.bf16.msra.mxu1 %v8187_v37  ;;  %v8299_v36 = vcombine.low %v549_v22, %v557_v24  ;;  %v8314_v37 = vcombine.high %v564_v29, %v572_v30  ;;  %v669_v22 = vld [vmem:[%s10598_s17 + $0x878] sm:$0xff]  ;;  %v684_v29 = vld [vmem:[%s10598_s17 + $0x8f0] sm:$0xff] }
 0x253   : > { %4052 = vmatprep.subr.bf16.mxu0 %v8202_v38  ;;  %4134 = vmatprep.subr.bf16.mxu1 %v8204_v39  ;;  %v8316_v38 = vcombine.high %v565_v31, %v573_v32  ;;  %v580_v39 = vld [vmem:[%s10598_s17 + $0x5b0] sm:$0xff]  ;;  %v677_v30 = vld [vmem:[%s10598_s17 + $0x8b8] sm:$0xff] }
 0x254   : > { %v8329_v54 = vcombine.low %v580_v39, %v588_v40 }
 0x256   : > { %4053 = vmatpush1.bf16.msra.mxu0 %v8201_v45  ;;  %4135 = vmatpush1.bf16.msra.mxu1 %v8203_v4  ;;  %v8315_v45 = vcombine.low %v565_v31, %v573_v32  ;;  %v8330_v4 = vcombine.high %v580_v39, %v588_v40  ;;  %v685_v31 = vld [vmem:[%s10598_s17 + $0x8f8] sm:$0xff]  ;;  %v700_v39 = vld [vmem:[%s10598_s17 + $0x970] sm:$0xff] }
 0x257   : > { %4054 = vmatprep.subr.bf16.mxu0 %v8218_v46  ;;  %4136 = vmatprep.subr.bf16.mxu1 %v8220_v49  ;;  %v8332_v46 = vcombine.high %v581_v41, %v589_v42  ;;  %v596_v49 = vld [vmem:[%s10598_s17 + $0x630] sm:$0xff]  ;;  %v693_v40 = vld [vmem:[%s10598_s17 + $0x938] sm:$0xff] }
 0x258   : > { %v8345_v62 = vcombine.low %v596_v49, %v604_v50 }
 0x25a   : > { %4055 = vmatpush1.bf16.msra.mxu0 %v8217_v55  ;;  %4137 = vmatpush1.bf16.msra.mxu1 %v8219_v56  ;;  %v8331_v55 = vcombine.low %v581_v41, %v589_v42  ;;  %v8346_v56 = vcombine.high %v596_v49, %v604_v50  ;;  %v701_v41 = vld [vmem:[%s10598_s17 + $0x978] sm:$0xff]  ;;  %v716_v49 = vld [vmem:[%s10598_s17 + $0x9f0] sm:$0xff] }
 0x25b   : > { %4056 = vmatprep.subr.bf16.mxu0 %v8234_v57  ;;  %4138 = vmatprep.subr.bf16.mxu1 %v8236_v58  ;;  %v8348_v57 = vcombine.high %v597_v52, %v605_v53  ;;  %v612_v58 = vld [vmem:[%s10598_s17 + $0x6b0] sm:$0xff]  ;;  %v709_v50 = vld [vmem:[%s10598_s17 + $0x9b8] sm:$0xff] }
 0x25c   : > { %v8361_v7 = vcombine.low %v612_v58, %v620_v59 }
 0x25e   : > { %4057 = vmatpush1.bf16.msra.mxu0 %v8233_v63  ;;  %4139 = vmatpush1.bf16.msra.mxu1 %v8235_v0  ;;  %v8347_v63 = vcombine.low %v597_v52, %v605_v53  ;;  %v8362_v0 = vcombine.high %v612_v58, %v620_v59  ;;  %v717_v52 = vld [vmem:[%s10598_s17 + $0x9f8] sm:$0xff]  ;;  %v8443_v53 = vcombine.low %v693_v40, %v701_v41 }
 0x25f   : > { %4058 = vmatprep.subr.bf16.mxu0 %v8250_v1  ;;  %4140 = vmatprep.subr.bf16.mxu1 %v8252_v2  ;;  %v8364_v1 = vcombine.high %v613_v60, %v621_v61  ;;  %v628_v2 = vld [vmem:[%s10598_s17 + $0x730] sm:$0xff]  ;;  %v725_v58 = vld [vmem:[%s10598_s17 + $0xa38] sm:$0xff] }
 0x260   : > { %v8377_v15 = vcombine.low %v628_v2, %v636_v3  ;;  %v733_v59 = vld [vmem:[%s10598_s17 + $0xa78] sm:$0xff] }
 0x262   : > { %4059 = vmatpush1.bf16.msra.mxu0 %v8249_v8  ;;  %4141 = vmatpush1.bf16.msra.mxu1 %v8251_v9  ;;  %v8363_v8 = vcombine.low %v613_v60, %v621_v61  ;;  %v8378_v9 = vcombine.high %v628_v2, %v636_v3  ;;  %v749_v2 = vld [vmem:[%s10598_s17 + $0xaf8] sm:$0xff] }
 0x263   : > { %4060 = vmatprep.subr.bf16.mxu0 %v8266_v10  ;;  %4142 = vmatprep.subr.bf16.mxu1 %v8268_v11  ;;  %v8380_v10 = vcombine.high %v629_v5, %v637_v6  ;;  %v644_v11 = vld [vmem:[%s10598_s17 + $0x7b0] sm:$0xff] }
 0x264   : > { %v8393_v24 = vcombine.low %v644_v11, %v652_v12 }
 0x266   : > { %4061 = vmatpush1.bf16.msra.mxu0 %v8265_v16  ;;  %4143 = vmatpush1.bf16.msra.mxu1 %v8267_v17  ;;  %v8379_v16 = vcombine.low %v629_v5, %v637_v6  ;;  %v8394_v17 = vcombine.high %v644_v11, %v652_v12  ;;  %v8475_v5 = vcombine.low %v725_v58, %v733_v59  ;;  %v765_v11 = vld [vmem:[%s10598_s17 + $0xb78] sm:$0xff] }
 0x267   : > { %4062 = vmatprep.subr.bf16.mxu0 %v8282_v18  ;;  %4144 = vmatprep.subr.bf16.mxu1 %v8284_v19  ;;  %v8396_v18 = vcombine.high %v645_v13, %v653_v14  ;;  %v660_v19 = vld [vmem:[%s10598_s17 + $0x830] sm:$0xff] }
 0x268   : > { %v8409_v32 = vcombine.low %v660_v19, %v668_v20 }
 0x26a   : > { %4063 = vmatpush1.bf16.msra.mxu0 %v8281_v25  ;;  %4145 = vmatpush1.bf16.msra.mxu1 %v8283_v26  ;;  %v8395_v25 = vcombine.low %v645_v13, %v653_v14  ;;  %v8410_v26 = vcombine.high %v660_v19, %v668_v20 }
 0x26b   : > { %4064 = vmatprep.subr.bf16.mxu0 %v8298_v27  ;;  %4146 = vmatprep.subr.bf16.mxu1 %v8300_v28  ;;  %v8412_v27 = vcombine.high %v661_v21, %v669_v22  ;;  %v676_v28 = vld [vmem:[%s10598_s17 + $0x8b0] sm:$0xff] }
 0x26c   : > { %v8425_v42 = vcombine.low %v676_v28, %v684_v29 }
 0x26e   : > { %4065 = vmatpush1.bf16.msra.mxu0 %v8297_v33  ;;  %4147 = vmatpush1.bf16.msra.mxu1 %v8299_v36  ;;  %v8411_v33 = vcombine.low %v661_v21, %v669_v22  ;;  %v8426_v36 = vcombine.high %v676_v28, %v684_v29  ;;  %v773_v21 = vld [vmem:[%s10598_s17 + $0xbb8] sm:$0xff] }
 0x26f   : > { %4066 = vmatprep.subr.bf16.mxu0 %v8314_v37  ;;  %4148 = vmatprep.subr.bf16.mxu1 %v8316_v38  ;;  %v8428_v37 = vcombine.high %v677_v30, %v685_v31  ;;  %v692_v38 = vld [vmem:[%s10598_s17 + $0x930] sm:$0xff]  ;;  %v781_v22 = vld [vmem:[%s10598_s17 + $0xbf8] sm:$0xff] }
 0x272   : > { %4067 = vmatpush1.bf16.msra.mxu0 %v8313_v44  ;;  %4149 = vmatpush1.bf16.msra.mxu1 %v8315_v45  ;;  %v8427_v44 = vcombine.low %v677_v30, %v685_v31  ;;  %v8442_v45 = vcombine.high %v692_v38, %v700_v39 }
 0x273   : > { %4068 = vmatprep.subr.bf16.mxu0 %v8330_v4  ;;  %4150 = vmatprep.subr.bf16.mxu1 %v8332_v46  ;;  %v8444_v4 = vcombine.high %v693_v40, %v701_v41  ;;  %v708_v46 = vld [vmem:[%s10598_s17 + $0x9b0] sm:$0xff]  ;;  %v8523_v40 = vcombine.low %v773_v21, %v781_v22 }
 0x274   : > { %v8457_v60 = vcombine.low %v708_v46, %v716_v49 }
 0x276   : > { %4069 = vmatpush1.bf16.msra.mxu0 %v8329_v54  ;;  %4151 = vmatpush1.bf16.msra.mxu1 %v8331_v55  ;;  %v8458_v54 = vcombine.high %v708_v46, %v716_v49  ;;  %v8460_v55 = vcombine.high %v709_v50, %v717_v52  ;;  %v813_v46 = vld [vmem:[%s10598_s17 + $0xcf8] sm:$0xff] }
 0x277   : > { %4070 = vmatprep.subr.bf16.mxu0 %v8346_v56  ;;  %4152 = vmatprep.subr.bf16.mxu1 %v8348_v57  ;;  %v724_v56 = vld [vmem:[%s10598_s17 + $0xa30] sm:$0xff] }
 0x278   : > { %v732_v57 = vld [vmem:[%s10598_s17 + $0xa70] sm:$0xff] }
 0x279   : > { %v8474_v61 = vcombine.high %v724_v56, %v732_v57  ;;  %v8473_v3 = vcombine.low %v724_v56, %v732_v57  ;;  %v829_v56 = vld [vmem:[%s10598_s17 + $0xd78] sm:$0xff] }
 0x27a   : > { %4071 = vmatpush1.bf16.msra.mxu0 %v8345_v62  ;;  %4153 = vmatpush1.bf16.msra.mxu1 %v8347_v63  ;;  %v8476_v62 = vcombine.high %v725_v58, %v733_v59  ;;  %v740_v63 = vld [vmem:[%s10598_s17 + $0xab0] sm:$0xff] }
 0x27b   : > { %4072 = vmatprep.subr.bf16.mxu0 %v8362_v0  ;;  %4154 = vmatprep.subr.bf16.mxu1 %v8364_v1  ;;  %v748_v0 = vld [vmem:[%s10598_s17 + $0xaf0] sm:$0xff]  ;;  %v741_v1 = vld [vmem:[%s10598_s17 + $0xab8] sm:$0xff] }
 0x27c   : > { %v8490_v6 = vcombine.high %v740_v63, %v748_v0  ;;  %v8489_v12 = vcombine.low %v740_v63, %v748_v0  ;;  %v8491_v13 = vcombine.low %v741_v1, %v749_v2  ;;  %v845_v63 = vld [vmem:[%s10598_s17 + $0xdf8] sm:$0xff] }
 0x27e   : > { %4073 = vmatpush1.bf16.msra.mxu0 %v8361_v7  ;;  %4155 = vmatpush1.bf16.msra.mxu1 %v8363_v8  ;;  %v8492_v7 = vcombine.high %v741_v1, %v749_v2  ;;  %v756_v8 = vld [vmem:[%s10598_s17 + $0xb30] sm:$0xff] }
 0x27f   : > { %4074 = vmatprep.subr.bf16.mxu0 %v8378_v9  ;;  %4156 = vmatprep.subr.bf16.mxu1 %v8380_v10  ;;  %v764_v9 = vld [vmem:[%s10598_s17 + $0xb70] sm:$0xff]  ;;  %v757_v10 = vld [vmem:[%s10598_s17 + $0xb38] sm:$0xff] }
 0x280   : > { %v8506_v14 = vcombine.high %v756_v8, %v764_v9  ;;  %v8507_v29 = vcombine.low %v757_v10, %v765_v11 }
 0x282   : > { %4075 = vmatpush1.bf16.msra.mxu0 %v8377_v15  ;;  %4157 = vmatpush1.bf16.msra.mxu1 %v8379_v16  ;;  %v8508_v16 = vcombine.high %v757_v10, %v765_v11 }
 0x283   : > { %4076 = vmatprep.subr.bf16.mxu0 %v8394_v17  ;;  %4158 = vmatprep.subr.bf16.mxu1 %v8396_v18  ;;  %v772_v17 = vld [vmem:[%s10598_s17 + $0xbb0] sm:$0xff] }
 0x284   : > { %v780_v18 = vld [vmem:[%s10598_s17 + $0xbf0] sm:$0xff] }
 0x285   : > { %v8522_v30 = vcombine.high %v772_v17, %v780_v18 }
 0x286   : > { %4077 = vmatpush1.bf16.msra.mxu0 %v8393_v24  ;;  %4159 = vmatpush1.bf16.msra.mxu1 %v8395_v25 }
 0x287   : > { %4087 = vmatprep.subr.bf16.mxu0 %v8410_v26  ;;  %4169 = vmatprep.subr.bf16.mxu1 %v8412_v27  ;;  %v8505_v26 = vcombine.low %v756_v8, %v764_v9  ;;  %v853_v8 = vld [vmem:[%s10598_s17 + $0xe38] sm:$0xff] }
 0x288   : > { %v861_v9 = vld [vmem:[%s10598_s17 + $0xe78] sm:$0xff] }
 0x289   : > { %4079 = vmatmul.mubr.bf16.vlgmr.msra.gmra.mrb[12].mxu0 %v10692_v23  ;;  %4161 = vmatmul.mubr.bf16.vlgmr.msra.gmra.mrb[12].mxu1 %v10692_v23  ;;  %v8441_v23 = vcombine.low %v692_v38, %v700_v39  ;;  %v797_v38 = vld [vmem:[%s10598_s17 + $0xc78] sm:$0xff]  ;;  %v8521_v39 = vcombine.low %v772_v17, %v780_v18 }
 0x28a   : > { %4088 = vmatpush1.bf16.msra.mxu0 %v8409_v32  ;;  %4170 = vmatpush1.bf16.msra.mxu1 %v8411_v33  ;;  %v8524_v32 = vcombine.high %v773_v21, %v781_v22  ;;  %v788_v33 = vld [vmem:[%s10598_s17 + $0xc30] sm:$0xff]  ;;  %v869_v18 = vld [vmem:[%s10598_s17 + $0xeb8] sm:$0xff] }
 0x28b   : > { %4089 = vmatprep.subr.bf16.mxu0 %v8426_v36  ;;  %4171 = vmatprep.subr.bf16.mxu1 %v8428_v37  ;;  %v796_v36 = vld [vmem:[%s10598_s17 + $0xc70] sm:$0xff]  ;;  %v789_v37 = vld [vmem:[%s10598_s17 + $0xc38] sm:$0xff] }
 0x28c   : > { %4119 = vmatprep.mubr.bf16.mxu0 %v10700_v35  ;;  %4201 = vmatprep.mubr.bf16.mxu1 %v10700_v35  ;;  %v8459_v35 = vcombine.low %v709_v50, %v717_v52  ;;  %v8538_v41 = vcombine.high %v788_v33, %v796_v36  ;;  %v8537_v49 = vcombine.low %v788_v33, %v796_v36  ;;  %v877_v21 = vld [vmem:[%s10598_s17 + $0xef8] sm:$0xff]  ;;  %v11185_v33 = vld [vmem:[%s312_s7] sm:$0xff] }
 0x28d   : > { %v8539_v50 = vcombine.low %v789_v37, %v797_v38 }
 0x28e   : > { %4090 = vmatpush1.bf16.msra.mxu0 %v8425_v42  ;;  %4172 = vmatpush1.bf16.msra.mxu1 %v8427_v44  ;;  %v8540_v42 = vcombine.high %v789_v37, %v797_v38  ;;  %v804_v44 = vld [vmem:[%s10598_s17 + $0xcb0] sm:$0xff]  ;;  %v8619_v38 = vcombine.low %v869_v18, %v877_v21 }
 0x28f   : > { %4091 = vmatprep.subr.bf16.mxu0 %v8442_v45  ;;  %4173 = vmatprep.subr.bf16.mxu1 %v8444_v4  ;;  %v812_v45 = vld [vmem:[%s10598_s17 + $0xcf0] sm:$0xff]  ;;  %v805_v4 = vld [vmem:[%s10598_s17 + $0xcb8] sm:$0xff] }
 0x290   : > { %v8554_v52 = vcombine.high %v804_v44, %v812_v45  ;;  %v8553_v57 = vcombine.low %v804_v44, %v812_v45  ;;  %v8555_v58 = vcombine.low %v805_v4, %v813_v46  ;;  %v901_v45 = vld [vmem:[%s10598_s17 + $0xfb8] sm:$0xff] }
 0x292   : > { %4092 = vmatpush1.bf16.msra.mxu0 %v8441_v23  ;;  %4174 = vmatpush1.bf16.msra.mxu1 %v8443_v53  ;;  %v8556_v23 = vcombine.high %v805_v4, %v813_v46  ;;  %v820_v53 = vld [vmem:[%s10598_s17 + $0xd30] sm:$0xff]  ;;  %v909_v4 = vld [vmem:[%s10598_s17 + $0xff8] sm:$0xff] }
 0x293   : > { %4093 = vmatprep.subr.bf16.mxu0 %v8458_v54  ;;  %4175 = vmatprep.subr.bf16.mxu1 %v8460_v55  ;;  %v828_v54 = vld [vmem:[%s10598_s17 + $0xd70] sm:$0xff]  ;;  %v821_v55 = vld [vmem:[%s10598_s17 + $0xd38] sm:$0xff] }
 0x294   : > { %v8570_v59 = vcombine.high %v820_v53, %v828_v54  ;;  %v8569_v0 = vcombine.low %v820_v53, %v828_v54  ;;  %v8571_v1 = vcombine.low %v821_v55, %v829_v56 }
 0x296   : > { %4094 = vmatpush1.bf16.msra.mxu0 %v8457_v60  ;;  %4176 = vmatpush1.bf16.msra.mxu1 %v8459_v35  ;;  %v8572_v60 = vcombine.high %v821_v55, %v829_v56  ;;  %v836_v35 = vld [vmem:[%s10598_s17 + $0xdb0] sm:$0xff]  ;;  %v8651_v56 = vcombine.low %v901_v45, %v909_v4 }
 0x297   : > { %4095 = vmatprep.subr.bf16.mxu0 %v8474_v61  ;;  %4177 = vmatprep.subr.bf16.mxu1 %v8476_v62  ;;  %v844_v61 = vld [vmem:[%s10598_s17 + $0xdf0] sm:$0xff]  ;;  %v837_v62 = vld [vmem:[%s10598_s17 + $0xdb8] sm:$0xff] }
 0x298   : > { %v8586_v2 = vcombine.high %v836_v35, %v844_v61  ;;  %v8585_v10 = vcombine.low %v836_v35, %v844_v61  ;;  %v8587_v11 = vcombine.low %v837_v62, %v845_v63  ;;  %v9319_v35 = vld [vmem:[%s10607_s6] ss:$16 sps:$4 sm:$0xff]  }
 0x29a   : > { %4096 = vmatpush1.bf16.msra.mxu0 %v8473_v3  ;;  %4178 = vmatpush1.bf16.msra.mxu1 %v8475_v5  ;;  %v8588_v3 = vcombine.high %v837_v62, %v845_v63  ;;  %v852_v5 = vld [vmem:[%s10598_s17 + $0xe30] sm:$0xff] }
 0x29b   : > { %4097 = vmatprep.subr.bf16.mxu0 %v8490_v6  ;;  %4179 = vmatprep.subr.bf16.mxu1 %v8492_v7  ;;  %v860_v6 = vld [vmem:[%s10598_s17 + $0xe70] sm:$0xff]  ;;  %v914_v7 = vlaneseq }
 0x29c   : > { %v11140_v15 = vpop.f32.mrb[4].mxu0  ;;  %v11144_v19 = vpop.f32.mrb[4].mxu1  ;;  %v8601_v22 = vcombine.low %v852_v5, %v860_v6  ;;  %v9330_v62 = vld [vmem:[%s10607_s6 + $0x224] ss:$16 sps:$4 sm:$0xff]  }
 0x29d   : > { %v11146_v20 = vpop.f32.mrb[5].mxu0  ;;  %v11150_v24 = vpop.f32.mrb[5].mxu1  ;;  %v11174_v17 = vshrl.u32 %v914_v7, 7  ;;  %v9342_v7 = vld [vmem:[%s10607_s6 + $0x264] ss:$16 sps:$4 sm:$0xff]  }
 0x29e   : > { %v3797_v25 = vpop.f32.mrb[6].mxu0  ;;  %4098 = vmatpush1.bf16.msra.mxu0 %v8489_v12  ;;  %v3879_v27 = vpop.f32.mrb[6].mxu1  ;;  %4180 = vmatpush1.bf16.msra.mxu1 %v8491_v13  ;;  %v8602_v12 = vcombine.high %v852_v5, %v860_v6  ;;  %v8604_v13 = vcombine.high %v853_v8, %v861_v9  ;;  %v9334_v5 = vld [vmem:[%s10607_s6 + $0x240] ss:$16 sps:$4 sm:$0xff]   ;;  %v9339_v6 = vld [vmem:[%s10607_s6 + $0x64] ss:$16 sps:$4 sm:$0xff]  }
 0x29f   : > { %v3798_v28 = vpop.f32.mrb[7].mxu0  ;;  %4099 = vmatprep.subr.bf16.mxu0 %v8506_v14  ;;  %v3880_v31 = vpop.f32.mrb[7].mxu1  ;;  %4181 = vmatprep.subr.bf16.mxu1 %v8508_v16  ;;  %v868_v14 = vld [vmem:[%s10598_s17 + $0xeb0] sm:$0xff]  ;;  %v8603_v25 = vcombine.low %v853_v8, %v861_v9  ;;  %v8620_v27 = vcombine.high %v869_v18, %v877_v21  ;;  %v928_v36 = vsub.s32 3, %v11174_v17 }
 0x2a0   : > { %v876_v16 = vld [vmem:[%s10598_s17 + $0xef0] sm:$0xff]  ;;  %v885_v31 = vld [vmem:[%s10598_s17 + $0xf38] sm:$0xff] }
 0x2a1   : > { %v884_v28 = vld [vmem:[%s10598_s17 + $0xf30] sm:$0xff]  ;;  %v8617_v37 = vcombine.low %v868_v14, %v876_v16  ;;  %v929_v46 = vrot.slane %v11185_v33, %v928_v36 }
 0x2a2   : > { %4100 = vmatpush1.bf16.msra.mxu0 %v8505_v26  ;;  %4182 = vmatpush1.bf16.msra.mxu1 %v8507_v29  ;;  %v8618_v26 = vcombine.high %v868_v14, %v876_v16  ;;  %v892_v29 = vld [vmem:[%s10598_s17 + $0xf70] sm:$0xff] }
 0x2a3   : > { %4101 = vmatprep.subr.bf16.mxu0 %v8522_v30  ;;  %4183 = vmatprep.subr.bf16.mxu1 %v8524_v32  ;;  %v920_v30 = vsub.s32 1, %v11174_v17  ;;  %v893_v32 = vld [vmem:[%s10598_s17 + $0xf78] sm:$0xff]  ;;  %v9176_v54 = vadd.f32 %v11006_v51, %v929_v46  ;;  %v9327_v51 = vld [vmem:[%s10607_s6 + $0x24] ss:$16 sps:$4 sm:$0xff]   ;;  %v9337_v8 = vld [vmem:[%s10607_s6 + $0x60] ss:$16 sps:$4 sm:$0xff]  }
 0x2a4   : > { %v9340_v9 = vld [vmem:[%s10607_s6 + $0x260] ss:$16 sps:$4 sm:$0xff]   ;;  %v9351_v14 = vld [vmem:[%s10607_s6 + $0xa4] ss:$16 sps:$4 sm:$0xff]  }
 0x2a5   : > { %v921_v44 = vrot.slane %v11185_v33, %v920_v30  ;;  %v9354_v16 = vld [vmem:[%s10607_s6 + $0x2a4] ss:$16 sps:$4 sm:$0xff]   ;;  %v9349_v18 = vld [vmem:[%s10607_s6 + $0xa0] ss:$16 sps:$4 sm:$0xff]  }
 0x2a6   : > { %4102 = vmatpush1.bf16.msra.mxu0 %v8521_v39  ;;  %4184 = vmatpush1.bf16.msra.mxu1 %v8523_v40  ;;  %v8634_v39 = vcombine.high %v884_v28, %v892_v29  ;;  %v8636_v40 = vcombine.high %v885_v31, %v893_v32  ;;  %v9352_v21 = vld [vmem:[%s10607_s6 + $0x2a0] ss:$16 sps:$4 sm:$0xff]   ;;  %v9384_v46 = vld [vmem:[%s10607_s6 + $0x344] ss:$16 sps:$4 sm:$0xff]  }
 0x2a7   : > { %4103 = vmatprep.subr.bf16.mxu0 %v8538_v41  ;;  %4185 = vmatprep.subr.bf16.mxu1 %v8540_v42  ;;  %v900_v41 = vld [vmem:[%s10598_s17 + $0xfb0] sm:$0xff]  ;;  %v9174_v53 = vadd.f32 %v11002_v48, %v921_v44 }
 0x2a8   : > { %v908_v42 = vld [vmem:[%s10598_s17 + $0xff0] sm:$0xff] }
 0x2a9   : > { %v8649_v55 = vcombine.low %v900_v41, %v908_v42  ;;  %v9322_v48 = vld [vmem:[%s10607_s6 + $0x200] ss:$16 sps:$4 sm:$0xff]  }
 0x2aa   : > { %4104 = vmatpush1.bf16.msra.mxu0 %v8537_v49  ;;  %4186 = vmatpush1.bf16.msra.mxu1 %v8539_v50  ;;  %v8633_v49 = vcombine.low %v884_v28, %v892_v29  ;;  %v8635_v50 = vcombine.low %v885_v31, %v893_v32  ;;  %v9363_v28 = vld [vmem:[%s10607_s6 + $0xe4] ss:$16 sps:$4 sm:$0xff]   ;;  %v9361_v31 = vld [vmem:[%s10607_s6 + $0xe0] ss:$16 sps:$4 sm:$0xff]  }
 0x2ab   : > { %4105 = vmatprep.subr.bf16.mxu0 %v8554_v52  ;;  %4187 = vmatprep.subr.bf16.mxu1 %v8556_v23  ;;  %v8650_v52 = vcombine.high %v900_v41, %v908_v42  ;;  %v8652_v23 = vcombine.high %v901_v45, %v909_v4  ;;  %v9366_v29 = vld [vmem:[%s10607_s6 + $0x2e4] ss:$16 sps:$4 sm:$0xff]   ;;  %v9364_v32 = vld [vmem:[%s10607_s6 + $0x2e0] ss:$16 sps:$4 sm:$0xff]  }
 0x2ac   : > { %v9375_v41 = vld [vmem:[%s10607_s6 + $0x124] ss:$16 sps:$4 sm:$0xff]   ;;  %v9373_v44 = vld [vmem:[%s10607_s6 + $0x120] ss:$16 sps:$4 sm:$0xff]  }
 0x2ad   : > { %v9378_v42 = vld [vmem:[%s10607_s6 + $0x324] ss:$16 sps:$4 sm:$0xff]   ;;  %v9376_v45 = vld [vmem:[%s10607_s6 + $0x320] ss:$16 sps:$4 sm:$0xff]  }
 0x2ae   : > { %4106 = vmatpush1.bf16.msra.mxu0 %v8553_v57  ;;  %4188 = vmatpush1.bf16.msra.mxu1 %v8555_v58  ;;  %v9321_v57 = vld [vmem:[%s10607_s6 + $0x4] ss:$16 sps:$4 sm:$0xff]  }
 0x2af   : > { %4107 = vmatprep.subr.bf16.mxu0 %v8570_v59  ;;  %4189 = vmatprep.subr.bf16.mxu1 %v8572_v60  ;;  %v9324_v58 = vld [vmem:[%s10607_s6 + $0x204] ss:$16 sps:$4 sm:$0xff]   ;;  %v4211_v59 = vmax.f32 %v9174_v53, 0.0  ;;  %v4213_v60 = vmax.f32 %v9176_v54, 0.0  ;;  %v9385_v53 = vld [vmem:[%s10607_s6 + $0x160] ss:$16 sps:$4 sm:$0xff]  }
 0x2b0   : > { %v9381_v4 = vld [vmem:[%s10607_s6 + $0x144] ss:$16 sps:$4 sm:$0xff]   ;;  %v9388_v54 = vld [vmem:[%s10607_s6 + $0x360] ss:$16 sps:$4 sm:$0xff]  }
 0x2b1   : > { %v11205_v61 = vpack.c.bf16 %v4211_v59, %v4211_v59  ;;  %v11209_v63 = vpack.c.bf16 %v4213_v60, %v4213_v60  ;;  %v9394_v59 = vld [vmem:[%s10607_s6 + $0x380] ss:$16 sps:$4 sm:$0xff]   ;;  %v9399_v60 = vld [vmem:[%s10607_s6 + $0x1a4] ss:$16 sps:$4 sm:$0xff]  }
 0x2b2   : > { %4108 = vmatpush1.bf16.msra.mxu0 %v8569_v0  ;;  %4190 = vmatpush1.bf16.msra.mxu1 %v8571_v1  ;;  %v9325_v0 = vld [vmem:[%s10607_s6 + $0x20] ss:$16 sps:$4 sm:$0xff]  }
 0x2b3   : > { %4109 = vmatprep.subr.bf16.mxu0 %v8586_v2  ;;  %4191 = vmatprep.subr.bf16.mxu1 %v8588_v3  ;;  %v9328_v1 = vld [vmem:[%s10607_s6 + $0x220] ss:$16 sps:$4 sm:$0xff]   ;;  %v9333_v2 = vld [vmem:[%s10607_s6 + $0x44] ss:$16 sps:$4 sm:$0xff]  }
 0x2b4   : > { %v9336_v3 = vld [vmem:[%s10607_s6 + $0x244] ss:$16 sps:$4 sm:$0xff]  }
 0x2b6   : > { %4110 = vmatpush1.bf16.msra.mxu0 %v8585_v10  ;;  %4192 = vmatpush1.bf16.msra.mxu1 %v8587_v11  ;;  %v9345_v10 = vld [vmem:[%s10607_s6 + $0x84] ss:$16 sps:$4 sm:$0xff]  }
 0x2b7   : > { %4111 = vmatprep.subr.bf16.mxu0 %v8602_v12  ;;  %4193 = vmatprep.subr.bf16.mxu1 %v8604_v13  ;;  %v9348_v11 = vld [vmem:[%s10607_s6 + $0x284] ss:$16 sps:$4 sm:$0xff]   ;;  %v9343_v12 = vld [vmem:[%s10607_s6 + $0x80] ss:$16 sps:$4 sm:$0xff]  }
 0x2b8   : > { %v9346_v13 = vld [vmem:[%s10607_s6 + $0x280] ss:$16 sps:$4 sm:$0xff]  }
 0x2ba   : > { %4112 = vmatpush1.bf16.msra.mxu0 %v8601_v22  ;;  %4194 = vmatpush1.bf16.msra.mxu1 %v8603_v25  ;;  %v9357_v22 = vld [vmem:[%s10607_s6 + $0xc4] ss:$16 sps:$4 sm:$0xff]  }
 0x2bb   : > { %4113 = vmatprep.subr.bf16.mxu0 %v8618_v26  ;;  %4195 = vmatprep.subr.bf16.mxu1 %v8620_v27  ;;  %v9360_v25 = vld [vmem:[%s10607_s6 + $0x2c4] ss:$16 sps:$4 sm:$0xff]   ;;  %v9355_v26 = vld [vmem:[%s10607_s6 + $0xc0] ss:$16 sps:$4 sm:$0xff]  }
 0x2bc   : > { %v9358_v27 = vld [vmem:[%s10607_s6 + $0x2c0] ss:$16 sps:$4 sm:$0xff]  }
 0x2be   : > { %4114 = vmatpush1.bf16.msra.mxu0 %v8617_v37  ;;  %4196 = vmatpush1.bf16.msra.mxu1 %v8619_v38  ;;  %v9369_v37 = vld [vmem:[%s10607_s6 + $0x104] ss:$16 sps:$4 sm:$0xff]  }
 0x2bf   : > { %4115 = vmatprep.subr.bf16.mxu0 %v8634_v39  ;;  %4197 = vmatprep.subr.bf16.mxu1 %v8636_v40  ;;  %v9372_v38 = vld [vmem:[%s10607_s6 + $0x304] ss:$16 sps:$4 sm:$0xff]   ;;  %v9367_v39 = vld [vmem:[%s10607_s6 + $0x100] ss:$16 sps:$4 sm:$0xff]  }
 0x2c0   : > { %v9370_v40 = vld [vmem:[%s10607_s6 + $0x300] ss:$16 sps:$4 sm:$0xff]  }
 0x2c2   : > { %4116 = vmatpush1.bf16.msra.mxu0 %v8633_v49  ;;  %4198 = vmatpush1.bf16.msra.mxu1 %v8635_v50  ;;  %v9379_v49 = vld [vmem:[%s10607_s6 + $0x140] ss:$16 sps:$4 sm:$0xff]  }
 0x2c3   : > { %4117 = vmatprep.subr.bf16.mxu0 %v8650_v52  ;;  %4199 = vmatprep.subr.bf16.mxu1 %v8652_v23  ;;  %v9382_v50 = vld [vmem:[%s10607_s6 + $0x340] ss:$16 sps:$4 sm:$0xff]   ;;  %v9387_v52 = vld [vmem:[%s10607_s6 + $0x164] ss:$16 sps:$4 sm:$0xff]  }
 0x2c4   : > { %v9390_v23 = vld [vmem:[%s10607_s6 + $0x364] ss:$16 sps:$4 sm:$0xff]  }
 0x2c6   : > { %4118 = vmatpush1.bf16.msra.mxu0 %v8649_v55  ;;  %4200 = vmatpush1.bf16.msra.mxu1 %v8651_v56  ;;  %v9393_v55 = vld [vmem:[%s10607_s6 + $0x184] ss:$16 sps:$4 sm:$0xff]  }
 0x2c7   : > { %7318 = vmatprep.subr.bf16.mxu0 %v9321_v57  ;;  %7359 = vmatprep.subr.bf16.mxu1 %v9324_v58  ;;  %v9396_v56 = vld [vmem:[%s10607_s6 + $0x384] ss:$16 sps:$4 sm:$0xff]   ;;  %v9391_v57 = vld [vmem:[%s10607_s6 + $0x180] ss:$16 sps:$4 sm:$0xff]   ;;  %v916_v58 = vsub.s32 0, %v11174_v17 }
 0x2c9   : > { %4120 = vmatmul.mubr.bf16.vlgmr.msra.gmra.mrb[12].mxu0 %v10766_v34  ;;  %4202 = vmatmul.mubr.bf16.vlgmr.msra.gmra.mrb[12].mxu1 %v10766_v34  ;;  %v9331_v34 = vld [vmem:[%s10607_s6 + $0x40] ss:$16 sps:$4 sm:$0xff]  }
 0x2ca   : > { %7319 = vmatpush1.bf16.msra.mxu0 %v9319_v35  ;;  %7350 = vmatprep.mubr.bf16.mxu0 %v11205_v61  ;;  %v924_v35 = vsub.s32 2, %v11174_v17 }
 0x2cb   : > { %7360 = vmatpush1.bf16.msra.mxu1 %v9322_v48  ;;  %7391 = vmatprep.mubr.bf16.mxu1 %v11209_v63  ;;  %v9402_v48 = vld [vmem:[%s10607_s6 + $0x3a4] ss:$16 sps:$4 sm:$0xff]  }
 0x2cc   : > { %7320 = vmatprep.subr.bf16.mxu0 %v9327_v51  ;;  %7361 = vmatprep.subr.bf16.mxu1 %v9330_v62  ;;  %v936_v51 = vsub.s32 5, %v11174_v17  ;;  %v944_v62 = vsub.s32 7, %v11174_v17 }
 0x2ce   : > { %7321 = vmatpush1.bf16.msra.mxu0 %v9325_v0  ;;  %v9397_v0 = vld [vmem:[%s10607_s6 + $0x1a0] ss:$16 sps:$4 sm:$0xff]  }
 0x2cf   : > { %7362 = vmatpush1.bf16.msra.mxu1 %v9328_v1  ;;  %7322 = vmatprep.subr.bf16.mxu0 %v9333_v2  ;;  %v917_v1 = vrot.slane %v11185_v33, %v916_v58  ;;  %v9400_v2 = vld [vmem:[%s10607_s6 + $0x3a0] ss:$16 sps:$4 sm:$0xff]  }
 0x2d0   : > { %7363 = vmatprep.subr.bf16.mxu1 %v9336_v3  ;;  %v9405_v3 = vld [vmem:[%s10607_s6 + $0x1c4] ss:$16 sps:$4 sm:$0xff]  }
 0x2d2   : > { %7323 = vmatpush1.bf16.msra.mxu0 %v9331_v34  ;;  %v925_v34 = vrot.slane %v11185_v33, %v924_v35 }
 0x2d3   : > { %7364 = vmatpush1.bf16.msra.mxu1 %v9334_v5  ;;  %7324 = vmatprep.subr.bf16.mxu0 %v9339_v6  ;;  %v9408_v5 = vld [vmem:[%s10607_s6 + $0x3c4] ss:$16 sps:$4 sm:$0xff]   ;;  %v937_v6 = vrot.slane %v11185_v33, %v936_v51 }
 0x2d4   : > { %7365 = vmatprep.subr.bf16.mxu1 %v9342_v7  ;;  %v945_v7 = vrot.slane %v11185_v33, %v944_v62 }
 0x2d6   : > { %7325 = vmatpush1.bf16.msra.mxu0 %v9337_v8  ;;  %v9403_v8 = vld [vmem:[%s10607_s6 + $0x1c0] ss:$16 sps:$4 sm:$0xff]  }
 0x2d7   : > { %7366 = vmatpush1.bf16.msra.mxu1 %v9340_v9  ;;  %7326 = vmatprep.subr.bf16.mxu0 %v9345_v10  ;;  %v9173_v9 = vadd.f32 %v10996_v43, %v917_v1  ;;  %v9406_v10 = vld [vmem:[%s10607_s6 + $0x3c0] ss:$16 sps:$4 sm:$0xff]  }
 0x2d8   : > { %7367 = vmatprep.subr.bf16.mxu1 %v9348_v11  ;;  %v9411_v11 = vld [vmem:[%s10607_s6 + $0x1e4] ss:$16 sps:$4 sm:$0xff]   ;;  %v9412_v43 = vld [vmem:[%s10607_s6 + $0x3e0] ss:$16 sps:$4 sm:$0xff]  }
 0x2da   : > { %7327 = vmatpush1.bf16.msra.mxu0 %v9343_v12  ;;  %v9175_v12 = vadd.f32 %v11000_v47, %v925_v34  ;;  %v9420_v47 = vld [vmem:[%s10607_s6 + $0x604] ss:$16 sps:$4 sm:$0xff]  }
 0x2db   : > { %7368 = vmatpush1.bf16.msra.mxu1 %v9346_v13  ;;  %7328 = vmatprep.subr.bf16.mxu0 %v9351_v14  ;;  %v9414_v13 = vld [vmem:[%s10607_s6 + $0x3e4] ss:$16 sps:$4 sm:$0xff]   ;;  %v9178_v14 = vadd.f32 %v11146_v20, %v937_v6  ;;  %v9415_v20 = vld [vmem:[%s10607_s6 + $0x400] ss:$16 sps:$4 sm:$0xff]  }
 0x2dc   : > { %7369 = vmatprep.subr.bf16.mxu1 %v9354_v16  ;;  %v9180_v16 = vadd.f32 %v11150_v24, %v945_v7  ;;  %v9418_v24 = vld [vmem:[%s10607_s6 + $0x600] ss:$16 sps:$4 sm:$0xff]  }
 0x2de   : > { %7329 = vmatpush1.bf16.msra.mxu0 %v9349_v18  ;;  %v9409_v18 = vld [vmem:[%s10607_s6 + $0x1e0] ss:$16 sps:$4 sm:$0xff]  }
 0x2df   : > { %7370 = vmatpush1.bf16.msra.mxu1 %v9352_v21  ;;  %7330 = vmatprep.subr.bf16.mxu0 %v9357_v22  ;;  %v4210_v21 = vmax.f32 %v9173_v9, 0.0  ;;  %v9417_v22 = vld [vmem:[%s10607_s6 + $0x404] ss:$16 sps:$4 sm:$0xff]  }
 0x2e0   : > { %7371 = vmatprep.subr.bf16.mxu1 %v9360_v25  ;;  %v4212_v25 = vmax.f32 %v9175_v12, 0.0  ;;  %v9459_v9 = vld [vmem:[%s10607_s6 + $0x4e4] ss:$16 sps:$4 sm:$0xff]   ;;  %v9457_v12 = vld [vmem:[%s10607_s6 + $0x4e0] ss:$16 sps:$4 sm:$0xff]  }
 0x2e2   : > { %7331 = vmatpush1.bf16.msra.mxu0 %v9355_v26  ;;  %v4215_v26 = vmax.f32 %v9178_v14, 0.0  ;;  %v9465_v14 = vld [vmem:[%s10607_s6 + $0x504] ss:$16 sps:$4 sm:$0xff]  }
 0x2e3   : > { %7372 = vmatpush1.bf16.msra.mxu1 %v9358_v27  ;;  %7332 = vmatprep.subr.bf16.mxu0 %v9363_v28  ;;  %v4217_v27 = vmax.f32 %v9180_v16, 0.0  ;;  %v11295_v28 = vpack.c.bf16 %v4210_v21, %v4210_v21  ;;  %v9468_v16 = vld [vmem:[%s10607_s6 + $0x704] ss:$16 sps:$4 sm:$0xff]   ;;  %v9466_v21 = vld [vmem:[%s10607_s6 + $0x700] ss:$16 sps:$4 sm:$0xff]  }
 0x2e4   : > { %7373 = vmatprep.subr.bf16.mxu1 %v9366_v29  ;;  %v11298_v29 = vpack.c.bf16 %v4212_v25, %v4212_v25  ;;  %v9469_v25 = vld [vmem:[%s10607_s6 + $0x520] ss:$16 sps:$4 sm:$0xff]  }
 0x2e6   : > { %7333 = vmatpush1.bf16.msra.mxu0 %v9361_v31  ;;  %v9423_v31 = vld [vmem:[%s10607_s6 + $0x424] ss:$16 sps:$4 sm:$0xff]  }
 0x2e7   : > { %7374 = vmatpush1.bf16.msra.mxu1 %v9364_v32  ;;  %7334 = vmatprep.subr.bf16.mxu0 %v9369_v37  ;;  %v11301_v32 = vpack.c.bf16 %v4215_v26, %v4215_v26  ;;  %v9426_v37 = vld [vmem:[%s10607_s6 + $0x624] ss:$16 sps:$4 sm:$0xff]  }
 0x2e8   : > { %7375 = vmatprep.subr.bf16.mxu1 %v9372_v38  ;;  %v11305_v38 = vpack.c.bf16 %v4217_v27, %v4217_v27  ;;  %v9477_v26 = vld [vmem:[%s10607_s6 + $0x544] ss:$16 sps:$4 sm:$0xff]  }
 0x2e9   : > { %v9480_v27 = vld [vmem:[%s10607_s6 + $0x744] ss:$16 sps:$4 sm:$0xff]  }
 0x2ea   : > { %7335 = vmatpush1.bf16.msra.mxu0 %v9367_v39  ;;  %v9421_v39 = vld [vmem:[%s10607_s6 + $0x420] ss:$16 sps:$4 sm:$0xff]  }
 0x2eb   : > { %7376 = vmatpush1.bf16.msra.mxu1 %v9370_v40  ;;  %7336 = vmatprep.subr.bf16.mxu0 %v9375_v41  ;;  %v9424_v40 = vld [vmem:[%s10607_s6 + $0x620] ss:$16 sps:$4 sm:$0xff]   ;;  %v9429_v41 = vld [vmem:[%s10607_s6 + $0x444] ss:$16 sps:$4 sm:$0xff]  }
 0x2ec   : > { %7377 = vmatprep.subr.bf16.mxu1 %v9378_v42  ;;  %v9432_v42 = vld [vmem:[%s10607_s6 + $0x644] ss:$16 sps:$4 sm:$0xff]  }
 0x2ee   : > { %7337 = vmatpush1.bf16.msra.mxu0 %v9373_v44  ;;  %v9427_v44 = vld [vmem:[%s10607_s6 + $0x440] ss:$16 sps:$4 sm:$0xff]  }
 0x2ef   : > { %7378 = vmatpush1.bf16.msra.mxu1 %v9376_v45  ;;  %7338 = vmatprep.subr.bf16.mxu0 %v9381_v4  ;;  %v9430_v45 = vld [vmem:[%s10607_s6 + $0x640] ss:$16 sps:$4 sm:$0xff]   ;;  %v9435_v4 = vld [vmem:[%s10607_s6 + $0x464] ss:$16 sps:$4 sm:$0xff]  }
 0x2f0   : > { %7379 = vmatprep.subr.bf16.mxu1 %v9384_v46  ;;  %v9438_v46 = vld [vmem:[%s10607_s6 + $0x664] ss:$16 sps:$4 sm:$0xff]  }
 0x2f2   : > { %7339 = vmatpush1.bf16.msra.mxu0 %v9379_v49  ;;  %v9433_v49 = vld [vmem:[%s10607_s6 + $0x460] ss:$16 sps:$4 sm:$0xff]  }
 0x2f3   : > { %7380 = vmatpush1.bf16.msra.mxu1 %v9382_v50  ;;  %7340 = vmatprep.subr.bf16.mxu0 %v9387_v52  ;;  %v9436_v50 = vld [vmem:[%s10607_s6 + $0x660] ss:$16 sps:$4 sm:$0xff]   ;;  %v9441_v52 = vld [vmem:[%s10607_s6 + $0x484] ss:$16 sps:$4 sm:$0xff]  }
 0x2f4   : > { %7381 = vmatprep.subr.bf16.mxu1 %v9390_v23  ;;  %v9444_v23 = vld [vmem:[%s10607_s6 + $0x684] ss:$16 sps:$4 sm:$0xff]  }
 0x2f6   : > { %7341 = vmatpush1.bf16.msra.mxu0 %v9385_v53  ;;  %v9439_v53 = vld [vmem:[%s10607_s6 + $0x480] ss:$16 sps:$4 sm:$0xff]  }
 0x2f7   : > { %7382 = vmatpush1.bf16.msra.mxu1 %v9388_v54  ;;  %7342 = vmatprep.subr.bf16.mxu0 %v9393_v55  ;;  %v9442_v54 = vld [vmem:[%s10607_s6 + $0x680] ss:$16 sps:$4 sm:$0xff]   ;;  %v9447_v55 = vld [vmem:[%s10607_s6 + $0x4a4] ss:$16 sps:$4 sm:$0xff]  }
 0x2f8   : > { %7383 = vmatprep.subr.bf16.mxu1 %v9396_v56  ;;  %v9450_v56 = vld [vmem:[%s10607_s6 + $0x6a4] ss:$16 sps:$4 sm:$0xff]  }
 0x2fa   : > { %7343 = vmatpush1.bf16.msra.mxu0 %v9391_v57  ;;  %v9445_v57 = vld [vmem:[%s10607_s6 + $0x4a0] ss:$16 sps:$4 sm:$0xff]  }
 0x2fb   : > { %7384 = vmatpush1.bf16.msra.mxu1 %v9394_v59  ;;  %7344 = vmatprep.subr.bf16.mxu0 %v9399_v60  ;;  %v9448_v59 = vld [vmem:[%s10607_s6 + $0x6a0] ss:$16 sps:$4 sm:$0xff]   ;;  %v9453_v60 = vld [vmem:[%s10607_s6 + $0x4c4] ss:$16 sps:$4 sm:$0xff]  }
 0x2fc   : > { %7385 = vmatprep.subr.bf16.mxu1 %v9402_v48 }
 0x2fe   : > { %7345 = vmatpush1.bf16.msra.mxu0 %v9397_v0  ;;  %v9456_v0 = vld [vmem:[%s10607_s6 + $0x6c4] ss:$16 sps:$4 sm:$0xff]  }
 0x2ff   : > { %7386 = vmatpush1.bf16.msra.mxu1 %v9400_v2  ;;  %7346 = vmatprep.subr.bf16.mxu0 %v9405_v3 }
 0x300   : > { %7387 = vmatprep.subr.bf16.mxu1 %v9408_v5  ;;  %v9451_v5 = vld [vmem:[%s10607_s6 + $0x4c0] ss:$16 sps:$4 sm:$0xff]  }
 0x302   : > { %7347 = vmatpush1.bf16.msra.mxu0 %v9403_v8  ;;  %v9454_v8 = vld [vmem:[%s10607_s6 + $0x6c0] ss:$16 sps:$4 sm:$0xff]  }
 0x303   : > { %7388 = vmatpush1.bf16.msra.mxu1 %v9406_v10  ;;  %7348 = vmatprep.subr.bf16.mxu0 %v9411_v11  ;;  %v9462_v11 = vld [vmem:[%s10607_s6 + $0x6e4] ss:$16 sps:$4 sm:$0xff]  }
 0x304   : > { %7389 = vmatprep.subr.bf16.mxu1 %v9414_v13  ;;  %v9460_v13 = vld [vmem:[%s10607_s6 + $0x6e0] ss:$16 sps:$4 sm:$0xff]  }
 0x306   : > { %7349 = vmatpush1.bf16.msra.mxu0 %v9409_v18  ;;  %v9463_v18 = vld [vmem:[%s10607_s6 + $0x500] ss:$16 sps:$4 sm:$0xff]  }
 0x307   : > { %7390 = vmatpush1.bf16.msra.mxu1 %v9412_v43  ;;  %7400 = vmatprep.subr.bf16.mxu0 %v9417_v22  ;;  %v9471_v43 = vld [vmem:[%s10607_s6 + $0x524] ss:$16 sps:$4 sm:$0xff]  }
 0x308   : > { %7441 = vmatprep.subr.bf16.mxu1 %v9420_v47  ;;  %v9474_v22 = vld [vmem:[%s10607_s6 + $0x724] ss:$16 sps:$4 sm:$0xff]   ;;  %v9472_v47 = vld [vmem:[%s10607_s6 + $0x720] ss:$16 sps:$4 sm:$0xff]  }
 0x309   : > { %7351 = vmatmul.mubr.bf16.vlgmr.msra.gmra.mrb[16].mxu0 %v11295_v28 }
 0x30a   : > { %7392 = vmatmul.mubr.bf16.vlgmr.msra.gmra.mrb[16].mxu1 %v11298_v29  ;;  %7401 = vmatpush1.bf16.msra.mxu0 %v9415_v20  ;;  %v9475_v20 = vld [vmem:[%s10607_s6 + $0x540] ss:$16 sps:$4 sm:$0xff]  }
 0x30b   : > { %7432 = vmatprep.mubr.bf16.mxu0 %v11301_v32  ;;  %7442 = vmatpush1.bf16.msra.mxu1 %v9418_v24  ;;  %v9478_v24 = vld [vmem:[%s10607_s6 + $0x740] ss:$16 sps:$4 sm:$0xff]  }
 0x30c   : > { %7473 = vmatprep.mubr.bf16.mxu1 %v11305_v38  ;;  %7402 = vmatprep.subr.bf16.mxu0 %v9423_v31  ;;  %v9483_v31 = vld [vmem:[%s10607_s6 + $0x564] ss:$16 sps:$4 sm:$0xff]  }
 0x30d   : > { %7443 = vmatprep.subr.bf16.mxu1 %v9426_v37  ;;  %v9486_v37 = vld [vmem:[%s10607_s6 + $0x764] ss:$16 sps:$4 sm:$0xff]  }
 0x30e   : > { %7403 = vmatpush1.bf16.msra.mxu0 %v9421_v39  ;;  %v9481_v39 = vld [vmem:[%s10607_s6 + $0x560] ss:$16 sps:$4 sm:$0xff]  }
 0x30f   : > { %7444 = vmatpush1.bf16.msra.mxu1 %v9424_v40  ;;  %7404 = vmatprep.subr.bf16.mxu0 %v9429_v41  ;;  %v9484_v40 = vld [vmem:[%s10607_s6 + $0x760] ss:$16 sps:$4 sm:$0xff]   ;;  %v9489_v41 = vld [vmem:[%s10607_s6 + $0x584] ss:$16 sps:$4 sm:$0xff]  }
 0x310   : > { %7445 = vmatprep.subr.bf16.mxu1 %v9432_v42  ;;  %v9492_v42 = vld [vmem:[%s10607_s6 + $0x784] ss:$16 sps:$4 sm:$0xff]  }
 0x312   : > { %7405 = vmatpush1.bf16.msra.mxu0 %v9427_v44  ;;  %v9487_v44 = vld [vmem:[%s10607_s6 + $0x580] ss:$16 sps:$4 sm:$0xff]  }
 0x313   : > { %7446 = vmatpush1.bf16.msra.mxu1 %v9430_v45  ;;  %7406 = vmatprep.subr.bf16.mxu0 %v9435_v4  ;;  %v932_v45 = vsub.s32 4, %v11174_v17  ;;  %v9490_v4 = vld [vmem:[%s10607_s6 + $0x780] ss:$16 sps:$4 sm:$0xff]  }
 0x314   : > { %7447 = vmatprep.subr.bf16.mxu1 %v9438_v46  ;;  %v9495_v46 = vld [vmem:[%s10607_s6 + $0x5a4] ss:$16 sps:$4 sm:$0xff]  }
 0x316   : > { %7407 = vmatpush1.bf16.msra.mxu0 %v9433_v49  ;;  %v940_v49 = vsub.s32 6, %v11174_v17  ;;  %v9702_v17 = vld [vmem:[%s10607_s6 + $0xfe4] ss:$16 sps:$4 sm:$0xff]  }
 0x317   : > { %7448 = vmatpush1.bf16.msra.mxu1 %v9436_v50  ;;  %7408 = vmatprep.subr.bf16.mxu0 %v9441_v52  ;;  %v9498_v50 = vld [vmem:[%s10607_s6 + $0x7a4] ss:$16 sps:$4 sm:$0xff]   ;;  %v11370_v52 = vld [vmem:[%s312_s7 + $0x8] sm:$0xff] }
 0x318   : > { %7449 = vmatprep.subr.bf16.mxu1 %v9444_v23  ;;  %v9493_v23 = vld [vmem:[%s10607_s6 + $0x5a0] ss:$16 sps:$4 sm:$0xff]  }
 0x31a   : > { %7409 = vmatpush1.bf16.msra.mxu0 %v9439_v53  ;;  %v933_v53 = vrot.slane %v11185_v33, %v932_v45 }
 0x31b   : > { %7450 = vmatpush1.bf16.msra.mxu1 %v9442_v54  ;;  %7410 = vmatprep.subr.bf16.mxu0 %v9447_v55  ;;  %v9496_v54 = vld [vmem:[%s10607_s6 + $0x7a0] ss:$16 sps:$4 sm:$0xff]   ;;  %v9501_v55 = vld [vmem:[%s10607_s6 + $0x5c4] ss:$16 sps:$4 sm:$0xff]  }
 0x31c   : > { %v11329_v48 = vpop.f32.mrb[8].mxu0  ;;  %7451 = vmatprep.subr.bf16.mxu1 %v9450_v56  ;;  %v11332_v1 = vpop.f32.mrb[8].mxu1  ;;  %v941_v56 = vrot.slane %v11185_v33, %v940_v49  ;;  %v9502_v33 = vld [vmem:[%s10607_s6 + $0x7c0] ss:$16 sps:$4 sm:$0xff]  }
 0x31d   : > { %v11334_v2 = vpop.f32.mrb[9].mxu0  ;;  %v11336_v3 = vpop.f32.mrb[9].mxu1 }
 0x31e   : > { %v3961_v34 = vpop.f32.mrb[10].mxu0  ;;  %7411 = vmatpush1.bf16.msra.mxu0 %v9445_v57  ;;  %v4043_v6 = vpop.f32.mrb[10].mxu1  ;;  %v9504_v57 = vld [vmem:[%s10607_s6 + $0x7c4] ss:$16 sps:$4 sm:$0xff]  }
 0x31f   : > { %7452 = vmatpush1.bf16.msra.mxu1 %v9448_v59  ;;  %v3962_v7 = vpop.f32.mrb[11].mxu0  ;;  %7412 = vmatprep.subr.bf16.mxu0 %v9453_v60  ;;  %v4044_v10 = vpop.f32.mrb[11].mxu1  ;;  %v953_v59 = vrot.slane %v11370_v52, %v920_v30  ;;  %v961_v60 = vrot.slane %v11370_v52, %v928_v36  ;;  %v9177_v34 = vadd.f32 %v11140_v15, %v933_v53  ;;  %v9508_v15 = vld [vmem:[%s10607_s6 + $0x7e0] ss:$16 sps:$4 sm:$0xff]  }
 0x320   : > { %7453 = vmatprep.subr.bf16.mxu1 %v9456_v0  ;;  %v9499_v0 = vld [vmem:[%s10607_s6 + $0x5c0] ss:$16 sps:$4 sm:$0xff]   ;;  %v9179_v6 = vadd.f32 %v11144_v19, %v941_v56  ;;  %v9510_v7 = vld [vmem:[%s10607_s6 + $0x7e4] ss:$16 sps:$4 sm:$0xff]  }
 0x321   : > { %v9182_v30 = vadd.f32 %v11334_v2, %v953_v59  ;;  %v9184_v36 = vadd.f32 %v11336_v3, %v961_v60  ;;  %v9513_v10 = vld [vmem:[%s10607_s6 + $0x804] ss:$16 sps:$4 sm:$0xff]   ;;  %v9511_v2 = vld [vmem:[%s10607_s6 + $0x800] ss:$16 sps:$4 sm:$0xff]  }
 0x322   : > { %7413 = vmatpush1.bf16.msra.mxu0 %v9451_v5  ;;  %v9507_v5 = vld [vmem:[%s10607_s6 + $0x5e4] ss:$16 sps:$4 sm:$0xff]   ;;  %v9514_v3 = vld [vmem:[%s10607_s6 + $0xa00] ss:$16 sps:$4 sm:$0xff]  }
 0x323   : > { %7454 = vmatpush1.bf16.msra.mxu1 %v9454_v8  ;;  %7414 = vmatprep.subr.bf16.mxu0 %v9459_v9  ;;  %v9505_v8 = vld [vmem:[%s10607_s6 + $0x5e0] ss:$16 sps:$4 sm:$0xff]   ;;  %v4214_v9 = vmax.f32 %v9177_v34, 0.0  ;;  %v9516_v19 = vld [vmem:[%s10607_s6 + $0xa04] ss:$16 sps:$4 sm:$0xff]  }
 0x324   : > { %7455 = vmatprep.subr.bf16.mxu1 %v9462_v11  ;;  %v4216_v11 = vmax.f32 %v9179_v6, 0.0  ;;  %v9544_v53 = vld [vmem:[%s10607_s6 + $0xaa0] ss:$16 sps:$4 sm:$0xff]   ;;  %v9555_v59 = vld [vmem:[%s10607_s6 + $0x8e4] ss:$16 sps:$4 sm:$0xff]  }
 0x325   : > { %v9547_v56 = vld [vmem:[%s10607_s6 + $0x8c0] ss:$16 sps:$4 sm:$0xff]   ;;  %v9558_v60 = vld [vmem:[%s10607_s6 + $0xae4] ss:$16 sps:$4 sm:$0xff]  }
 0x326   : > { %7415 = vmatpush1.bf16.msra.mxu0 %v9457_v12  ;;  %v4219_v12 = vmax.f32 %v9182_v30, 0.0  ;;  %v9556_v34 = vld [vmem:[%s10607_s6 + $0xae0] ss:$16 sps:$4 sm:$0xff]   ;;  %v9567_v30 = vld [vmem:[%s10607_s6 + $0x924] ss:$16 sps:$4 sm:$0xff]  }
 0x327   : > { %7456 = vmatpush1.bf16.msra.mxu1 %v9460_v13  ;;  %7416 = vmatprep.subr.bf16.mxu0 %v9465_v14  ;;  %v4221_v13 = vmax.f32 %v9184_v36, 0.0  ;;  %v11401_v14 = vpack.c.bf16 %v4214_v9, %v4214_v9  ;;  %v9559_v6 = vld [vmem:[%s10607_s6 + $0x900] ss:$16 sps:$4 sm:$0xff]   ;;  %v9570_v36 = vld [vmem:[%s10607_s6 + $0xb24] ss:$16 sps:$4 sm:$0xff]  }
 0x328   : > { %7457 = vmatprep.subr.bf16.mxu1 %v9468_v16  ;;  %v11404_v16 = vpack.c.bf16 %v4216_v11, %v4216_v11  ;;  %v9568_v9 = vld [vmem:[%s10607_s6 + $0xb20] ss:$16 sps:$4 sm:$0xff]  }
 0x329   : > { %v9571_v11 = vld [vmem:[%s10607_s6 + $0x940] ss:$16 sps:$4 sm:$0xff]  }
 0x32a   : > { %7417 = vmatpush1.bf16.msra.mxu0 %v9463_v18  ;;  %v9519_v18 = vld [vmem:[%s10607_s6 + $0x824] ss:$16 sps:$4 sm:$0xff]  }
 0x32b   : > { %7458 = vmatpush1.bf16.msra.mxu1 %v9466_v21  ;;  %7418 = vmatprep.subr.bf16.mxu0 %v9471_v43  ;;  %v11407_v21 = vpack.c.bf16 %v4219_v12, %v4219_v12  ;;  %v9522_v43 = vld [vmem:[%s10607_s6 + $0xa24] ss:$16 sps:$4 sm:$0xff]  }
 0x32c   : > { %7459 = vmatprep.subr.bf16.mxu1 %v9474_v22  ;;  %v11411_v22 = vpack.c.bf16 %v4221_v13, %v4221_v13  ;;  %v9579_v12 = vld [vmem:[%s10607_s6 + $0x964] ss:$16 sps:$4 sm:$0xff]  }
 0x32d   : > { %v9582_v13 = vld [vmem:[%s10607_s6 + $0xb64] ss:$16 sps:$4 sm:$0xff]  }
 0x32e   : > { %7419 = vmatpush1.bf16.msra.mxu0 %v9469_v25  ;;  %v9517_v25 = vld [vmem:[%s10607_s6 + $0x820] ss:$16 sps:$4 sm:$0xff]  }
 0x32f   : > { %7460 = vmatpush1.bf16.msra.mxu1 %v9472_v47  ;;  %7420 = vmatprep.subr.bf16.mxu0 %v9477_v26  ;;  %v9520_v47 = vld [vmem:[%s10607_s6 + $0xa20] ss:$16 sps:$4 sm:$0xff]   ;;  %v9525_v26 = vld [vmem:[%s10607_s6 + $0x844] ss:$16 sps:$4 sm:$0xff]  }
 0x330   : > { %7461 = vmatprep.subr.bf16.mxu1 %v9480_v27  ;;  %v9528_v27 = vld [vmem:[%s10607_s6 + $0xa44] ss:$16 sps:$4 sm:$0xff]  }
 0x332   : > { %7421 = vmatpush1.bf16.msra.mxu0 %v9475_v20  ;;  %v9523_v20 = vld [vmem:[%s10607_s6 + $0x840] ss:$16 sps:$4 sm:$0xff]  }
 0x333   : > { %7462 = vmatpush1.bf16.msra.mxu1 %v9478_v24  ;;  %7422 = vmatprep.subr.bf16.mxu0 %v9483_v31  ;;  %v9526_v24 = vld [vmem:[%s10607_s6 + $0xa40] ss:$16 sps:$4 sm:$0xff]   ;;  %v9531_v31 = vld [vmem:[%s10607_s6 + $0x864] ss:$16 sps:$4 sm:$0xff]  }
 0x334   : > { %7463 = vmatprep.subr.bf16.mxu1 %v9486_v37  ;;  %v9534_v37 = vld [vmem:[%s10607_s6 + $0xa64] ss:$16 sps:$4 sm:$0xff]  }
 0x336   : > { %7423 = vmatpush1.bf16.msra.mxu0 %v9481_v39  ;;  %v9529_v39 = vld [vmem:[%s10607_s6 + $0x860] ss:$16 sps:$4 sm:$0xff]  }
 0x337   : > { %7464 = vmatpush1.bf16.msra.mxu1 %v9484_v40  ;;  %7424 = vmatprep.subr.bf16.mxu0 %v9489_v41  ;;  %v9532_v40 = vld [vmem:[%s10607_s6 + $0xa60] ss:$16 sps:$4 sm:$0xff]   ;;  %v9537_v41 = vld [vmem:[%s10607_s6 + $0x884] ss:$16 sps:$4 sm:$0xff]  }
 0x338   : > { %7465 = vmatprep.subr.bf16.mxu1 %v9492_v42  ;;  %v9540_v42 = vld [vmem:[%s10607_s6 + $0xa84] ss:$16 sps:$4 sm:$0xff]  }
 0x33a   : > { %7425 = vmatpush1.bf16.msra.mxu0 %v9487_v44  ;;  %v9535_v44 = vld [vmem:[%s10607_s6 + $0x880] ss:$16 sps:$4 sm:$0xff]  }
 0x33b   : > { %7466 = vmatpush1.bf16.msra.mxu1 %v9490_v4  ;;  %7426 = vmatprep.subr.bf16.mxu0 %v9495_v46  ;;  %v9538_v4 = vld [vmem:[%s10607_s6 + $0xa80] ss:$16 sps:$4 sm:$0xff]   ;;  %v9543_v46 = vld [vmem:[%s10607_s6 + $0x8a4] ss:$16 sps:$4 sm:$0xff]  }
 0x33c   : > { %7467 = vmatprep.subr.bf16.mxu1 %v9498_v50  ;;  %v9546_v50 = vld [vmem:[%s10607_s6 + $0xaa4] ss:$16 sps:$4 sm:$0xff]  }
 0x33e   : > { %7427 = vmatpush1.bf16.msra.mxu0 %v9493_v23  ;;  %v9541_v23 = vld [vmem:[%s10607_s6 + $0x8a0] ss:$16 sps:$4 sm:$0xff]  }
 0x33f   : > { %7468 = vmatpush1.bf16.msra.mxu1 %v9496_v54  ;;  %7428 = vmatprep.subr.bf16.mxu0 %v9501_v55  ;;  %v9549_v54 = vld [vmem:[%s10607_s6 + $0x8c4] ss:$16 sps:$4 sm:$0xff]  }
 0x340   : > { %7469 = vmatprep.subr.bf16.mxu1 %v9504_v57  ;;  %v9552_v55 = vld [vmem:[%s10607_s6 + $0xac4] ss:$16 sps:$4 sm:$0xff]   ;;  %v9550_v57 = vld [vmem:[%s10607_s6 + $0xac0] ss:$16 sps:$4 sm:$0xff]  }
 0x342   : > { %7429 = vmatpush1.bf16.msra.mxu0 %v9499_v0  ;;  %v9553_v0 = vld [vmem:[%s10607_s6 + $0x8e0] ss:$16 sps:$4 sm:$0xff]  }
 0x343   : > { %7470 = vmatpush1.bf16.msra.mxu1 %v9502_v33  ;;  %7430 = vmatprep.subr.bf16.mxu0 %v9507_v5  ;;  %v9561_v33 = vld [vmem:[%s10607_s6 + $0x904] ss:$16 sps:$4 sm:$0xff]  }
 0x344   : > { %7471 = vmatprep.subr.bf16.mxu1 %v9510_v7  ;;  %v9564_v5 = vld [vmem:[%s10607_s6 + $0xb04] ss:$16 sps:$4 sm:$0xff]   ;;  %v9562_v7 = vld [vmem:[%s10607_s6 + $0xb00] ss:$16 sps:$4 sm:$0xff]  }
 0x346   : > { %7431 = vmatpush1.bf16.msra.mxu0 %v9505_v8  ;;  %v9565_v8 = vld [vmem:[%s10607_s6 + $0x920] ss:$16 sps:$4 sm:$0xff]  }
 0x347   : > { %7472 = vmatpush1.bf16.msra.mxu1 %v9508_v15  ;;  %7482 = vmatprep.subr.bf16.mxu0 %v9513_v10  ;;  %v9573_v15 = vld [vmem:[%s10607_s6 + $0x944] ss:$16 sps:$4 sm:$0xff]  }
 0x348   : > { %7523 = vmatprep.subr.bf16.mxu1 %v9516_v19  ;;  %v9576_v10 = vld [vmem:[%s10607_s6 + $0xb44] ss:$16 sps:$4 sm:$0xff]   ;;  %v9574_v19 = vld [vmem:[%s10607_s6 + $0xb40] ss:$16 sps:$4 sm:$0xff]  }
 0x349   : > { %7433 = vmatmul.mubr.bf16.vlgmr.msra.gmra.mrb[20].mxu0 %v11401_v14 }
 0x34a   : > { %7474 = vmatmul.mubr.bf16.vlgmr.msra.gmra.mrb[20].mxu1 %v11404_v16  ;;  %7483 = vmatpush1.bf16.msra.mxu0 %v9511_v2  ;;  %v9577_v2 = vld [vmem:[%s10607_s6 + $0x960] ss:$16 sps:$4 sm:$0xff]  }
 0x34b   : > { %7514 = vmatprep.mubr.bf16.mxu0 %v11407_v21  ;;  %7524 = vmatpush1.bf16.msra.mxu1 %v9514_v3  ;;  %v9580_v3 = vld [vmem:[%s10607_s6 + $0xb60] ss:$16 sps:$4 sm:$0xff]  }
 0x34c   : > { %7555 = vmatprep.mubr.bf16.mxu1 %v11411_v22  ;;  %7484 = vmatprep.subr.bf16.mxu0 %v9519_v18  ;;  %v9585_v18 = vld [vmem:[%s10607_s6 + $0x984] ss:$16 sps:$4 sm:$0xff]  }
 0x34d   : > { %7525 = vmatprep.subr.bf16.mxu1 %v9522_v43  ;;  %v9588_v43 = vld [vmem:[%s10607_s6 + $0xb84] ss:$16 sps:$4 sm:$0xff]  }
 0x34e   : > { %7485 = vmatpush1.bf16.msra.mxu0 %v9517_v25  ;;  %v9583_v25 = vld [vmem:[%s10607_s6 + $0x980] ss:$16 sps:$4 sm:$0xff]  }
 0x34f   : > { %7526 = vmatpush1.bf16.msra.mxu1 %v9520_v47  ;;  %7486 = vmatprep.subr.bf16.mxu0 %v9525_v26  ;;  %v9586_v47 = vld [vmem:[%s10607_s6 + $0xb80] ss:$16 sps:$4 sm:$0xff]   ;;  %v9591_v26 = vld [vmem:[%s10607_s6 + $0x9a4] ss:$16 sps:$4 sm:$0xff]  }
 0x350   : > { %7527 = vmatprep.subr.bf16.mxu1 %v9528_v27  ;;  %v9594_v27 = vld [vmem:[%s10607_s6 + $0xba4] ss:$16 sps:$4 sm:$0xff]  }
 0x352   : > { %7487 = vmatpush1.bf16.msra.mxu0 %v9523_v20  ;;  %v9589_v20 = vld [vmem:[%s10607_s6 + $0x9a0] ss:$16 sps:$4 sm:$0xff]  }
 0x353   : > { %7528 = vmatpush1.bf16.msra.mxu1 %v9526_v24  ;;  %7488 = vmatprep.subr.bf16.mxu0 %v9531_v31  ;;  %v949_v24 = vrot.slane %v11370_v52, %v916_v58  ;;  %v9592_v31 = vld [vmem:[%s10607_s6 + $0xba0] ss:$16 sps:$4 sm:$0xff]  }
 0x354   : > { %7529 = vmatprep.subr.bf16.mxu1 %v9534_v37  ;;  %v9597_v37 = vld [vmem:[%s10607_s6 + $0x9c4] ss:$16 sps:$4 sm:$0xff]   ;;  %v9598_v58 = vld [vmem:[%s10607_s6 + $0xbc0] ss:$16 sps:$4 sm:$0xff]  }
 0x356   : > { %7489 = vmatpush1.bf16.msra.mxu0 %v9529_v39  ;;  %v957_v39 = vrot.slane %v11370_v52, %v924_v35  ;;  %v9601_v35 = vld [vmem:[%s10607_s6 + $0x9e0] ss:$16 sps:$4 sm:$0xff]  }
 0x357   : > { %7530 = vmatpush1.bf16.msra.mxu1 %v9532_v40  ;;  %7490 = vmatprep.subr.bf16.mxu0 %v9537_v41  ;;  %v9600_v40 = vld [vmem:[%s10607_s6 + $0xbc4] ss:$16 sps:$4 sm:$0xff]   ;;  %v9595_v41 = vld [vmem:[%s10607_s6 + $0x9c0] ss:$16 sps:$4 sm:$0xff]  }
 0x358   : > { %7531 = vmatprep.subr.bf16.mxu1 %v9540_v42  ;;  %v9181_v42 = vadd.f32 %v11329_v48, %v949_v24  ;;  %v9609_v48 = vld [vmem:[%s10607_s6 + $0xc04] ss:$16 sps:$4 sm:$0xff]  }
 0x35a   : > { %7491 = vmatpush1.bf16.msra.mxu0 %v9535_v44  ;;  %v9603_v44 = vld [vmem:[%s10607_s6 + $0x9e4] ss:$16 sps:$4 sm:$0xff]  }
 0x35b   : > { %7532 = vmatpush1.bf16.msra.mxu1 %v9538_v4  ;;  %7492 = vmatprep.subr.bf16.mxu0 %v9543_v46  ;;  %v9183_v4 = vadd.f32 %v11332_v1, %v957_v39  ;;  %v9606_v46 = vld [vmem:[%s10607_s6 + $0xbe4] ss:$16 sps:$4 sm:$0xff]  }
 0x35c   : > { %7533 = vmatprep.subr.bf16.mxu1 %v9546_v50  ;;  %v4218_v50 = vmax.f32 %v9181_v42, 0.0  ;;  %v9651_v42 = vld [vmem:[%s10607_s6 + $0xce4] ss:$16 sps:$4 sm:$0xff]  }
 0x35e   : > { %7493 = vmatpush1.bf16.msra.mxu0 %v9541_v23  ;;  %v9604_v23 = vld [vmem:[%s10607_s6 + $0xbe0] ss:$16 sps:$4 sm:$0xff]   ;;  %v11485_v1 = vpack.c.bf16 %v4218_v50, %v4218_v50 }
 0x35f   : > { %7534 = vmatpush1.bf16.msra.mxu1 %v9544_v53  ;;  %7494 = vmatprep.subr.bf16.mxu0 %v9549_v54  ;;  %v4220_v53 = vmax.f32 %v9183_v4, 0.0  ;;  %v9612_v54 = vld [vmem:[%s10607_s6 + $0xe04] ss:$16 sps:$4 sm:$0xff]   ;;  %v9649_v50 = vld [vmem:[%s10607_s6 + $0xce0] ss:$16 sps:$4 sm:$0xff]  }
 0x360   : > { %7535 = vmatprep.subr.bf16.mxu1 %v9552_v55  ;;  %v9607_v55 = vld [vmem:[%s10607_s6 + $0xc00] ss:$16 sps:$4 sm:$0xff]   ;;  %v9654_v4 = vld [vmem:[%s10607_s6 + $0xee4] ss:$16 sps:$4 sm:$0xff]  }
 0x362   : > { %7495 = vmatpush1.bf16.msra.mxu0 %v9547_v56  ;;  %v9610_v56 = vld [vmem:[%s10607_s6 + $0xe00] ss:$16 sps:$4 sm:$0xff]  }
 0x363   : > { %7536 = vmatpush1.bf16.msra.mxu1 %v9550_v57  ;;  %7496 = vmatprep.subr.bf16.mxu0 %v9555_v59  ;;  %v9615_v57 = vld [vmem:[%s10607_s6 + $0xc24] ss:$16 sps:$4 sm:$0xff]   ;;  %v11489_v59 = vpack.c.bf16 %v4220_v53, %v4220_v53 }
 0x364   : > { %7537 = vmatprep.subr.bf16.mxu1 %v9558_v60  ;;  %v9618_v60 = vld [vmem:[%s10607_s6 + $0xe24] ss:$16 sps:$4 sm:$0xff]  }
 0x365   : > { %v9657_v53 = vld [vmem:[%s10607_s6 + $0xd04] ss:$16 sps:$4 sm:$0xff]  }
 0x366   : > { %7497 = vmatpush1.bf16.msra.mxu0 %v9553_v0  ;;  %v9613_v0 = vld [vmem:[%s10607_s6 + $0xc20] ss:$16 sps:$4 sm:$0xff]  }
 0x367   : > { %7538 = vmatpush1.bf16.msra.mxu1 %v9556_v34  ;;  %7498 = vmatprep.subr.bf16.mxu0 %v9561_v33  ;;  %v9616_v34 = vld [vmem:[%s10607_s6 + $0xe20] ss:$16 sps:$4 sm:$0xff]   ;;  %v9621_v33 = vld [vmem:[%s10607_s6 + $0xc44] ss:$16 sps:$4 sm:$0xff]  }
 0x368   : > { %7539 = vmatprep.subr.bf16.mxu1 %v9564_v5  ;;  %v9624_v5 = vld [vmem:[%s10607_s6 + $0xe44] ss:$16 sps:$4 sm:$0xff]  }
 0x36a   : > { %7499 = vmatpush1.bf16.msra.mxu0 %v9559_v6  ;;  %v9619_v6 = vld [vmem:[%s10607_s6 + $0xc40] ss:$16 sps:$4 sm:$0xff]  }
 0x36b   : > { %7540 = vmatpush1.bf16.msra.mxu1 %v9562_v7  ;;  %7500 = vmatprep.subr.bf16.mxu0 %v9567_v30  ;;  %v9622_v7 = vld [vmem:[%s10607_s6 + $0xe40] ss:$16 sps:$4 sm:$0xff]   ;;  %v9627_v30 = vld [vmem:[%s10607_s6 + $0xc64] ss:$16 sps:$4 sm:$0xff]  }
 0x36c   : > { %7541 = vmatprep.subr.bf16.mxu1 %v9570_v36  ;;  %v9630_v36 = vld [vmem:[%s10607_s6 + $0xe64] ss:$16 sps:$4 sm:$0xff]  }
 0x36e   : > { %7501 = vmatpush1.bf16.msra.mxu0 %v9565_v8  ;;  %v9625_v8 = vld [vmem:[%s10607_s6 + $0xc60] ss:$16 sps:$4 sm:$0xff]  }
 0x36f   : > { %7542 = vmatpush1.bf16.msra.mxu1 %v9568_v9  ;;  %7502 = vmatprep.subr.bf16.mxu0 %v9573_v15  ;;  %v9628_v9 = vld [vmem:[%s10607_s6 + $0xe60] ss:$16 sps:$4 sm:$0xff]   ;;  %v9633_v15 = vld [vmem:[%s10607_s6 + $0xc84] ss:$16 sps:$4 sm:$0xff]  }
 0x370   : > { %7543 = vmatprep.subr.bf16.mxu1 %v9576_v10  ;;  %v9636_v10 = vld [vmem:[%s10607_s6 + $0xe84] ss:$16 sps:$4 sm:$0xff]  }
 0x372   : > { %7503 = vmatpush1.bf16.msra.mxu0 %v9571_v11  ;;  %v9631_v11 = vld [vmem:[%s10607_s6 + $0xc80] ss:$16 sps:$4 sm:$0xff]  }
 0x373   : > { %7544 = vmatpush1.bf16.msra.mxu1 %v9574_v19  ;;  %7504 = vmatprep.subr.bf16.mxu0 %v9579_v12  ;;  %v9634_v19 = vld [vmem:[%s10607_s6 + $0xe80] ss:$16 sps:$4 sm:$0xff]   ;;  %v9639_v12 = vld [vmem:[%s10607_s6 + $0xca4] ss:$16 sps:$4 sm:$0xff]  }
 0x374   : > { %7545 = vmatprep.subr.bf16.mxu1 %v9582_v13  ;;  %v9642_v13 = vld [vmem:[%s10607_s6 + $0xea4] ss:$16 sps:$4 sm:$0xff]  }
 0x376   : > { %7505 = vmatpush1.bf16.msra.mxu0 %v9577_v2  ;;  %v969_v2 = vrot.slane %v11370_v52, %v936_v51 }
 0x377   : > { %7546 = vmatpush1.bf16.msra.mxu1 %v9580_v3  ;;  %7506 = vmatprep.subr.bf16.mxu0 %v9585_v18  ;;  %v9637_v3 = vld [vmem:[%s10607_s6 + $0xca0] ss:$16 sps:$4 sm:$0xff]   ;;  %v977_v18 = vrot.slane %v11370_v52, %v944_v62 }
 0x378   : > { %7547 = vmatprep.subr.bf16.mxu1 %v9588_v43  ;;  %v9640_v43 = vld [vmem:[%s10607_s6 + $0xea0] ss:$16 sps:$4 sm:$0xff]  }
 0x37a   : > { %7507 = vmatpush1.bf16.msra.mxu0 %v9583_v25  ;;  %v9645_v25 = vld [vmem:[%s10607_s6 + $0xcc4] ss:$16 sps:$4 sm:$0xff]  }
 0x37b   : > { %7548 = vmatpush1.bf16.msra.mxu1 %v9586_v47  ;;  %7508 = vmatprep.subr.bf16.mxu0 %v9591_v26  ;;  %v9648_v26 = vld [vmem:[%s10607_s6 + $0xec4] ss:$16 sps:$4 sm:$0xff]  }
 0x37c   : > { %7549 = vmatprep.subr.bf16.mxu1 %v9594_v27 }
 0x37e   : > { %7509 = vmatpush1.bf16.msra.mxu0 %v9589_v20 }
 0x37f   : > { %7550 = vmatpush1.bf16.msra.mxu1 %v9592_v31  ;;  %7510 = vmatprep.subr.bf16.mxu0 %v9597_v37  ;;  %v9643_v37 = vld [vmem:[%s10607_s6 + $0xcc0] ss:$16 sps:$4 sm:$0xff]  }
 0x380   : > { %7551 = vmatprep.subr.bf16.mxu1 %v9600_v40 }
 0x382   : > { %7511 = vmatpush1.bf16.msra.mxu0 %v9595_v41  ;;  %v9646_v41 = vld [vmem:[%s10607_s6 + $0xec0] ss:$16 sps:$4 sm:$0xff]  }
 0x383   : > { %7552 = vmatpush1.bf16.msra.mxu1 %v9598_v58  ;;  %7512 = vmatprep.subr.bf16.mxu0 %v9603_v44 }
 0x384   : > { %7553 = vmatprep.subr.bf16.mxu1 %v9606_v46 }
 0x386   : > { %7513 = vmatpush1.bf16.msra.mxu0 %v9601_v35 }
 0x387   : > { %7554 = vmatpush1.bf16.msra.mxu1 %v9604_v23  ;;  %7564 = vmatprep.subr.bf16.mxu0 %v9609_v48  ;;  %v9652_v48 = vld [vmem:[%s10607_s6 + $0xee0] ss:$16 sps:$4 sm:$0xff]  }
 0x388   : > { %7605 = vmatprep.subr.bf16.mxu1 %v9612_v54  ;;  %v9660_v54 = vld [vmem:[%s10607_s6 + $0xf04] ss:$16 sps:$4 sm:$0xff]  }
 0x389   : > { %7515 = vmatmul.mubr.bf16.vlgmr.msra.gmra.mrb[24].mxu0 %v11485_v1 }
 0x38a   : > { %7556 = vmatmul.mubr.bf16.vlgmr.msra.gmra.mrb[24].mxu1 %v11489_v59  ;;  %7565 = vmatpush1.bf16.msra.mxu0 %v9607_v55  ;;  %v9655_v55 = vld [vmem:[%s10607_s6 + $0xd00] ss:$16 sps:$4 sm:$0xff]  }
 0x38b   : > { %7606 = vmatpush1.bf16.msra.mxu1 %v9610_v56  ;;  %7566 = vmatprep.subr.bf16.mxu0 %v9615_v57  ;;  %v9658_v56 = vld [vmem:[%s10607_s6 + $0xf00] ss:$16 sps:$4 sm:$0xff]   ;;  %v9663_v57 = vld [vmem:[%s10607_s6 + $0xd24] ss:$16 sps:$4 sm:$0xff]  }
 0x38c   : > { %7607 = vmatprep.subr.bf16.mxu1 %v9618_v60  ;;  %v9666_v60 = vld [vmem:[%s10607_s6 + $0xf24] ss:$16 sps:$4 sm:$0xff]  }
 0x38e   : > { %7567 = vmatpush1.bf16.msra.mxu0 %v9613_v0  ;;  %v9661_v0 = vld [vmem:[%s10607_s6 + $0xd20] ss:$16 sps:$4 sm:$0xff]  }
 0x38f   : > { %7608 = vmatpush1.bf16.msra.mxu1 %v9616_v34  ;;  %7568 = vmatprep.subr.bf16.mxu0 %v9621_v33  ;;  %v9664_v34 = vld [vmem:[%s10607_s6 + $0xf20] ss:$16 sps:$4 sm:$0xff]   ;;  %v9669_v33 = vld [vmem:[%s10607_s6 + $0xd44] ss:$16 sps:$4 sm:$0xff]  }
 0x390   : > { %7609 = vmatprep.subr.bf16.mxu1 %v9624_v5  ;;  %v9672_v5 = vld [vmem:[%s10607_s6 + $0xf44] ss:$16 sps:$4 sm:$0xff]  }
 0x392   : > { %7569 = vmatpush1.bf16.msra.mxu0 %v9619_v6  ;;  %v9667_v6 = vld [vmem:[%s10607_s6 + $0xd40] ss:$16 sps:$4 sm:$0xff]  }
 0x393   : > { %7610 = vmatpush1.bf16.msra.mxu1 %v9622_v7  ;;  %7570 = vmatprep.subr.bf16.mxu0 %v9627_v30  ;;  %v9670_v7 = vld [vmem:[%s10607_s6 + $0xf40] ss:$16 sps:$4 sm:$0xff]   ;;  %v9675_v30 = vld [vmem:[%s10607_s6 + $0xd64] ss:$16 sps:$4 sm:$0xff]  }
 0x394   : > { %7611 = vmatprep.subr.bf16.mxu1 %v9630_v36  ;;  %v9678_v36 = vld [vmem:[%s10607_s6 + $0xf64] ss:$16 sps:$4 sm:$0xff]  }
 0x396   : > { %7571 = vmatpush1.bf16.msra.mxu0 %v9625_v8  ;;  %v9673_v8 = vld [vmem:[%s10607_s6 + $0xd60] ss:$16 sps:$4 sm:$0xff]  }
 0x397   : > { %7612 = vmatpush1.bf16.msra.mxu1 %v9628_v9  ;;  %7572 = vmatprep.subr.bf16.mxu0 %v9633_v15  ;;  %v9676_v9 = vld [vmem:[%s10607_s6 + $0xf60] ss:$16 sps:$4 sm:$0xff]   ;;  %v9681_v15 = vld [vmem:[%s10607_s6 + $0xd84] ss:$16 sps:$4 sm:$0xff]  }
 0x398   : > { %7613 = vmatprep.subr.bf16.mxu1 %v9636_v10  ;;  %v9684_v10 = vld [vmem:[%s10607_s6 + $0xf84] ss:$16 sps:$4 sm:$0xff]  }
 0x39a   : > { %7573 = vmatpush1.bf16.msra.mxu0 %v9631_v11  ;;  %v9679_v11 = vld [vmem:[%s10607_s6 + $0xd80] ss:$16 sps:$4 sm:$0xff]  }
 0x39b   : > { %7614 = vmatpush1.bf16.msra.mxu1 %v9634_v19  ;;  %7574 = vmatprep.subr.bf16.mxu0 %v9639_v12  ;;  %v9682_v19 = vld [vmem:[%s10607_s6 + $0xf80] ss:$16 sps:$4 sm:$0xff]   ;;  %v9687_v12 = vld [vmem:[%s10607_s6 + $0xda4] ss:$16 sps:$4 sm:$0xff]  }
 0x39c   : > { %v11519_v47 = vpop.f32.mrb[12].mxu0  ;;  %7615 = vmatprep.subr.bf16.mxu1 %v9642_v13  ;;  %v11522_v27 = vpop.f32.mrb[12].mxu1  ;;  %v9690_v13 = vld [vmem:[%s10607_s6 + $0xfa4] ss:$16 sps:$4 sm:$0xff]  }
 0x39d   : > { %v4123_v20 = vpop.f32.mrb[13].mxu0  ;;  %v4205_v24 = vpop.f32.mrb[13].mxu1 }
 0x39e   : > { %v9186_v51 = vadd.f32 %v4123_v20, %v969_v2  ;;  %v4125_v31 = vpop.f32.mrb[14].mxu0  ;;  %7575 = vmatpush1.bf16.msra.mxu0 %v9637_v3  ;;  %v9188_v62 = vadd.f32 %v4205_v24, %v977_v18  ;;  %v4207_v39 = vpop.f32.mrb[14].mxu1  ;;  %v9685_v2 = vld [vmem:[%s10607_s6 + $0xda0] ss:$16 sps:$4 sm:$0xff]   ;;  %v965_v3 = vrot.slane %v11370_v52, %v932_v45  ;;  %v9699_v24 = vld [vmem:[%s10607_s6 + $0xde4] ss:$16 sps:$4 sm:$0xff]  }
 0x39f   : > { %7616 = vmatpush1.bf16.msra.mxu1 %v9640_v43  ;;  %v4126_v40 = vpop.f32.mrb[15].mxu0  ;;  %7576 = vmatprep.subr.bf16.mxu0 %v9645_v25  ;;  %v4208_v44 = vpop.f32.mrb[15].mxu1  ;;  %v9688_v18 = vld [vmem:[%s10607_s6 + $0xfa0] ss:$16 sps:$4 sm:$0xff]   ;;  %v9693_v43 = vld [vmem:[%s10607_s6 + $0xdc4] ss:$16 sps:$4 sm:$0xff]   ;;  %v973_v25 = vrot.slane %v11370_v52, %v940_v49 }
 0x3a0   : > { %v4223_v58 = vmax.f32 %v9186_v51, 0.0  ;;  %7617 = vmatprep.subr.bf16.mxu1 %v9648_v26  ;;  %v4225_v46 = vmax.f32 %v9188_v62, 0.0  ;;  %v9696_v26 = vld [vmem:[%s10607_s6 + $0xfc4] ss:$16 sps:$4 sm:$0xff]   ;;  %v9691_v20 = vld [vmem:[%s10607_s6 + $0xdc0] ss:$16 sps:$4 sm:$0xff]   ;;  %v9185_v51 = vadd.f32 %v11519_v47, %v965_v3 }
 0x3a1   : > { %v9694_v45 = vld [vmem:[%s10607_s6 + $0xfc0] ss:$16 sps:$4 sm:$0xff]   ;;  %v9187_v31 = vadd.f32 %v11522_v27, %v973_v25  ;;  %v9705_v47 = vld [vmem:[%s10607_s6 + $0xc] ss:$16 sps:$4 sm:$0xff]   ;;  %v9703_v40 = vld [vmem:[%s10607_s6 + $0x8] ss:$16 sps:$4 sm:$0xff]  }
 0x3a2   : > { %v11528_v35 = vpack.c.bf16 %v4223_v58, %v4223_v58  ;;  %7577 = vmatpush1.bf16.msra.mxu0 %v9643_v37  ;;  %v11531_v23 = vpack.c.bf16 %v4225_v46, %v4225_v46  ;;  %v9697_v49 = vld [vmem:[%s10607_s6 + $0xde0] ss:$16 sps:$4 sm:$0xff]   ;;  %v4222_v52 = vmax.f32 %v9185_v51, 0.0  ;;  %v9708_v39 = vld [vmem:[%s10607_s6 + $0x20c] ss:$16 sps:$4 sm:$0xff]  }
 0x3a3   : > { %7618 = vmatpush1.bf16.msra.mxu1 %v9646_v41  ;;  %7578 = vmatprep.subr.bf16.mxu0 %v9651_v42  ;;  %v9700_v37 = vld [vmem:[%s10607_s6 + $0xfe0] ss:$16 sps:$4 sm:$0xff]   ;;  %v4224_v62 = vmax.f32 %v9187_v31, 0.0  ;;  %v9706_v41 = vld [vmem:[%s10607_s6 + $0x208] ss:$16 sps:$4 sm:$0xff]  }
 0x3a4   : > { %7596 = vmatprep.mubr.bf16.mxu0 %v11528_v35  ;;  %7619 = vmatprep.subr.bf16.mxu1 %v9654_v4  ;;  %v11579_v27 = vpack.c.bf16 %v4222_v52, %v4222_v52  ;;  %v9711_v58 = vld [vmem:[%s10607_s6 + $0x2c] ss:$16 sps:$4 sm:$0xff]   ;;  %v9709_v4 = vld [vmem:[%s10607_s6 + $0x28] ss:$16 sps:$4 sm:$0xff]  }
 0x3a5   : > { %7637 = vmatprep.mubr.bf16.mxu1 %v11531_v23  ;;  %v11582_v42 = vpack.c.bf16 %v4224_v62, %v4224_v62  ;;  %v9714_v44 = vld [vmem:[%s10607_s6 + $0x22c] ss:$16 sps:$4 sm:$0xff]   ;;  %v9712_v46 = vld [vmem:[%s10607_s6 + $0x228] ss:$16 sps:$4 sm:$0xff]  }
 0x3a6   : > { %7579 = vmatpush1.bf16.msra.mxu0 %v9649_v50  ;;  %v9717_v50 = vld [vmem:[%s10607_s6 + $0x4c] ss:$16 sps:$4 sm:$0xff]   ;;  %v9748_v51 = vld [vmem:[%s10607_s6 + $0x2e8] ss:$16 sps:$4 sm:$0xff]  }
 0x3a7   : > { %7620 = vmatpush1.bf16.msra.mxu1 %v9652_v48  ;;  %7580 = vmatprep.subr.bf16.mxu0 %v9657_v53  ;;  %v9720_v48 = vld [vmem:[%s10607_s6 + $0x24c] ss:$16 sps:$4 sm:$0xff]   ;;  %v9715_v53 = vld [vmem:[%s10607_s6 + $0x48] ss:$16 sps:$4 sm:$0xff]  }
 0x3a8   : > { %7621 = vmatprep.subr.bf16.mxu1 %v9660_v54  ;;  %v9718_v54 = vld [vmem:[%s10607_s6 + $0x248] ss:$16 sps:$4 sm:$0xff]   ;;  %v9762_v52 = vld [vmem:[%s10607_s6 + $0x32c] ss:$16 sps:$4 sm:$0xff]  }
 0x3a9   : > { %v9751_v31 = vld [vmem:[%s10607_s6 + $0x108] ss:$16 sps:$4 sm:$0xff]   ;;  %v9765_v62 = vld [vmem:[%s10607_s6 + $0x14c] ss:$16 sps:$4 sm:$0xff]  }
 0x3aa   : > { %7581 = vmatpush1.bf16.msra.mxu0 %v9655_v55  ;;  %v9726_v55 = vld [vmem:[%s10607_s6 + $0x26c] ss:$16 sps:$4 sm:$0xff]  }
 0x3ab   : > { %7622 = vmatpush1.bf16.msra.mxu1 %v9658_v56  ;;  %7582 = vmatprep.subr.bf16.mxu0 %v9663_v57  ;;  %v9724_v56 = vld [vmem:[%s10607_s6 + $0x268] ss:$16 sps:$4 sm:$0xff]   ;;  %v9729_v57 = vld [vmem:[%s10607_s6 + $0x8c] ss:$16 sps:$4 sm:$0xff]  }
 0x3ac   : > { %7623 = vmatprep.subr.bf16.mxu1 %v9666_v60  ;;  %v9732_v60 = vld [vmem:[%s10607_s6 + $0x28c] ss:$16 sps:$4 sm:$0xff]  }
 0x3ae   : > { %7583 = vmatpush1.bf16.msra.mxu0 %v9661_v0  ;;  %v9727_v0 = vld [vmem:[%s10607_s6 + $0x88] ss:$16 sps:$4 sm:$0xff]  }
 0x3af   : > { %7624 = vmatpush1.bf16.msra.mxu1 %v9664_v34  ;;  %7584 = vmatprep.subr.bf16.mxu0 %v9669_v33  ;;  %v9730_v34 = vld [vmem:[%s10607_s6 + $0x288] ss:$16 sps:$4 sm:$0xff]   ;;  %v9735_v33 = vld [vmem:[%s10607_s6 + $0xac] ss:$16 sps:$4 sm:$0xff]  }
 0x3b0   : > { %7625 = vmatprep.subr.bf16.mxu1 %v9672_v5  ;;  %v9738_v5 = vld [vmem:[%s10607_s6 + $0x2ac] ss:$16 sps:$4 sm:$0xff]  }
 0x3b2   : > { %7585 = vmatpush1.bf16.msra.mxu0 %v9667_v6  ;;  %v9733_v6 = vld [vmem:[%s10607_s6 + $0xa8] ss:$16 sps:$4 sm:$0xff]  }
 0x3b3   : > { %7626 = vmatpush1.bf16.msra.mxu1 %v9670_v7  ;;  %7586 = vmatprep.subr.bf16.mxu0 %v9675_v30  ;;  %v9736_v7 = vld [vmem:[%s10607_s6 + $0x2a8] ss:$16 sps:$4 sm:$0xff]   ;;  %v9741_v30 = vld [vmem:[%s10607_s6 + $0xcc] ss:$16 sps:$4 sm:$0xff]  }
 0x3b4   : > { %7627 = vmatprep.subr.bf16.mxu1 %v9678_v36 }
 0x3b6   : > { %7587 = vmatpush1.bf16.msra.mxu0 %v9673_v8  ;;  %v9744_v8 = vld [vmem:[%s10607_s6 + $0x2cc] ss:$16 sps:$4 sm:$0xff]  }
 0x3b7   : > { %7628 = vmatpush1.bf16.msra.mxu1 %v9676_v9  ;;  %7588 = vmatprep.subr.bf16.mxu0 %v9681_v15 }
 0x3b8   : > { %7629 = vmatprep.subr.bf16.mxu1 %v9684_v10 }
 0x3ba   : > { %7589 = vmatpush1.bf16.msra.mxu0 %v9679_v11 }
 0x3bb   : > { %7630 = vmatpush1.bf16.msra.mxu1 %v9682_v19  ;;  %7590 = vmatprep.subr.bf16.mxu0 %v9687_v12  ;;  %v9739_v12 = vld [vmem:[%s10607_s6 + $0xc8] ss:$16 sps:$4 sm:$0xff]  }
 0x3bc   : > { %7631 = vmatprep.subr.bf16.mxu1 %v9690_v13 }
 0x3be   : > { %7591 = vmatpush1.bf16.msra.mxu0 %v9685_v2 }
 0x3bf   : > { %7632 = vmatpush1.bf16.msra.mxu1 %v9688_v18  ;;  %7592 = vmatprep.subr.bf16.mxu0 %v9693_v43  ;;  %v9742_v18 = vld [vmem:[%s10607_s6 + $0x2c8] ss:$16 sps:$4 sm:$0xff]   ;;  %v9747_v43 = vld [vmem:[%s10607_s6 + $0xec] ss:$16 sps:$4 sm:$0xff]  }
 0x3c0   : > { %7633 = vmatprep.subr.bf16.mxu1 %v9696_v26  ;;  %v9750_v26 = vld [vmem:[%s10607_s6 + $0x2ec] ss:$16 sps:$4 sm:$0xff]  }
 0x3c2   : > { %7593 = vmatpush1.bf16.msra.mxu0 %v9691_v20  ;;  %v9745_v20 = vld [vmem:[%s10607_s6 + $0xe8] ss:$16 sps:$4 sm:$0xff]  }
 0x3c3   : > { %7634 = vmatpush1.bf16.msra.mxu1 %v9694_v45  ;;  %7594 = vmatprep.subr.bf16.mxu0 %v9699_v24  ;;  %v9753_v45 = vld [vmem:[%s10607_s6 + $0x10c] ss:$16 sps:$4 sm:$0xff]  }
 0x3c4   : > { %7635 = vmatprep.subr.bf16.mxu1 %v9702_v17  ;;  %v9756_v24 = vld [vmem:[%s10607_s6 + $0x30c] ss:$16 sps:$4 sm:$0xff]   ;;  %v9754_v17 = vld [vmem:[%s10607_s6 + $0x308] ss:$16 sps:$4 sm:$0xff]  }
 0x3c6   : > { %7595 = vmatpush1.bf16.msra.mxu0 %v9697_v49  ;;  %v9759_v49 = vld [vmem:[%s10607_s6 + $0x12c] ss:$16 sps:$4 sm:$0xff]  }
 0x3c7   : > { %7636 = vmatpush1.bf16.msra.mxu1 %v9700_v37  ;;  %7646 = vmatprep.subr.bf16.mxu0 %v9705_v47  ;;  %v9757_v37 = vld [vmem:[%s10607_s6 + $0x128] ss:$16 sps:$4 sm:$0xff]  }
 0x3c8   : > { %7687 = vmatprep.subr.bf16.mxu1 %v9708_v39  ;;  %v9760_v47 = vld [vmem:[%s10607_s6 + $0x328] ss:$16 sps:$4 sm:$0xff]   ;;  %v9768_v39 = vld [vmem:[%s10607_s6 + $0x34c] ss:$16 sps:$4 sm:$0xff]  }
 0x3c9   : > { %7597 = vmatmul.mubr.bf16.vlgmr.msra.gmra.mrb[28].mxu0 %v11579_v27 }
 0x3ca   : > { %7638 = vmatmul.mubr.bf16.vlgmr.msra.gmra.mrb[28].mxu1 %v11582_v42  ;;  %7647 = vmatpush1.bf16.msra.mxu0 %v9703_v40  ;;  %v9763_v40 = vld [vmem:[%s10607_s6 + $0x148] ss:$16 sps:$4 sm:$0xff]  }
 0x3cb   : > { %7678 = vmatprep.mubr.bf16.mxu0 %v11205_v61  ;;  %7688 = vmatpush1.bf16.msra.mxu1 %v9706_v41  ;;  %v9723_v61 = vld [vmem:[%s10607_s6 + $0x6c] ss:$16 sps:$4 sm:$0xff]   ;;  %v9766_v41 = vld [vmem:[%s10607_s6 + $0x348] ss:$16 sps:$4 sm:$0xff]  }
 0x3cc   : > { %7719 = vmatprep.mubr.bf16.mxu1 %v11209_v63  ;;  %7648 = vmatprep.subr.bf16.mxu0 %v9711_v58  ;;  %v9721_v63 = vld [vmem:[%s10607_s6 + $0x68] ss:$16 sps:$4 sm:$0xff]   ;;  %v9771_v58 = vld [vmem:[%s10607_s6 + $0x16c] ss:$16 sps:$4 sm:$0xff]  }
 0x3cd   : > { %7689 = vmatprep.subr.bf16.mxu1 %v9714_v44  ;;  %v9774_v44 = vld [vmem:[%s10607_s6 + $0x36c] ss:$16 sps:$4 sm:$0xff]  }
 0x3ce   : > { %7649 = vmatpush1.bf16.msra.mxu0 %v9709_v4  ;;  %v9769_v4 = vld [vmem:[%s10607_s6 + $0x168] ss:$16 sps:$4 sm:$0xff]  }
 0x3cf   : > { %7690 = vmatpush1.bf16.msra.mxu1 %v9712_v46  ;;  %7650 = vmatprep.subr.bf16.mxu0 %v9717_v50  ;;  %v9772_v46 = vld [vmem:[%s10607_s6 + $0x368] ss:$16 sps:$4 sm:$0xff]   ;;  %v9777_v50 = vld [vmem:[%s10607_s6 + $0x18c] ss:$16 sps:$4 sm:$0xff]  }
 0x3d0   : > { %7691 = vmatprep.subr.bf16.mxu1 %v9720_v48  ;;  %v9780_v48 = vld [vmem:[%s10607_s6 + $0x38c] ss:$16 sps:$4 sm:$0xff]  }
 0x3d2   : > { %7651 = vmatpush1.bf16.msra.mxu0 %v9715_v53  ;;  %v9775_v53 = vld [vmem:[%s10607_s6 + $0x188] ss:$16 sps:$4 sm:$0xff]  }
 0x3d3   : > { %7692 = vmatpush1.bf16.msra.mxu1 %v9718_v54  ;;  %7652 = vmatprep.subr.bf16.mxu0 %v9723_v61  ;;  %v9778_v54 = vld [vmem:[%s10607_s6 + $0x388] ss:$16 sps:$4 sm:$0xff]   ;;  %v9783_v61 = vld [vmem:[%s10607_s6 + $0x1ac] ss:$16 sps:$4 sm:$0xff]  }
 0x3d4   : > { %7693 = vmatprep.subr.bf16.mxu1 %v9726_v55  ;;  %v9786_v55 = vld [vmem:[%s10607_s6 + $0x3ac] ss:$16 sps:$4 sm:$0xff]  }
 0x3d6   : > { %7653 = vmatpush1.bf16.msra.mxu0 %v9721_v63  ;;  %v9781_v63 = vld [vmem:[%s10607_s6 + $0x1a8] ss:$16 sps:$4 sm:$0xff]  }
 0x3d7   : > { %7694 = vmatpush1.bf16.msra.mxu1 %v9724_v56  ;;  %7654 = vmatprep.subr.bf16.mxu0 %v9729_v57  ;;  %v9784_v56 = vld [vmem:[%s10607_s6 + $0x3a8] ss:$16 sps:$4 sm:$0xff]   ;;  %v9789_v57 = vld [vmem:[%s10607_s6 + $0x1cc] ss:$16 sps:$4 sm:$0xff]  }
 0x3d8   : > { %7695 = vmatprep.subr.bf16.mxu1 %v9732_v60  ;;  %v9792_v60 = vld [vmem:[%s10607_s6 + $0x3cc] ss:$16 sps:$4 sm:$0xff]  }
 0x3da   : > { %7655 = vmatpush1.bf16.msra.mxu0 %v9727_v0  ;;  %v9787_v0 = vld [vmem:[%s10607_s6 + $0x1c8] ss:$16 sps:$4 sm:$0xff]  }
 0x3db   : > { %7696 = vmatpush1.bf16.msra.mxu1 %v9730_v34  ;;  %7656 = vmatprep.subr.bf16.mxu0 %v9735_v33  ;;  %v9790_v34 = vld [vmem:[%s10607_s6 + $0x3c8] ss:$16 sps:$4 sm:$0xff]   ;;  %v9795_v33 = vld [vmem:[%s10607_s6 + $0x1ec] ss:$16 sps:$4 sm:$0xff]  }
 0x3dc   : > { %v7352_v36 = vpop.f32.mrb[16].mxu0  ;;  %7697 = vmatprep.subr.bf16.mxu1 %v9738_v5  ;;  %v9798_v5 = vld [vmem:[%s10607_s6 + $0x3ec] ss:$16 sps:$4 sm:$0xff]  }
 0x3dd   : > { %v7393_v9 = vpop.f32.mrb[16].mxu1  ;;  %v7354_v15 = vpop.f32.mrb[17].mxu0 }
 0x3de   : > { %v11610_v10 = vadd.f32 %v7393_v9, %v7352_v36  ;;  %v7395_v11 = vpop.f32.mrb[17].mxu1  ;;  %v7356_v19 = vpop.f32.mrb[18].mxu0  ;;  %7657 = vmatpush1.bf16.msra.mxu0 %v9733_v6  ;;  %v9793_v6 = vld [vmem:[%s10607_s6 + $0x1e8] ss:$16 sps:$4 sm:$0xff]   ;;  %v9804_v36 = vld [vmem:[%s10607_s6 + $0x60c] ss:$16 sps:$4 sm:$0xff]  }
 0x3df   : > { %v11613_v13 = vadd.f32 %v7395_v11, %v7354_v15  ;;  %v7397_v2 = vpop.f32.mrb[18].mxu1  ;;  %7698 = vmatpush1.bf16.msra.mxu1 %v9736_v7  ;;  %v7357_v3 = vpop.f32.mrb[19].mxu0  ;;  %7658 = vmatprep.subr.bf16.mxu0 %v9741_v30  ;;  %v9796_v7 = vld [vmem:[%s10607_s6 + $0x3e8] ss:$16 sps:$4 sm:$0xff]   ;;  %v9801_v30 = vld [vmem:[%s10607_s6 + $0x40c] ss:$16 sps:$4 sm:$0xff]  }
 0x3e0   : > { %v7398_v25 = vpop.f32.mrb[19].mxu1  ;;  %7699 = vmatprep.subr.bf16.mxu1 %v9744_v8  ;;  %v9799_v8 = vld [vmem:[%s10607_s6 + $0x408] ss:$16 sps:$4 sm:$0xff]   ;;  %v9807_v15 = vld [vmem:[%s10607_s6 + $0x42c] ss:$16 sps:$4 sm:$0xff]  }
 0x3e1   : > { %v9802_v9 = vld [vmem:[%s10607_s6 + $0x608] ss:$16 sps:$4 sm:$0xff]   ;;  %v9810_v11 = vld [vmem:[%s10607_s6 + $0x62c] ss:$16 sps:$4 sm:$0xff]  }
 0x3e2   : > { %7659 = vmatpush1.bf16.msra.mxu0 %v9739_v12  ;;  %v9805_v19 = vld [vmem:[%s10607_s6 + $0x428] ss:$16 sps:$4 sm:$0xff]   ;;  %v9813_v2 = vld [vmem:[%s10607_s6 + $0x44c] ss:$16 sps:$4 sm:$0xff]  }
 0x3e3   : > { %7700 = vmatpush1.bf16.msra.mxu1 %v9742_v18  ;;  %7660 = vmatprep.subr.bf16.mxu0 %v9747_v43  ;;  %v9808_v12 = vld [vmem:[%s10607_s6 + $0x628] ss:$16 sps:$4 sm:$0xff]   ;;  %v9822_v18 = vld [vmem:[%s10607_s6 + $0x66c] ss:$16 sps:$4 sm:$0xff]  }
 0x3e4   : > { %7701 = vmatprep.subr.bf16.mxu1 %v9750_v26  ;;  %v9814_v3 = vld [vmem:[%s10607_s6 + $0x648] ss:$16 sps:$4 sm:$0xff]   ;;  %v9825_v25 = vld [vmem:[%s10607_s6 + $0x48c] ss:$16 sps:$4 sm:$0xff]  }
 0x3e5   : > { %v9820_v43 = vld [vmem:[%s10607_s6 + $0x668] ss:$16 sps:$4 sm:$0xff]   ;;  %v9828_v26 = vld [vmem:[%s10607_s6 + $0x68c] ss:$16 sps:$4 sm:$0xff]  }
 0x3e6   : > { %7661 = vmatpush1.bf16.msra.mxu0 %v9745_v20  ;;  %v9823_v20 = vld [vmem:[%s10607_s6 + $0x488] ss:$16 sps:$4 sm:$0xff]  }
 0x3e7   : > { %7702 = vmatpush1.bf16.msra.mxu1 %v9748_v51  ;;  %7662 = vmatprep.subr.bf16.mxu0 %v9753_v45  ;;  %v9826_v51 = vld [vmem:[%s10607_s6 + $0x688] ss:$16 sps:$4 sm:$0xff]   ;;  %v9831_v45 = vld [vmem:[%s10607_s6 + $0x4ac] ss:$16 sps:$4 sm:$0xff]  }
 0x3e8   : > { %7703 = vmatprep.subr.bf16.mxu1 %v9756_v24  ;;  %v9834_v24 = vld [vmem:[%s10607_s6 + $0x6ac] ss:$16 sps:$4 sm:$0xff]  }
 0x3ea   : > { %7663 = vmatpush1.bf16.msra.mxu0 %v9751_v31  ;;  %v9829_v31 = vld [vmem:[%s10607_s6 + $0x4a8] ss:$16 sps:$4 sm:$0xff]  }
 0x3eb   : > { %7704 = vmatpush1.bf16.msra.mxu1 %v9754_v17  ;;  %7664 = vmatprep.subr.bf16.mxu0 %v9759_v49  ;;  %v9832_v17 = vld [vmem:[%s10607_s6 + $0x6a8] ss:$16 sps:$4 sm:$0xff]   ;;  %v9837_v49 = vld [vmem:[%s10607_s6 + $0x4cc] ss:$16 sps:$4 sm:$0xff]  }
 0x3ec   : > { %7705 = vmatprep.subr.bf16.mxu1 %v9762_v52 }
 0x3ee   : > { %7665 = vmatpush1.bf16.msra.mxu0 %v9757_v37  ;;  %v9840_v37 = vld [vmem:[%s10607_s6 + $0x6cc] ss:$16 sps:$4 sm:$0xff]  }
 0x3ef   : > { %7706 = vmatpush1.bf16.msra.mxu1 %v9760_v47  ;;  %7666 = vmatprep.subr.bf16.mxu0 %v9765_v62 }
 0x3f0   : > { %7707 = vmatprep.subr.bf16.mxu1 %v9768_v39 }
 0x3f2   : > { %7667 = vmatpush1.bf16.msra.mxu0 %v9763_v40 }
 0x3f3   : > { %7708 = vmatpush1.bf16.msra.mxu1 %v9766_v41  ;;  %7668 = vmatprep.subr.bf16.mxu0 %v9771_v58 }
 0x3f4   : > { %7709 = vmatprep.subr.bf16.mxu1 %v9774_v44  ;;  %v9835_v44 = vld [vmem:[%s10607_s6 + $0x4c8] ss:$16 sps:$4 sm:$0xff]  }
 0x3f6   : > { %7669 = vmatpush1.bf16.msra.mxu0 %v9769_v4 }
 0x3f7   : > { %7710 = vmatpush1.bf16.msra.mxu1 %v9772_v46  ;;  %7670 = vmatprep.subr.bf16.mxu0 %v9777_v50 }
 0x3f8   : > { %7711 = vmatprep.subr.bf16.mxu1 %v9780_v48  ;;  %v9843_v48 = vld [vmem:[%s10607_s6 + $0x4ec] ss:$16 sps:$4 sm:$0xff]  }
 0x3fa   : > { %7671 = vmatpush1.bf16.msra.mxu0 %v9775_v53 }
 0x3fb   : > { %7712 = vmatpush1.bf16.msra.mxu1 %v9778_v54  ;;  %7672 = vmatprep.subr.bf16.mxu0 %v9783_v61  ;;  %v9846_v54 = vld [vmem:[%s10607_s6 + $0x6ec] ss:$16 sps:$4 sm:$0xff]   ;;  %v9841_v61 = vld [vmem:[%s10607_s6 + $0x4e8] ss:$16 sps:$4 sm:$0xff]  }
 0x3fc   : > { %7713 = vmatprep.subr.bf16.mxu1 %v9786_v55  ;;  %v9844_v55 = vld [vmem:[%s10607_s6 + $0x6e8] ss:$16 sps:$4 sm:$0xff]  }
 0x3fe   : > { %7673 = vmatpush1.bf16.msra.mxu0 %v9781_v63  ;;  %v9849_v63 = vld [vmem:[%s10607_s6 + $0x50c] ss:$16 sps:$4 sm:$0xff]  }
 0x3ff   : > { %7714 = vmatpush1.bf16.msra.mxu1 %v9784_v56  ;;  %7674 = vmatprep.subr.bf16.mxu0 %v9789_v57  ;;  %v9852_v56 = vld [vmem:[%s10607_s6 + $0x70c] ss:$16 sps:$4 sm:$0xff]   ;;  %v9847_v57 = vld [vmem:[%s10607_s6 + $0x508] ss:$16 sps:$4 sm:$0xff]  }
 0x400   : > { %7715 = vmatprep.subr.bf16.mxu1 %v9792_v60  ;;  %v9850_v60 = vld [vmem:[%s10607_s6 + $0x708] ss:$16 sps:$4 sm:$0xff]  }
 0x402   : > { %7675 = vmatpush1.bf16.msra.mxu0 %v9787_v0  ;;  %v9855_v0 = vld [vmem:[%s10607_s6 + $0x52c] ss:$16 sps:$4 sm:$0xff]  }
 0x403   : > { %7716 = vmatpush1.bf16.msra.mxu1 %v9790_v34  ;;  %7676 = vmatprep.subr.bf16.mxu0 %v9795_v33  ;;  %v9858_v34 = vld [vmem:[%s10607_s6 + $0x72c] ss:$16 sps:$4 sm:$0xff]   ;;  %v9853_v33 = vld [vmem:[%s10607_s6 + $0x528] ss:$16 sps:$4 sm:$0xff]  }
 0x404   : > { %7717 = vmatprep.subr.bf16.mxu1 %v9798_v5  ;;  %v9856_v5 = vld [vmem:[%s10607_s6 + $0x728] ss:$16 sps:$4 sm:$0xff]  }
 0x406   : > { %7677 = vmatpush1.bf16.msra.mxu0 %v9793_v6  ;;  %v9861_v6 = vld [vmem:[%s10607_s6 + $0x54c] ss:$16 sps:$4 sm:$0xff]  }
 0x407   : > { %7718 = vmatpush1.bf16.msra.mxu1 %v9796_v7  ;;  %7728 = vmatprep.subr.bf16.mxu0 %v9801_v30  ;;  %v9864_v7 = vld [vmem:[%s10607_s6 + $0x74c] ss:$16 sps:$4 sm:$0xff]   ;;  %v9859_v30 = vld [vmem:[%s10607_s6 + $0x548] ss:$16 sps:$4 sm:$0xff]  }
 0x408   : > { %7769 = vmatprep.subr.bf16.mxu1 %v9804_v36  ;;  %v9862_v36 = vld [vmem:[%s10607_s6 + $0x748] ss:$16 sps:$4 sm:$0xff]  }
 0x409   : > { %7679 = vmatmul.mubr.bf16.vlgmr.msra.gmra.mrb[32].mxu0 %v11295_v28  ;;  %v9816_v28 = vld [vmem:[%s10607_s6 + $0x64c] ss:$16 sps:$4 sm:$0xff]  }
 0x40a   : > { %7720 = vmatmul.mubr.bf16.vlgmr.msra.gmra.mrb[32].mxu1 %v11298_v29  ;;  %7729 = vmatpush1.bf16.msra.mxu0 %v9799_v8  ;;  %v9811_v29 = vld [vmem:[%s10607_s6 + $0x448] ss:$16 sps:$4 sm:$0xff]   ;;  %v9867_v8 = vld [vmem:[%s10607_s6 + $0x56c] ss:$16 sps:$4 sm:$0xff]  }
 0x40b   : > { %7760 = vmatprep.mubr.bf16.mxu0 %v11301_v32  ;;  %7770 = vmatpush1.bf16.msra.mxu1 %v9802_v9  ;;  %v9819_v32 = vld [vmem:[%s10607_s6 + $0x46c] ss:$16 sps:$4 sm:$0xff]  }
 0x40c   : > { %7801 = vmatprep.mubr.bf16.mxu1 %v11305_v38  ;;  %7730 = vmatprep.subr.bf16.mxu0 %v9807_v15  ;;  %v9817_v38 = vld [vmem:[%s10607_s6 + $0x468] ss:$16 sps:$4 sm:$0xff]   ;;  %v9870_v9 = vld [vmem:[%s10607_s6 + $0x76c] ss:$16 sps:$4 sm:$0xff]  }
 0x40d   : > { %7771 = vmatprep.subr.bf16.mxu1 %v9810_v11  ;;  %v9865_v15 = vld [vmem:[%s10607_s6 + $0x568] ss:$16 sps:$4 sm:$0xff]  }
 0x40e   : > { %7731 = vmatpush1.bf16.msra.mxu0 %v9805_v19  ;;  %v9868_v11 = vld [vmem:[%s10607_s6 + $0x768] ss:$16 sps:$4 sm:$0xff]   ;;  %v9873_v19 = vld [vmem:[%s10607_s6 + $0x58c] ss:$16 sps:$4 sm:$0xff]  }
 0x40f   : > { %7772 = vmatpush1.bf16.msra.mxu1 %v9808_v12  ;;  %7732 = vmatprep.subr.bf16.mxu0 %v9813_v2  ;;  %v9876_v12 = vld [vmem:[%s10607_s6 + $0x78c] ss:$16 sps:$4 sm:$0xff]   ;;  %v9871_v2 = vld [vmem:[%s10607_s6 + $0x588] ss:$16 sps:$4 sm:$0xff]  }
 0x410   : > { %7773 = vmatprep.subr.bf16.mxu1 %v9816_v28  ;;  %v9874_v28 = vld [vmem:[%s10607_s6 + $0x788] ss:$16 sps:$4 sm:$0xff]  }
 0x412   : > { %7733 = vmatpush1.bf16.msra.mxu0 %v9811_v29  ;;  %v9879_v29 = vld [vmem:[%s10607_s6 + $0x5ac] ss:$16 sps:$4 sm:$0xff]  }
 0x413   : > { %7774 = vmatpush1.bf16.msra.mxu1 %v9814_v3  ;;  %7734 = vmatprep.subr.bf16.mxu0 %v9819_v32  ;;  %v9882_v3 = vld [vmem:[%s10607_s6 + $0x7ac] ss:$16 sps:$4 sm:$0xff]   ;;  %v9877_v32 = vld [vmem:[%s10607_s6 + $0x5a8] ss:$16 sps:$4 sm:$0xff]  }
 0x414   : > { %7775 = vmatprep.subr.bf16.mxu1 %v9822_v18  ;;  %v9880_v18 = vld [vmem:[%s10607_s6 + $0x7a8] ss:$16 sps:$4 sm:$0xff]  }
 0x416   : > { %7735 = vmatpush1.bf16.msra.mxu0 %v9817_v38  ;;  %v9885_v38 = vld [vmem:[%s10607_s6 + $0x5cc] ss:$16 sps:$4 sm:$0xff]  }
 0x417   : > { %7776 = vmatpush1.bf16.msra.mxu1 %v9820_v43  ;;  %7736 = vmatprep.subr.bf16.mxu0 %v9825_v25  ;;  %v9888_v43 = vld [vmem:[%s10607_s6 + $0x7cc] ss:$16 sps:$4 sm:$0xff]   ;;  %v9883_v25 = vld [vmem:[%s10607_s6 + $0x5c8] ss:$16 sps:$4 sm:$0xff]  }
 0x418   : > { %7777 = vmatprep.subr.bf16.mxu1 %v9828_v26  ;;  %v9886_v26 = vld [vmem:[%s10607_s6 + $0x7c8] ss:$16 sps:$4 sm:$0xff]  }
 0x41a   : > { %7737 = vmatpush1.bf16.msra.mxu0 %v9823_v20  ;;  %v9891_v20 = vld [vmem:[%s10607_s6 + $0x5ec] ss:$16 sps:$4 sm:$0xff]  }
 0x41b   : > { %7778 = vmatpush1.bf16.msra.mxu1 %v9826_v51  ;;  %7738 = vmatprep.subr.bf16.mxu0 %v9831_v45  ;;  %v9894_v51 = vld [vmem:[%s10607_s6 + $0x7ec] ss:$16 sps:$4 sm:$0xff]   ;;  %v9889_v45 = vld [vmem:[%s10607_s6 + $0x5e8] ss:$16 sps:$4 sm:$0xff]  }
 0x41c   : > { %v7434_v52 = vpop.f32.mrb[20].mxu0  ;;  %7779 = vmatprep.subr.bf16.mxu1 %v9834_v24  ;;  %v9892_v24 = vld [vmem:[%s10607_s6 + $0x7e8] ss:$16 sps:$4 sm:$0xff]  }
 0x41d   : > { %v7435_v47 = vadd.f32 %v7434_v52, %v11610_v10  ;;  %v7475_v62 = vpop.f32.mrb[20].mxu1  ;;  %v7436_v39 = vpop.f32.mrb[21].mxu0  ;;  %v9838_v10 = vld [vmem:[%s10607_s6 + $0x6c8] ss:$16 sps:$4 sm:$0xff]  }
 0x41e   : > { %v7437_v40 = vadd.f32 %v7436_v39, %v11613_v13  ;;  %v7477_v41 = vpop.f32.mrb[21].mxu1  ;;  %v7438_v58 = vpop.f32.mrb[22].mxu0  ;;  %7739 = vmatpush1.bf16.msra.mxu0 %v9829_v31  ;;  %v9897_v31 = vld [vmem:[%s10607_s6 + $0x80c] ss:$16 sps:$4 sm:$0xff]   ;;  %v9898_v52 = vld [vmem:[%s10607_s6 + $0xa08] ss:$16 sps:$4 sm:$0xff]  }
 0x41f   : > { %v11685_v4 = vadd.f32 %v7475_v62, %v7435_v47  ;;  %v7479_v46 = vpop.f32.mrb[22].mxu1  ;;  %7780 = vmatpush1.bf16.msra.mxu1 %v9832_v17  ;;  %v7439_v50 = vpop.f32.mrb[23].mxu0  ;;  %7740 = vmatprep.subr.bf16.mxu0 %v9837_v49  ;;  %v9900_v17 = vld [vmem:[%s10607_s6 + $0xa0c] ss:$16 sps:$4 sm:$0xff]   ;;  %v9895_v49 = vld [vmem:[%s10607_s6 + $0x808] ss:$16 sps:$4 sm:$0xff]  }
 0x420   : > { %v11689_v53 = vadd.f32 %v7477_v41, %v7437_v40  ;;  %v7480_v13 = vpop.f32.mrb[23].mxu1  ;;  %7781 = vmatprep.subr.bf16.mxu1 %v9840_v37  ;;  %v9903_v37 = vld [vmem:[%s10607_s6 + $0x82c] ss:$16 sps:$4 sm:$0xff]   ;;  %v9901_v62 = vld [vmem:[%s10607_s6 + $0x828] ss:$16 sps:$4 sm:$0xff]  }
 0x421   : > { %v9906_v47 = vld [vmem:[%s10607_s6 + $0xa2c] ss:$16 sps:$4 sm:$0xff]   ;;  %v9904_v39 = vld [vmem:[%s10607_s6 + $0xa28] ss:$16 sps:$4 sm:$0xff]  }
 0x422   : > { %7741 = vmatpush1.bf16.msra.mxu0 %v9835_v44  ;;  %v9909_v40 = vld [vmem:[%s10607_s6 + $0x84c] ss:$16 sps:$4 sm:$0xff]   ;;  %v9910_v41 = vld [vmem:[%s10607_s6 + $0xa48] ss:$16 sps:$4 sm:$0xff]  }
 0x423   : > { %7782 = vmatpush1.bf16.msra.mxu1 %v9838_v10  ;;  %7742 = vmatprep.subr.bf16.mxu0 %v9843_v48  ;;  %v9918_v58 = vld [vmem:[%s10607_s6 + $0xa6c] ss:$16 sps:$4 sm:$0xff]   ;;  %v9916_v44 = vld [vmem:[%s10607_s6 + $0xa68] ss:$16 sps:$4 sm:$0xff]  }
 0x424   : > { %7783 = vmatprep.subr.bf16.mxu1 %v9846_v54  ;;  %v9921_v46 = vld [vmem:[%s10607_s6 + $0x88c] ss:$16 sps:$4 sm:$0xff]   ;;  %v9919_v10 = vld [vmem:[%s10607_s6 + $0x888] ss:$16 sps:$4 sm:$0xff]  }
 0x425   : > { %v9924_v50 = vld [vmem:[%s10607_s6 + $0xa8c] ss:$16 sps:$4 sm:$0xff]   ;;  %v9922_v48 = vld [vmem:[%s10607_s6 + $0xa88] ss:$16 sps:$4 sm:$0xff]  }
 0x426   : > { %7743 = vmatpush1.bf16.msra.mxu0 %v9841_v61  ;;  %v9927_v13 = vld [vmem:[%s10607_s6 + $0x8ac] ss:$16 sps:$4 sm:$0xff]   ;;  %v9925_v61 = vld [vmem:[%s10607_s6 + $0x8a8] ss:$16 sps:$4 sm:$0xff]  }
 0x427   : > { %7784 = vmatpush1.bf16.msra.mxu1 %v9844_v55  ;;  %7744 = vmatprep.subr.bf16.mxu0 %v9849_v63  ;;  %v9930_v54 = vld [vmem:[%s10607_s6 + $0xaac] ss:$16 sps:$4 sm:$0xff]   ;;  %v9928_v55 = vld [vmem:[%s10607_s6 + $0xaa8] ss:$16 sps:$4 sm:$0xff]  }
 0x428   : > { %7785 = vmatprep.subr.bf16.mxu1 %v9852_v56  ;;  %v9933_v63 = vld [vmem:[%s10607_s6 + $0x8cc] ss:$16 sps:$4 sm:$0xff]  }
 0x42a   : > { %7745 = vmatpush1.bf16.msra.mxu0 %v9847_v57  ;;  %v9936_v57 = vld [vmem:[%s10607_s6 + $0xacc] ss:$16 sps:$4 sm:$0xff]  }
 0x42b   : > { %7786 = vmatpush1.bf16.msra.mxu1 %v9850_v60  ;;  %7746 = vmatprep.subr.bf16.mxu0 %v9855_v0 }
 0x42c   : > { %7787 = vmatprep.subr.bf16.mxu1 %v9858_v34 }
 0x42e   : > { %7747 = vmatpush1.bf16.msra.mxu0 %v9853_v33 }
 0x42f   : > { %7788 = vmatpush1.bf16.msra.mxu1 %v9856_v5  ;;  %7748 = vmatprep.subr.bf16.mxu0 %v9861_v6 }
 0x430   : > { %7789 = vmatprep.subr.bf16.mxu1 %v9864_v7  ;;  %v9931_v7 = vld [vmem:[%s10607_s6 + $0x8c8] ss:$16 sps:$4 sm:$0xff]  }
 0x432   : > { %7749 = vmatpush1.bf16.msra.mxu0 %v9859_v30 }
 0x433   : > { %7790 = vmatpush1.bf16.msra.mxu1 %v9862_v36  ;;  %7750 = vmatprep.subr.bf16.mxu0 %v9867_v8 }
 0x434   : > { %7791 = vmatprep.subr.bf16.mxu1 %v9870_v9  ;;  %v9939_v9 = vld [vmem:[%s10607_s6 + $0x8ec] ss:$16 sps:$4 sm:$0xff]  }
 0x436   : > { %7751 = vmatpush1.bf16.msra.mxu0 %v9865_v15 }
 0x437   : > { %7792 = vmatpush1.bf16.msra.mxu1 %v9868_v11  ;;  %7752 = vmatprep.subr.bf16.mxu0 %v9873_v19  ;;  %v9942_v11 = vld [vmem:[%s10607_s6 + $0xaec] ss:$16 sps:$4 sm:$0xff]   ;;  %v9937_v19 = vld [vmem:[%s10607_s6 + $0x8e8] ss:$16 sps:$4 sm:$0xff]  }
 0x438   : > { %7793 = vmatprep.subr.bf16.mxu1 %v9876_v12  ;;  %v9940_v12 = vld [vmem:[%s10607_s6 + $0xae8] ss:$16 sps:$4 sm:$0xff]  }
 0x43a   : > { %7753 = vmatpush1.bf16.msra.mxu0 %v9871_v2  ;;  %v9945_v2 = vld [vmem:[%s10607_s6 + $0x90c] ss:$16 sps:$4 sm:$0xff]  }
 0x43b   : > { %7794 = vmatpush1.bf16.msra.mxu1 %v9874_v28  ;;  %7754 = vmatprep.subr.bf16.mxu0 %v9879_v29  ;;  %v9948_v28 = vld [vmem:[%s10607_s6 + $0xb0c] ss:$16 sps:$4 sm:$0xff]   ;;  %v9943_v29 = vld [vmem:[%s10607_s6 + $0x908] ss:$16 sps:$4 sm:$0xff]  }
 0x43c   : > { %7795 = vmatprep.subr.bf16.mxu1 %v9882_v3  ;;  %v9946_v3 = vld [vmem:[%s10607_s6 + $0xb08] ss:$16 sps:$4 sm:$0xff]  }
 0x43e   : > { %7755 = vmatpush1.bf16.msra.mxu0 %v9877_v32  ;;  %v9951_v32 = vld [vmem:[%s10607_s6 + $0x92c] ss:$16 sps:$4 sm:$0xff]  }
 0x43f   : > { %7796 = vmatpush1.bf16.msra.mxu1 %v9880_v18  ;;  %7756 = vmatprep.subr.bf16.mxu0 %v9885_v38  ;;  %v9954_v18 = vld [vmem:[%s10607_s6 + $0xb2c] ss:$16 sps:$4 sm:$0xff]   ;;  %v9949_v38 = vld [vmem:[%s10607_s6 + $0x928] ss:$16 sps:$4 sm:$0xff]  }
 0x440   : > { %7797 = vmatprep.subr.bf16.mxu1 %v9888_v43  ;;  %v9952_v43 = vld [vmem:[%s10607_s6 + $0xb28] ss:$16 sps:$4 sm:$0xff]  }
 0x442   : > { %7757 = vmatpush1.bf16.msra.mxu0 %v9883_v25  ;;  %v9957_v25 = vld [vmem:[%s10607_s6 + $0x94c] ss:$16 sps:$4 sm:$0xff]  }
 0x443   : > { %7798 = vmatpush1.bf16.msra.mxu1 %v9886_v26  ;;  %7758 = vmatprep.subr.bf16.mxu0 %v9891_v20  ;;  %v9960_v26 = vld [vmem:[%s10607_s6 + $0xb4c] ss:$16 sps:$4 sm:$0xff]   ;;  %v9955_v20 = vld [vmem:[%s10607_s6 + $0x948] ss:$16 sps:$4 sm:$0xff]  }
 0x444   : > { %7799 = vmatprep.subr.bf16.mxu1 %v9894_v51  ;;  %v9958_v51 = vld [vmem:[%s10607_s6 + $0xb48] ss:$16 sps:$4 sm:$0xff]  }
 0x446   : > { %7759 = vmatpush1.bf16.msra.mxu0 %v9889_v45  ;;  %v9963_v45 = vld [vmem:[%s10607_s6 + $0x96c] ss:$16 sps:$4 sm:$0xff]  }
 0x447   : > { %7800 = vmatpush1.bf16.msra.mxu1 %v9892_v24  ;;  %7810 = vmatprep.subr.bf16.mxu0 %v9897_v31  ;;  %v9966_v24 = vld [vmem:[%s10607_s6 + $0xb6c] ss:$16 sps:$4 sm:$0xff]   ;;  %v9961_v31 = vld [vmem:[%s10607_s6 + $0x968] ss:$16 sps:$4 sm:$0xff]  }
 0x448   : > { %7851 = vmatprep.subr.bf16.mxu1 %v9900_v17  ;;  %v9964_v17 = vld [vmem:[%s10607_s6 + $0xb68] ss:$16 sps:$4 sm:$0xff]  }
 0x449   : > { %7761 = vmatmul.mubr.bf16.vlgmr.msra.gmra.mrb[36].mxu0 %v11401_v14  ;;  %v9912_v14 = vld [vmem:[%s10607_s6 + $0xa4c] ss:$16 sps:$4 sm:$0xff]  }
 0x44a   : > { %7802 = vmatmul.mubr.bf16.vlgmr.msra.gmra.mrb[36].mxu1 %v11404_v16  ;;  %7811 = vmatpush1.bf16.msra.mxu0 %v9895_v49  ;;  %v9907_v16 = vld [vmem:[%s10607_s6 + $0x848] ss:$16 sps:$4 sm:$0xff]   ;;  %v9969_v49 = vld [vmem:[%s10607_s6 + $0x98c] ss:$16 sps:$4 sm:$0xff]  }
 0x44b   : > { %7842 = vmatprep.mubr.bf16.mxu0 %v11407_v21  ;;  %7852 = vmatpush1.bf16.msra.mxu1 %v9898_v52  ;;  %v9915_v21 = vld [vmem:[%s10607_s6 + $0x86c] ss:$16 sps:$4 sm:$0xff]  }
 0x44c   : > { %7883 = vmatprep.mubr.bf16.mxu1 %v11411_v22  ;;  %7812 = vmatprep.subr.bf16.mxu0 %v9903_v37  ;;  %v9913_v22 = vld [vmem:[%s10607_s6 + $0x868] ss:$16 sps:$4 sm:$0xff]   ;;  %v9972_v52 = vld [vmem:[%s10607_s6 + $0xb8c] ss:$16 sps:$4 sm:$0xff]  }
 0x44d   : > { %7853 = vmatprep.subr.bf16.mxu1 %v9906_v47  ;;  %v9967_v37 = vld [vmem:[%s10607_s6 + $0x988] ss:$16 sps:$4 sm:$0xff]  }
 0x44e   : > { %7813 = vmatpush1.bf16.msra.mxu0 %v9901_v62  ;;  %v9970_v47 = vld [vmem:[%s10607_s6 + $0xb88] ss:$16 sps:$4 sm:$0xff]   ;;  %v9975_v62 = vld [vmem:[%s10607_s6 + $0x9ac] ss:$16 sps:$4 sm:$0xff]  }
 0x44f   : > { %7854 = vmatpush1.bf16.msra.mxu1 %v9904_v39  ;;  %7814 = vmatprep.subr.bf16.mxu0 %v9909_v40  ;;  %v9978_v39 = vld [vmem:[%s10607_s6 + $0xbac] ss:$16 sps:$4 sm:$0xff]   ;;  %v9973_v40 = vld [vmem:[%s10607_s6 + $0x9a8] ss:$16 sps:$4 sm:$0xff]  }
 0x450   : > { %7855 = vmatprep.subr.bf16.mxu1 %v9912_v14  ;;  %v9976_v14 = vld [vmem:[%s10607_s6 + $0xba8] ss:$16 sps:$4 sm:$0xff]  }
 0x452   : > { %7815 = vmatpush1.bf16.msra.mxu0 %v9907_v16  ;;  %v9981_v16 = vld [vmem:[%s10607_s6 + $0x9cc] ss:$16 sps:$4 sm:$0xff]  }
 0x453   : > { %7856 = vmatpush1.bf16.msra.mxu1 %v9910_v41  ;;  %7816 = vmatprep.subr.bf16.mxu0 %v9915_v21  ;;  %v9984_v41 = vld [vmem:[%s10607_s6 + $0xbcc] ss:$16 sps:$4 sm:$0xff]   ;;  %v9979_v21 = vld [vmem:[%s10607_s6 + $0x9c8] ss:$16 sps:$4 sm:$0xff]  }
 0x454   : > { %7857 = vmatprep.subr.bf16.mxu1 %v9918_v58  ;;  %v9982_v58 = vld [vmem:[%s10607_s6 + $0xbc8] ss:$16 sps:$4 sm:$0xff]  }
 0x456   : > { %7817 = vmatpush1.bf16.msra.mxu0 %v9913_v22  ;;  %v9987_v22 = vld [vmem:[%s10607_s6 + $0x9ec] ss:$16 sps:$4 sm:$0xff]  }
 0x457   : > { %7858 = vmatpush1.bf16.msra.mxu1 %v9916_v44  ;;  %7818 = vmatprep.subr.bf16.mxu0 %v9921_v46  ;;  %v9990_v44 = vld [vmem:[%s10607_s6 + $0xbec] ss:$16 sps:$4 sm:$0xff]   ;;  %v9985_v46 = vld [vmem:[%s10607_s6 + $0x9e8] ss:$16 sps:$4 sm:$0xff]  }
 0x458   : > { %7859 = vmatprep.subr.bf16.mxu1 %v9924_v50  ;;  %v9988_v50 = vld [vmem:[%s10607_s6 + $0xbe8] ss:$16 sps:$4 sm:$0xff]  }
 0x45a   : > { %7819 = vmatpush1.bf16.msra.mxu0 %v9919_v10  ;;  %v9993_v10 = vld [vmem:[%s10607_s6 + $0xc0c] ss:$16 sps:$4 sm:$0xff]  }
 0x45b   : > { %7860 = vmatpush1.bf16.msra.mxu1 %v9922_v48  ;;  %7820 = vmatprep.subr.bf16.mxu0 %v9927_v13  ;;  %v9996_v48 = vld [vmem:[%s10607_s6 + $0xe0c] ss:$16 sps:$4 sm:$0xff]   ;;  %v9991_v13 = vld [vmem:[%s10607_s6 + $0xc08] ss:$16 sps:$4 sm:$0xff]  }
 0x45c   : > { %v7516_v56 = vpop.f32.mrb[24].mxu0  ;;  %7861 = vmatprep.subr.bf16.mxu1 %v9930_v54  ;;  %v9994_v54 = vld [vmem:[%s10607_s6 + $0xe08] ss:$16 sps:$4 sm:$0xff]  }
 0x45d   : > { %v7517_v60 = vadd.f32 %v7516_v56, %v11685_v4  ;;  %v7557_v0 = vpop.f32.mrb[24].mxu1  ;;  %v7518_v34 = vpop.f32.mrb[25].mxu0  ;;  %v9934_v4 = vld [vmem:[%s10607_s6 + $0xac8] ss:$16 sps:$4 sm:$0xff]  }
 0x45e   : > { %v7519_v33 = vadd.f32 %v7518_v34, %v11689_v53  ;;  %v7559_v5 = vpop.f32.mrb[25].mxu1  ;;  %v7520_v6 = vpop.f32.mrb[26].mxu0  ;;  %7821 = vmatpush1.bf16.msra.mxu0 %v9925_v61  ;;  %v9999_v61 = vld [vmem:[%s10607_s6 + $0xc2c] ss:$16 sps:$4 sm:$0xff]   ;;  %v10000_v56 = vld [vmem:[%s10607_s6 + $0xe28] ss:$16 sps:$4 sm:$0xff]  }
 0x45f   : > { %v11759_v30 = vadd.f32 %v7557_v0, %v7517_v60  ;;  %v7561_v36 = vpop.f32.mrb[26].mxu1  ;;  %7862 = vmatpush1.bf16.msra.mxu1 %v9928_v55  ;;  %v7521_v8 = vpop.f32.mrb[27].mxu0  ;;  %7822 = vmatprep.subr.bf16.mxu0 %v9933_v63  ;;  %v10002_v55 = vld [vmem:[%s10607_s6 + $0xe2c] ss:$16 sps:$4 sm:$0xff]   ;;  %v9997_v63 = vld [vmem:[%s10607_s6 + $0xc28] ss:$16 sps:$4 sm:$0xff]  }
 0x460   : > { %v11763_v15 = vadd.f32 %v7559_v5, %v7519_v33  ;;  %v7562_v53 = vpop.f32.mrb[27].mxu1  ;;  %7863 = vmatprep.subr.bf16.mxu1 %v9936_v57  ;;  %v10005_v57 = vld [vmem:[%s10607_s6 + $0xc4c] ss:$16 sps:$4 sm:$0xff]   ;;  %v10006_v60 = vld [vmem:[%s10607_s6 + $0xe48] ss:$16 sps:$4 sm:$0xff]  }
 0x461   : > { %v10014_v0 = vld [vmem:[%s10607_s6 + $0xe6c] ss:$16 sps:$4 sm:$0xff]   ;;  %v10012_v34 = vld [vmem:[%s10607_s6 + $0xe68] ss:$16 sps:$4 sm:$0xff]  }
 0x462   : > { %7823 = vmatpush1.bf16.msra.mxu0 %v9931_v7  ;;  %v10017_v33 = vld [vmem:[%s10607_s6 + $0xc8c] ss:$16 sps:$4 sm:$0xff]   ;;  %v10015_v6 = vld [vmem:[%s10607_s6 + $0xc88] ss:$16 sps:$4 sm:$0xff]  }
 0x463   : > { %7864 = vmatpush1.bf16.msra.mxu1 %v9934_v4  ;;  %7824 = vmatprep.subr.bf16.mxu0 %v9939_v9  ;;  %v10020_v5 = vld [vmem:[%s10607_s6 + $0xe8c] ss:$16 sps:$4 sm:$0xff]   ;;  %v10018_v7 = vld [vmem:[%s10607_s6 + $0xe88] ss:$16 sps:$4 sm:$0xff]  }
 0x464   : > { %7865 = vmatprep.subr.bf16.mxu1 %v9942_v11  ;;  %v10023_v36 = vld [vmem:[%s10607_s6 + $0xcac] ss:$16 sps:$4 sm:$0xff]   ;;  %v10021_v4 = vld [vmem:[%s10607_s6 + $0xca8] ss:$16 sps:$4 sm:$0xff]  }
 0x465   : > { %v10026_v8 = vld [vmem:[%s10607_s6 + $0xeac] ss:$16 sps:$4 sm:$0xff]   ;;  %v10024_v9 = vld [vmem:[%s10607_s6 + $0xea8] ss:$16 sps:$4 sm:$0xff]  }
 0x466   : > { %7825 = vmatpush1.bf16.msra.mxu0 %v9937_v19  ;;  %v10029_v53 = vld [vmem:[%s10607_s6 + $0xccc] ss:$16 sps:$4 sm:$0xff]  }
 0x467   : > { %7866 = vmatpush1.bf16.msra.mxu1 %v9940_v12  ;;  %7826 = vmatprep.subr.bf16.mxu0 %v9945_v2  ;;  %v10032_v19 = vld [vmem:[%s10607_s6 + $0xecc] ss:$16 sps:$4 sm:$0xff]   ;;  %v4226_v2 = vld [vmem:[#allocation11] sm:$0xff] }
 0x468   : > { %7867 = vmatprep.subr.bf16.mxu1 %v9948_v28 }
 0x46a   : > { %7827 = vmatpush1.bf16.msra.mxu0 %v9943_v29 }
 0x46b   : > { %7868 = vmatpush1.bf16.msra.mxu1 %v9946_v3  ;;  %7828 = vmatprep.subr.bf16.mxu0 %v9951_v32 }
 0x46c   : > { %7869 = vmatprep.subr.bf16.mxu1 %v9954_v18 }
 0x46e   : > { %7829 = vmatpush1.bf16.msra.mxu0 %v9949_v38  ;;  %v10027_v38 = vld [vmem:[%s10607_s6 + $0xcc8] ss:$16 sps:$4 sm:$0xff]  }
 0x46f   : > { %7870 = vmatpush1.bf16.msra.mxu1 %v9952_v43  ;;  %7830 = vmatprep.subr.bf16.mxu0 %v9957_v25  ;;  %v10030_v43 = vld [vmem:[%s10607_s6 + $0xec8] ss:$16 sps:$4 sm:$0xff]  }
 0x470   : > { %7871 = vmatprep.subr.bf16.mxu1 %v9960_v26  ;;  %v4227_v26 = vld [vmem:[#allocation11 + $0x8] sm:$0xff] }
 0x472   : > { %7831 = vmatpush1.bf16.msra.mxu0 %v9955_v20 }
 0x473   : > { %7872 = vmatpush1.bf16.msra.mxu1 %v9958_v51  ;;  %7832 = vmatprep.subr.bf16.mxu0 %v9963_v45  ;;  %v10035_v51 = vld [vmem:[%s10607_s6 + $0xcec] ss:$16 sps:$4 sm:$0xff]  }
 0x474   : > { %7873 = vmatprep.subr.bf16.mxu1 %v9966_v24 }
 0x476   : > { %7833 = vmatpush1.bf16.msra.mxu0 %v9961_v31 }
 0x477   : > { %7874 = vmatpush1.bf16.msra.mxu1 %v9964_v17  ;;  %7834 = vmatprep.subr.bf16.mxu0 %v9969_v49  ;;  %v10033_v49 = vld [vmem:[%s10607_s6 + $0xce8] ss:$16 sps:$4 sm:$0xff]  }
 0x478   : > { %7875 = vmatprep.subr.bf16.mxu1 %v9972_v52  ;;  %v10036_v52 = vld [vmem:[%s10607_s6 + $0xee8] ss:$16 sps:$4 sm:$0xff]  }
 0x47a   : > { %7835 = vmatpush1.bf16.msra.mxu0 %v9967_v37  ;;  %v10041_v37 = vld [vmem:[%s10607_s6 + $0xd0c] ss:$16 sps:$4 sm:$0xff]  }
 0x47b   : > { %7876 = vmatpush1.bf16.msra.mxu1 %v9970_v47  ;;  %7836 = vmatprep.subr.bf16.mxu0 %v9975_v62  ;;  %v10044_v47 = vld [vmem:[%s10607_s6 + $0xf0c] ss:$16 sps:$4 sm:$0xff]   ;;  %v10039_v62 = vld [vmem:[%s10607_s6 + $0xd08] ss:$16 sps:$4 sm:$0xff]  }
 0x47c   : > { %7877 = vmatprep.subr.bf16.mxu1 %v9978_v39  ;;  %v10042_v39 = vld [vmem:[%s10607_s6 + $0xf08] ss:$16 sps:$4 sm:$0xff]  }
 0x47e   : > { %7837 = vmatpush1.bf16.msra.mxu0 %v9973_v40  ;;  %v10047_v40 = vld [vmem:[%s10607_s6 + $0xd2c] ss:$16 sps:$4 sm:$0xff]  }
 0x47f   : > { %7878 = vmatpush1.bf16.msra.mxu1 %v9976_v14  ;;  %7838 = vmatprep.subr.bf16.mxu0 %v9981_v16  ;;  %v10050_v14 = vld [vmem:[%s10607_s6 + $0xf2c] ss:$16 sps:$4 sm:$0xff]   ;;  %v10045_v16 = vld [vmem:[%s10607_s6 + $0xd28] ss:$16 sps:$4 sm:$0xff]  }
 0x480   : > { %7879 = vmatprep.subr.bf16.mxu1 %v9984_v41  ;;  %v10048_v41 = vld [vmem:[%s10607_s6 + $0xf28] ss:$16 sps:$4 sm:$0xff]  }
 0x482   : > { %7839 = vmatpush1.bf16.msra.mxu0 %v9979_v21  ;;  %v10053_v21 = vld [vmem:[%s10607_s6 + $0xd4c] ss:$16 sps:$4 sm:$0xff]  }
 0x483   : > { %7880 = vmatpush1.bf16.msra.mxu1 %v9982_v58  ;;  %7840 = vmatprep.subr.bf16.mxu0 %v9987_v22  ;;  %v10056_v58 = vld [vmem:[%s10607_s6 + $0xf4c] ss:$16 sps:$4 sm:$0xff]   ;;  %v10051_v22 = vld [vmem:[%s10607_s6 + $0xd48] ss:$16 sps:$4 sm:$0xff]  }
 0x484   : > { %7881 = vmatprep.subr.bf16.mxu1 %v9990_v44  ;;  %v10054_v44 = vld [vmem:[%s10607_s6 + $0xf48] ss:$16 sps:$4 sm:$0xff]  }
 0x486   : > { %7841 = vmatpush1.bf16.msra.mxu0 %v9985_v46  ;;  %v10059_v46 = vld [vmem:[%s10607_s6 + $0xd6c] ss:$16 sps:$4 sm:$0xff]  }
 0x487   : > { %7882 = vmatpush1.bf16.msra.mxu1 %v9988_v50  ;;  %7892 = vmatprep.subr.bf16.mxu0 %v9993_v10  ;;  %v10062_v50 = vld [vmem:[%s10607_s6 + $0xf6c] ss:$16 sps:$4 sm:$0xff]   ;;  %v10057_v10 = vld [vmem:[%s10607_s6 + $0xd68] ss:$16 sps:$4 sm:$0xff]  }
 0x488   : > { %7933 = vmatprep.subr.bf16.mxu1 %v9996_v48  ;;  %v10060_v48 = vld [vmem:[%s10607_s6 + $0xf68] ss:$16 sps:$4 sm:$0xff]  }
 0x489   : > { %7843 = vmatmul.mubr.bf16.vlgmr.msra.gmra.mrb[40].mxu0 %v11485_v1  ;;  %v10008_v1 = vld [vmem:[%s10607_s6 + $0xe4c] ss:$16 sps:$4 sm:$0xff]  }
 0x48a   : > { %7884 = vmatmul.mubr.bf16.vlgmr.msra.gmra.mrb[40].mxu1 %v11489_v59  ;;  %7893 = vmatpush1.bf16.msra.mxu0 %v9991_v13  ;;  %v10003_v59 = vld [vmem:[%s10607_s6 + $0xc48] ss:$16 sps:$4 sm:$0xff]   ;;  %v10065_v13 = vld [vmem:[%s10607_s6 + $0xd8c] ss:$16 sps:$4 sm:$0xff]  }
 0x48b   : > { %7924 = vmatprep.mubr.bf16.mxu0 %v11528_v35  ;;  %7934 = vmatpush1.bf16.msra.mxu1 %v9994_v54  ;;  %v10011_v35 = vld [vmem:[%s10607_s6 + $0xc6c] ss:$16 sps:$4 sm:$0xff]  }
 0x48c   : > { %7965 = vmatprep.mubr.bf16.mxu1 %v11531_v23  ;;  %7894 = vmatprep.subr.bf16.mxu0 %v9999_v61  ;;  %v10009_v23 = vld [vmem:[%s10607_s6 + $0xc68] ss:$16 sps:$4 sm:$0xff]   ;;  %v10068_v54 = vld [vmem:[%s10607_s6 + $0xf8c] ss:$16 sps:$4 sm:$0xff]  }
 0x48d   : > { %7935 = vmatprep.subr.bf16.mxu1 %v10002_v55  ;;  %v10063_v61 = vld [vmem:[%s10607_s6 + $0xd88] ss:$16 sps:$4 sm:$0xff]  }
 0x48e   : > { %7895 = vmatpush1.bf16.msra.mxu0 %v9997_v63  ;;  %v10066_v55 = vld [vmem:[%s10607_s6 + $0xf88] ss:$16 sps:$4 sm:$0xff]   ;;  %v10071_v63 = vld [vmem:[%s10607_s6 + $0xdac] ss:$16 sps:$4 sm:$0xff]  }
 0x48f   : > { %7936 = vmatpush1.bf16.msra.mxu1 %v10000_v56  ;;  %7896 = vmatprep.subr.bf16.mxu0 %v10005_v57  ;;  %v10074_v56 = vld [vmem:[%s10607_s6 + $0xfac] ss:$16 sps:$4 sm:$0xff]   ;;  %v10069_v57 = vld [vmem:[%s10607_s6 + $0xda8] ss:$16 sps:$4 sm:$0xff]  }
 0x490   : > { %7937 = vmatprep.subr.bf16.mxu1 %v10008_v1  ;;  %v10072_v1 = vld [vmem:[%s10607_s6 + $0xfa8] ss:$16 sps:$4 sm:$0xff]  }
 0x492   : > { %7897 = vmatpush1.bf16.msra.mxu0 %v10003_v59  ;;  %v10077_v59 = vld [vmem:[%s10607_s6 + $0xdcc] ss:$16 sps:$4 sm:$0xff]  }
 0x493   : > { %7938 = vmatpush1.bf16.msra.mxu1 %v10006_v60  ;;  %7898 = vmatprep.subr.bf16.mxu0 %v10011_v35  ;;  %v10080_v60 = vld [vmem:[%s10607_s6 + $0xfcc] ss:$16 sps:$4 sm:$0xff]   ;;  %v10075_v35 = vld [vmem:[%s10607_s6 + $0xdc8] ss:$16 sps:$4 sm:$0xff]  }
 0x494   : > { %7939 = vmatprep.subr.bf16.mxu1 %v10014_v0  ;;  %v10078_v0 = vld [vmem:[%s10607_s6 + $0xfc8] ss:$16 sps:$4 sm:$0xff]  }
 0x496   : > { %7899 = vmatpush1.bf16.msra.mxu0 %v10009_v23  ;;  %v10083_v23 = vld [vmem:[%s10607_s6 + $0xdec] ss:$16 sps:$4 sm:$0xff]  }
 0x497   : > { %7940 = vmatpush1.bf16.msra.mxu1 %v10012_v34  ;;  %7900 = vmatprep.subr.bf16.mxu0 %v10017_v33  ;;  %v10086_v34 = vld [vmem:[%s10607_s6 + $0xfec] ss:$16 sps:$4 sm:$0xff]   ;;  %v10081_v33 = vld [vmem:[%s10607_s6 + $0xde8] ss:$16 sps:$4 sm:$0xff]  }
 0x498   : > { %7941 = vmatprep.subr.bf16.mxu1 %v10020_v5  ;;  %v10084_v5 = vld [vmem:[%s10607_s6 + $0xfe8] ss:$16 sps:$4 sm:$0xff]  }
 0x49a   : > { %7901 = vmatpush1.bf16.msra.mxu0 %v10015_v6 }
 0x49b   : > { %7942 = vmatpush1.bf16.msra.mxu1 %v10018_v7  ;;  %7902 = vmatprep.subr.bf16.mxu0 %v10023_v36 }
 0x49c   : > { %v7598_v11 = vpop.f32.mrb[28].mxu0  ;;  %7943 = vmatprep.subr.bf16.mxu1 %v10026_v8 }
 0x49d   : > { %v7599_v12 = vadd.f32 %v7598_v11, %v11759_v30  ;;  %v7639_v28 = vpop.f32.mrb[28].mxu1  ;;  %v7600_v29 = vpop.f32.mrb[29].mxu0 }
 0x49e   : > { %v7601_v3 = vadd.f32 %v7600_v29, %v11763_v15  ;;  %v7641_v32 = vpop.f32.mrb[29].mxu1  ;;  %v7602_v18 = vpop.f32.mrb[30].mxu0  ;;  %7903 = vmatpush1.bf16.msra.mxu0 %v10021_v4  ;;  %v10038_v15 = vld [vmem:[%s10607_s6 + $0xeec] ss:$16 sps:$4 sm:$0xff]  }
 0x49f   : > { %v7640_v25 = vadd.f32 %v7639_v28, %v7599_v12  ;;  %v7643_v20 = vpop.f32.mrb[30].mxu1  ;;  %7944 = vmatpush1.bf16.msra.mxu1 %v10024_v9  ;;  %v7603_v30 = vpop.f32.mrb[31].mxu0  ;;  %7904 = vmatprep.subr.bf16.mxu0 %v10029_v53 }
 0x4a0   : > { %v7642_v45 = vadd.f32 %v7641_v32, %v7601_v3  ;;  %v7644_v24 = vpop.f32.mrb[31].mxu1  ;;  %7945 = vmatprep.subr.bf16.mxu1 %v10032_v19 }
 0x4a1   : > { %v7974_v31 = vadd.f32 %v7640_v25, %v4226_v2 }
 0x4a2   : > { %v7975_v17 = vadd.f32 %v7642_v45, %v4227_v26  ;;  %7905 = vmatpush1.bf16.msra.mxu0 %v10027_v38 }
 0x4a3   : > { %7978 = vst [vmem:[#allocation11] sm:$0xff] %v7974_v31  ;;  %7946 = vmatpush1.bf16.msra.mxu1 %v10030_v43  ;;  %7906 = vmatprep.subr.bf16.mxu0 %v10035_v51 }
 0x4a4   : > { %7979 = vst [vmem:[#allocation11 + $0x8] sm:$0xff] %v7975_v17  ;;  %7947 = vmatprep.subr.bf16.mxu1 %v10038_v15 }
 0x4a6   : > { %7907 = vmatpush1.bf16.msra.mxu0 %v10033_v49 }
 0x4a7   : > { %7948 = vmatpush1.bf16.msra.mxu1 %v10036_v52  ;;  %7908 = vmatprep.subr.bf16.mxu0 %v10041_v37 }
 0x4a8   : > { %7949 = vmatprep.subr.bf16.mxu1 %v10044_v47 }
 0x4aa   : > { %7909 = vmatpush1.bf16.msra.mxu0 %v10039_v62 }
 0x4ab   : > { %7950 = vmatpush1.bf16.msra.mxu1 %v10042_v39  ;;  %7910 = vmatprep.subr.bf16.mxu0 %v10047_v40 }
 0x4ac   : > { %7951 = vmatprep.subr.bf16.mxu1 %v10050_v14 }
 0x4ae   : > { %7911 = vmatpush1.bf16.msra.mxu0 %v10045_v16  ;;  %v4228_v16 = vld [vmem:[#allocation11 + $0x10] sm:$0xff] }
 0x4af   : > { %7952 = vmatpush1.bf16.msra.mxu1 %v10048_v41  ;;  %7912 = vmatprep.subr.bf16.mxu0 %v10053_v21 }
 0x4b0   : > { %7953 = vmatprep.subr.bf16.mxu1 %v10056_v58 }
 0x4b2   : > { %7913 = vmatpush1.bf16.msra.mxu0 %v10051_v22 }
 0x4b3   : > { %7954 = vmatpush1.bf16.msra.mxu1 %v10054_v44  ;;  %7914 = vmatprep.subr.bf16.mxu0 %v10059_v46  ;;  %v4229_v44 = vld [vmem:[#allocation11 + $0x18] sm:$0xff] }
 0x4b4   : > { %7955 = vmatprep.subr.bf16.mxu1 %v10062_v50 }
 0x4b6   : > { %7915 = vmatpush1.bf16.msra.mxu0 %v10057_v10 }
 0x4b7   : > { %7956 = vmatpush1.bf16.msra.mxu1 %v10060_v48  ;;  %7916 = vmatprep.subr.bf16.mxu0 %v10065_v13 }
 0x4b8   : > { %7957 = vmatprep.subr.bf16.mxu1 %v10068_v54 }
 0x4ba   : > { %7917 = vmatpush1.bf16.msra.mxu0 %v10063_v61 }
 0x4bb   : > { %7958 = vmatpush1.bf16.msra.mxu1 %v10066_v55  ;;  %7918 = vmatprep.subr.bf16.mxu0 %v10071_v63 }
 0x4bc   : > { %7959 = vmatprep.subr.bf16.mxu1 %v10074_v56 }
 0x4be   : > { %7919 = vmatpush1.bf16.msra.mxu0 %v10069_v57 }
 0x4bf   : > { %7960 = vmatpush1.bf16.msra.mxu1 %v10072_v1  ;;  %7920 = vmatprep.subr.bf16.mxu0 %v10077_v59 }
 0x4c0   : > { %7961 = vmatprep.subr.bf16.mxu1 %v10080_v60 }
 0x4c2   : > { %7921 = vmatpush1.bf16.msra.mxu0 %v10075_v35 }
 0x4c3   : > { %7962 = vmatpush1.bf16.msra.mxu1 %v10078_v0  ;;  %7922 = vmatprep.subr.bf16.mxu0 %v10083_v23 }
 0x4c4   : > { %7963 = vmatprep.subr.bf16.mxu1 %v10086_v34 }
 0x4c6   : > { %7923 = vmatpush1.bf16.msra.mxu0 %v10081_v33 }
 0x4c7   : > { %7964 = vmatpush1.bf16.msra.mxu1 %v10084_v5 }
 0x4c9   : > { %7925 = vmatmul.mubr.bf16.vlgmr.msra.gmra.mrb[44].mxu0 %v11579_v27 }
 0x4ca   : > { %7966 = vmatmul.mubr.bf16.vlgmr.msra.gmra.mrb[44].mxu1 %v11582_v42 }
 0x4dc   : > { %v7680_v6 = vpop.f32.mrb[32].mxu0 }
 0x4dd   : > { %v7721_v7 = vpop.f32.mrb[32].mxu1  ;;  %v7682_v36 = vpop.f32.mrb[33].mxu0 }
 0x4de   : > { %v7722_v8 = vadd.f32 %v7721_v7, %v7680_v6  ;;  %v7723_v4 = vpop.f32.mrb[33].mxu1  ;;  %v7684_v9 = vpop.f32.mrb[34].mxu0 }
 0x4df   : > { %v7724_v53 = vadd.f32 %v7723_v4, %v7682_v36  ;;  %v7725_v11 = vpop.f32.mrb[34].mxu1  ;;  %v7685_v19 = vpop.f32.mrb[35].mxu0 }
 0x4e0   : > { %v7726_v12 = vpop.f32.mrb[35].mxu1 }
 0x51c   : > { %v7762_v2 = vpop.f32.mrb[36].mxu0 }
 0x51d   : > { %v7763_v28 = vadd.f32 %v7762_v2, %v7722_v8  ;;  %v7803_v29 = vpop.f32.mrb[36].mxu1  ;;  %v7764_v3 = vpop.f32.mrb[37].mxu0 }
 0x51e   : > { %v7765_v32 = vadd.f32 %v7764_v3, %v7724_v53  ;;  %v7805_v18 = vpop.f32.mrb[37].mxu1  ;;  %v7766_v38 = vpop.f32.mrb[38].mxu0 }
 0x51f   : > { %v7804_v27 = vadd.f32 %v7803_v29, %v7763_v28  ;;  %v7807_v43 = vpop.f32.mrb[38].mxu1  ;;  %v7767_v42 = vpop.f32.mrb[39].mxu0 }
 0x520   : > { %v7806_v25 = vadd.f32 %v7805_v18, %v7765_v32  ;;  %v7808_v26 = vpop.f32.mrb[39].mxu1 }
 0x55c   : > { %v7844_v20 = vpop.f32.mrb[40].mxu0 }
 0x55d   : > { %v7845_v30 = vadd.f32 %v7844_v20, %v7804_v27  ;;  %v7885_v51 = vpop.f32.mrb[40].mxu1  ;;  %v7846_v45 = vpop.f32.mrb[41].mxu0 }
 0x55e   : > { %v7847_v24 = vadd.f32 %v7846_v45, %v7806_v25  ;;  %v7887_v15 = vpop.f32.mrb[41].mxu1  ;;  %v7848_v31 = vpop.f32.mrb[42].mxu0 }
 0x55f   : > { %v7886_v17 = vadd.f32 %v7885_v51, %v7845_v30  ;;  %v7889_v49 = vpop.f32.mrb[42].mxu1  ;;  %v7849_v52 = vpop.f32.mrb[43].mxu0 }
 0x560   : > { %v7888_v37 = vadd.f32 %v7887_v15, %v7847_v24  ;;  %v7890_v47 = vpop.f32.mrb[43].mxu1 }
 0x59c   : > { %v7926_v62 = vpop.f32.mrb[44].mxu0 }
 0x59d   : > { %v7927_v39 = vadd.f32 %v7926_v62, %v7886_v17  ;;  %v7967_v40 = vpop.f32.mrb[44].mxu1  ;;  %v7928_v14 = vpop.f32.mrb[45].mxu0 }
 0x59e   : > { %v7929_v41 = vadd.f32 %v7928_v14, %v7888_v37  ;;  %v7969_v21 = vpop.f32.mrb[45].mxu1  ;;  %v7930_v58 = vpop.f32.mrb[46].mxu0 }
 0x59f   : > { %v7968_v22 = vadd.f32 %v7967_v40, %v7927_v39  ;;  %v7971_v46 = vpop.f32.mrb[46].mxu1  ;;  %v7931_v50 = vpop.f32.mrb[47].mxu0 }
 0x5a0   : > { %v7970_v10 = vadd.f32 %v7969_v21, %v7929_v41  ;;  %v7972_v48 = vpop.f32.mrb[47].mxu1 }
 0x5a1   : > { %v7976_v13 = vadd.f32 %v7968_v22, %v4228_v16 }
 0x5a2   : > { %v7977_v54 = vadd.f32 %v7970_v10, %v4229_v44 }
 0x5a3   : > { %7980 = vst [vmem:[#allocation11 + $0x10] sm:$0xff] %v7976_v13 }
 0x5a4   : > { %7981 = vst [vmem:[#allocation11 + $0x18] sm:$0xff] %v7977_v54 }
 0x5a5   : > { %10246 = shalt.err (!%p10243_p13)
}
 0x5a6   : > { %s11961_s10 = sld [smem:[#allocation22_spill]] }
 0x5ac   : > { %s10247_s30 = scalar_lea.hbm %s11961_s10, 512 }
 0x5ad   : > { %p10248_p3 = scmp.ne.s32.totalorder %s11961_s10, %s10247_s30  ;;  %p10253_p9 = scmp.lt.u32.totalorder %s10247_s30, %s11961_s10 }
 0x5af   : > { %p10249_p1 = pnand %p10248_p3, %p9261_p12 }
 0x5b1   : > { %p10250_p4 = pneg %p10249_p1 }
 0x5b3   : > { %p10255_p5 = pnand %p10253_p9, %p10250_p4 }
 0x5b5   : > { %10258 = shalt.err (!%p10255_p5)
}
 0x5b6   : > { %9236 = dma.vmem_to_hbm [thread:$0]  (%p9261_p12), %s7993_s14, 512, %s11961_s10, [#allocation4]  }
 0x5b7   : > { %10300 = dma.done.wait (%p9261_p12), [#allocation4], 512  }
 0x5b8   : > { %10302 = vsyncadd (%p9261_p12), [#allocation4], 4294966784 }
 0x5b9 PF: > { %s23_s23 = sadd.s32 1, %s10325_s23   ;;  %s11962_s9 = sld [smem:[#allocation19_spill]] }
 0x5ba   : > { %p20_p2 = scmp.ge.s32.totalorder %s23_s23, 4   ;;  %s11963_s4 = sld [smem:[#allocation18_spill]] }
 0x5bb   : > { %s11964_s18 = smov %s10309_s19  ;;  %s11965_s19 = smov %s10313_s20 }
 0x5bc   : > { %s11967_s21 = smov %s10321_s22  ;;  %22 = sbr.rel (!%p20_p2) target bundleno = 12 (0xc), region = 116 }
 0x5bf   : > { %s11966_s20 = smov %s11962_s9 }
 0x5c0   : > { %s11968_s22 = smov %s11963_s4 }
 0x5c3   :  { %8005 = vsyncpa [#allocation3], 1 }
 0x5c4   :  { %8007 = vsyncpa [#allocation3 + $0x1], 1 }
 0x5c5   :  { %8008 = vsyncpa [#allocation6], 1 }
 0x5c6   :  { %8010 = vsyncpa [#allocation6 + $0x1], 1 }
 0x5c7   :  { %8011 = vsyncpa [#allocation9], 1 }
 0x5c8   :  { %8013 = vsyncpa [#allocation9 + $0x1], 1 }
 0x5c9   :  { %8014 = vsyncpa [#allocation4], 1 }
 0x5ca   :  { %8016 = vsyncpa [#allocation4 + $0x1], 1 }

</bundles_post_ra>
